<compile_context>
chip_gen: v7x
topology: tpu7x:2x2x1
jax: 0.10.0
libtpu: 0.0.40
codegen_flags: <defaults>
</compile_context>

<pallas_src>
import math

import jax
import jax.numpy as jnp
from jax.experimental import pallas as pl
from jax.experimental.pallas import tpu as pltpu


# Row indices into the packed (n_vec, E) parameter-vector slab.
_R_SA_BQ, _R_SA_BK, _R_SA_BV = 0, 1, 2
_R_SA_BO = 3
_R_LN1_G, _R_LN1_B = 4, 5
_R_CA_BQ, _R_CA_BK, _R_CA_BV = 6, 7, 8
_R_CA_BO = 9
_R_LN2_G, _R_LN2_B = 10, 11
_R_B2 = 12
_R_LN3_G, _R_LN3_B = 13, 14
_R_LNF_G, _R_LNF_B = 15, 16        # only present when the final norm is fused


# ----------------------------------------------------------------------------
# Fused decoder-layer kernel (one grid step == one batch GROUP)
# ----------------------------------------------------------------------------

def _make_layer_kernel(nhead, bg, L, S, has_tgt_mask, has_mem_mask,
                       has_final_norm, mxu_dtype, eps=1e-5):
    """Self-attn -> cross-attn -> FFN, post-norm, fully fused in one kernel."""

    def kernel(*refs):
        it = iter(refs)
        tgt_ref = next(it)                               # (bg*L, E) f32
        mem_ref = next(it)                               # (bg*S, E) f32
        tm_ref = next(it) if has_tgt_mask else None      # (L, L) additive
        mm_ref = next(it) if has_mem_mask else None      # (L, S) additive
        wqkv_ref = next(it)                              # (E, 3E)   mxu dtype
        sa_wo_ref = next(it)                             # (E, E)
        ca_wq_ref = next(it)                             # (E, E)
        ca_wkv_ref = next(it)                            # (E, 2E)
        ca_wo_ref = next(it)                             # (E, E)
        w1_ref = next(it)                                # (E, F)
        w2_ref = next(it)                                # (F, E)
        vec_ref = next(it)                               # (n_vec, E) f32
        b1_ref = next(it)                                # (1, F)     f32
        o_ref = next(it)                                 # (bg*L, E)
        attn_scratch = next(it)                          # VMEM (bg*L, E) f32

        x = tgt_ref[...].astype(jnp.float32)             # (M, E)
        mem = mem_ref[...].astype(jnp.float32)           # (Mk, E)
        vec = vec_ref[...]                               # (n_vec, E) f32

        E = x.shape[1]
        Dh = E // nhead
        scale = 1.0 / math.sqrt(Dh)

        def row(i):                                      # (1, E) broadcast row
            return vec[i:i + 1, :]

        def mm(a, w_ref, b=None):
            # bf16 (or configured) MXU operands, f32 accumulation.
            r = jnp.dot(a.astype(mxu_dtype), w_ref[...],
                        preferred_element_type=jnp.float32)
            return r if b is None else r + b

        def ln(z, gi, bi):                               # f32 elementwise
            mu = jnp.mean(z, axis=-1, keepdims=True)
            var = jnp.mean((z - mu) ** 2, axis=-1, keepdims=True)
            return (z - mu) * jax.lax.rsqrt(var + eps) * row(gi) + row(bi)

        def attn(q, k, v, Lq, Lk, wo_ref, bo_row, mask_ref):
            # q: (bg*Lq, E), k/v: (bg*Lk, E).  Scores are block-diagonal over
            # the batch group -> small static loop over batches and heads.
            # Each head's (Lq, Dh) output is stored at its final (row, lane)
            # position in the VMEM scratch, so the concatenated (bg*Lq, E)
            # head outputs feed ONE full-E output projection.
            mask = mask_ref[...] if mask_ref is not None else None  # hoisted
            for b in range(bg):
                qb = q[b * Lq:(b + 1) * Lq, :]
                kb = k[b * Lk:(b + 1) * Lk, :]
                vb = v[b * Lk:(b + 1) * Lk, :]
                for h in range(nhead):
                    sl = slice(h * Dh, (h + 1) * Dh)
                    s = jax.lax.dot_general(
                        qb[:, sl].astype(mxu_dtype),
                        kb[:, sl].astype(mxu_dtype),
                        (((1,), (1,)), ((), ())),
                        preferred_element_type=jnp.float32) * scale  # (Lq,Lk)
                    if mask is not None:
                        s = s + mask
                    m = jnp.max(s, axis=-1, keepdims=True)
                    p = jnp.exp(s - m)
                    denom = jnp.sum(p, axis=-1, keepdims=True)
                    p = p * pl.reciprocal(denom, approx=True)        # EUP slot
                    oh = jnp.dot(p.astype(mxu_dtype),
                                 vb[:, sl].astype(mxu_dtype),
                                 preferred_element_type=jnp.float32)  # (Lq,Dh)
                    attn_scratch[b * Lq:(b + 1) * Lq, sl] = oh
            # one (bg*Lq, E) @ (E, E) output projection for all heads/batches
            return mm(attn_scratch[...], wo_ref, bo_row)

        # ---- self-attention + residual + norm1 ----
        qkv = mm(x, wqkv_ref)                                        # (M, 3E)
        q = qkv[:, :E] + row(_R_SA_BQ)
        k = qkv[:, E:2 * E] + row(_R_SA_BK)
        v = qkv[:, 2 * E:] + row(_R_SA_BV)
        sa = attn(q, k, v, L, L, sa_wo_ref, row(_R_SA_BO), tm_ref)
        x1 = ln(x + sa, _R_LN1_G, _R_LN1_B)

        # ---- cross-attention + residual + norm2 ----
        qc = mm(x1, ca_wq_ref, row(_R_CA_BQ))
        kvc = mm(mem, ca_wkv_ref)                                    # (Mk, 2E)
        kc = kvc[:, :E] + row(_R_CA_BK)
        vc = kvc[:, E:] + row(_R_CA_BV)
        ca = attn(qc, kc, vc, L, S, ca_wo_ref, row(_R_CA_BO), mm_ref)
        x2 = ln(x1 + ca, _R_LN2_G, _R_LN2_B)

        # ---- feed-forward + residual + norm3 ----
        h1 = jnp.maximum(mm(x2, w1_ref, b1_ref[...]), 0.0)           # (M, F)
        y = mm(h1, w2_ref, row(_R_B2))                               # (M, E)
        x3 = ln(x2 + y, _R_LN3_G, _R_LN3_B)

        # ---- optional final decoder norm (fused) ----
        if has_final_norm:
            x3 = ln(x3, _R_LNF_G, _R_LNF_B)

        o_ref[...] = x3.astype(o_ref.dtype)

    return kernel


# ----------------------------------------------------------------------------
# Parameter packing + pallas_call wrapper
# ----------------------------------------------------------------------------

def _pack_layer_params(p, final_norm, mxu_dtype):
    """Pack tiny vectors into one (n_vec, E) slab; cast weights to MXU dtype."""
    E = p["sa_wo"].shape[0]
    rows = [
        p["sa_bqkv"][:E], p["sa_bqkv"][E:2 * E], p["sa_bqkv"][2 * E:],
        p["sa_bo"],
        p["ln1_g"], p["ln1_b"],
        p["ca_bq"], p["ca_bkv"][:E], p["ca_bkv"][E:],
        p["ca_bo"],
        p["ln2_g"], p["ln2_b"],
        p["b2"], p["ln3_g"], p["ln3_b"],
    ]
    if final_norm is not None:
        rows += [final_norm[0], final_norm[1]]
    vec = jnp.stack([jnp.asarray(r, jnp.float32) for r in rows], axis=0)
    weights = [p["sa_wqkv"], p["sa_wo"], p["ca_wq"], p["ca_wkv"],
               p["ca_wo"], p["w1"], p["w2"]]
    weights = [jnp.asarray(w, mxu_dtype) for w in weights]
    b1 = jnp.asarray(p["b1"], jnp.float32).reshape(1, -1)
    return weights, vec, b1


def _fused_decoder_layer(tgt, memory, p, tgt_mask, memory_mask, nhead,
                         final_norm=None, mxu_dtype=jnp.bfloat16):
    B, L, E = tgt.shape
    S = memory.shape[1]
    F = p["w1"].shape[1]
    assert E % nhead == 0

    has_tm = tgt_mask is not None
    has_mm = memory_mask is not None
    has_fn = final_norm is not None

    # Batch grouping: fold as many batches as possible into the matmul M
    # dimension.  At realistic sizes keep two "parallel" grid steps so both
    # v7x TensorCores get work; at toy sizes a single fully-folded step wins
    # (better MXU fill, fewer ~0.35 us grid steps).
    if B % 2 == 0 and B * L >= 256 and ((B // 2) * L) % 8 == 0:
        num_groups = 2
    else:
        num_groups = 1
    bg = B // num_groups
    M, Mk = bg * L, bg * S

    # 2-D activation slabs (leading dims folded by the wrapper, not in-kernel).
    x2d = tgt.reshape(B * L, E)
    mem2d = memory.reshape(B * S, E)

    weights, vec, b1 = _pack_layer_params(p, final_norm, mxu_dtype)

    def const_spec(shape):
        nd = len(shape)
        return pl.BlockSpec(shape, lambda g, _nd=nd: (0,) * _nd)

    args = [x2d, mem2d]
    in_specs = [
        pl.BlockSpec((M, E), lambda g: (g, 0)),
        pl.BlockSpec((Mk, E), lambda g: (g, 0)),
    ]
    if has_tm:
        args.append(jnp.asarray(tgt_mask, jnp.float32))
        in_specs.append(const_spec((L, L)))
    if has_mm:
        args.append(jnp.asarray(memory_mask, jnp.float32))
        in_specs.append(const_spec((L, S)))
    for w in weights:
        args.append(w)
        in_specs.append(const_spec(w.shape))
    args.append(vec)
    in_specs.append(const_spec(vec.shape))
    args.append(b1)
    in_specs.append(const_spec(b1.shape))

    kernel = _make_layer_kernel(nhead, bg, L, S, has_tm, has_mm, has_fn,
                                mxu_dtype)

    # Advisory cost hint for XLA scheduling around the custom call.
    BL, BS = B * L, B * S
    flops = (2 * BL * E * 3 * E        # self qkv proj
             + 4 * BL * L * E          # self scores + pv
             + 2 * BL * E * E          # self out proj
             + 2 * BL * E * E          # cross q proj
             + 2 * BS * E * 2 * E      # cross kv proj
             + 4 * BL * S * E          # cross scores + pv
             + 2 * BL * E * E          # cross out proj
             + 4 * BL * E * F)         # ffn
    transcendentals = B * nhead * L * (L + S) + 8 * BL
    bytes_accessed = int(4 * (x2d.size + mem2d.size + vec.size + b1.size
                              + BL * E)
                         + sum(w.size * w.dtype.itemsize for w in weights))

    out2d = pl.pallas_call(
        kernel,
        out_shape=jax.ShapeDtypeStruct((B * L, E), tgt.dtype),
        grid=(num_groups,),
        in_specs=in_specs,
        out_specs=pl.BlockSpec((M, E), lambda g: (g, 0)),
        scratch_shapes=[pltpu.VMEM((M, E), jnp.float32)],
        compiler_params=pltpu.CompilerParams(
            dimension_semantics=("parallel",),
            vmem_limit_bytes=32 * 1024 * 1024,
        ),
        cost_estimate=pl.CostEstimate(
            flops=int(flops),
            transcendentals=int(transcendentals),
            bytes_accessed=bytes_accessed),
    )(*args)
    return out2d.reshape(B, L, E)


# ----------------------------------------------------------------------------
# Decoder forward
# ----------------------------------------------------------------------------

def decoder_forward(tgt, memory, params, tgt_mask=None, memory_mask=None,
                    nhead=4, chain_layers=False, mxu_dtype=jnp.bfloat16):
    """Pallas forward of Decoder.

    chain_layers=False (default) reproduces the reference exactly: every layer
    consumes the ORIGINAL tgt and overwrites output, so only the last layer is
    observable -> we compute just that layer (output-identical, (NL-1)/NL less
    work).  chain_layers=True feeds each layer's output into the next (the
    "fixed" semantics), running one fused pallas_call per layer.
    """
    layers = params["layers"]
    norm = params["norm"]
    if chain_layers:
        out = tgt
        n = len(layers)
        for i, lp in enumerate(layers):
            fn = norm if i == n - 1 else None
            out = _fused_decoder_layer(out, memory, lp, tgt_mask, memory_mask,
                                       nhead, final_norm=fn,
                                       mxu_dtype=mxu_dtype)
        return out
    # dead-layer elimination (faithful to the reference quirk)
    return _fused_decoder_layer(tgt, memory, layers[-1], tgt_mask, memory_mask,
                                nhead, final_norm=norm, mxu_dtype=mxu_dtype)


# ----------------------------------------------------------------------------
# Pure-JAX reference (f32, faithful loop over all layers) for self-checking
# ----------------------------------------------------------------------------

def _reference_decoder(tgt, memory, params, tgt_mask, memory_mask, nhead,
                       chain_layers=False):
    E = tgt.shape[-1]

    def ln(z, g, b, eps=1e-5):
        mu = z.mean(-1, keepdims=True)
        var = ((z - mu) ** 2).mean(-1, keepdims=True)
        return (z - mu) / jnp.sqrt(var + eps) * g + b

    def mha(xq, xkv, wq, bq, wk, bk, wv, bv, wo, bo, mask):
        B, Lq, _ = xq.shape
        Lk = xkv.shape[1]
        Dh = E // nhead
        q = (xq @ wq + bq).reshape(B, Lq, nhead, Dh).transpose(0, 2, 1, 3)
        k = (xkv @ wk + bk).reshape(B, Lk, nhead, Dh).transpose(0, 2, 1, 3)
        v = (xkv @ wv + bv).reshape(B, Lk, nhead, Dh).transpose(0, 2, 1, 3)
        s = jnp.einsum("bhqd,bhkd->bhqk", q, k) / jnp.sqrt(Dh)
        if mask is not None:
            s = s + mask
        p = jax.nn.softmax(s, axis=-1)
        o = jnp.einsum("bhqk,bhkd->bhqd", p, v)
        o = o.transpose(0, 2, 1, 3).reshape(B, Lq, E)
        return o @ wo + bo

    output = tgt
    for p in params["layers"]:
        inp = output if chain_layers else tgt
        wq, wk, wv = (p["sa_wqkv"][:, :E], p["sa_wqkv"][:, E:2 * E],
                      p["sa_wqkv"][:, 2 * E:])
        bq, bk, bv = p["sa_bqkv"][:E], p["sa_bqkv"][E:2 * E], p["sa_bqkv"][2 * E:]
        sa = mha(inp, inp, wq, bq, wk, bk, wv, bv, p["sa_wo"], p["sa_bo"],
                 tgt_mask)
        x = ln(inp + sa, p["ln1_g"], p["ln1_b"])
        wkc, wvc = p["ca_wkv"][:, :E], p["ca_wkv"][:, E:]
        bkc, bvc = p["ca_bkv"][:E], p["ca_bkv"][E:]
        ca = mha(x, memory, p["ca_wq"], p["ca_bq"], wkc, bkc, wvc, bvc,
                 p["ca_wo"], p["ca_bo"], memory_mask)
        x = ln(x + ca, p["ln2_g"], p["ln2_b"])
        ff = jnp.maximum(x @ p["w1"] + p["b1"], 0.0) @ p["w2"] + p["b2"]
        x = ln(x + ff, p["ln3_g"], p["ln3_b"])
        output = x
    if params["norm"] is not None:
        g, b = params["norm"]
        output = ln(output, g, b)
    return output


# ----------------------------------------------------------------------------
# Deterministic parameter construction (fused [Q|K|V] / [K|V] layouts)
# ----------------------------------------------------------------------------

def make_params(key, num_layers, d_model, d_ff):
    s = 0.02

    def dense(k, shape):
        return s * jax.random.normal(k, shape, jnp.float32)

    layer_keys = jax.random.split(key, num_layers)
    layers = []
    for lk in layer_keys:
        ks = jax.random.split(lk, 12)
        layers.append({
            "sa_wqkv": dense(ks[0], (d_model, 3 * d_model)),
            "sa_bqkv": dense(ks[1], (3 * d_model,)),
            "sa_wo": dense(ks[2], (d_model, d_model)),
            "sa_bo": dense(ks[3], (d_model,)),
            "ca_wq": dense(ks[4], (d_model, d_model)),
            "ca_bq": dense(ks[5], (d_model,)),
            "ca_wkv": dense(ks[6], (d_model, 2 * d_model)),
            "ca_bkv": dense(ks[7], (2 * d_model,)),
            "ca_wo": dense(ks[8], (d_model, d_model)),
            "ca_bo": dense(ks[9], (d_model,)),
            "w1": dense(ks[10], (d_model, d_ff)),
            "b1": jnp.zeros((d_ff,), jnp.float32),
            "w2": dense(ks[11], (d_ff, d_model)),
            "b2": jnp.zeros((d_model,), jnp.float32),
            "ln1_g": jnp.ones((d_model,), jnp.float32),
            "ln1_b": jnp.zeros((d_model,), jnp.float32),
            "ln2_g": jnp.ones((d_model,), jnp.float32),
            "ln2_b": jnp.zeros((d_model,), jnp.float32),
            "ln3_g": jnp.ones((d_model,), jnp.float32),
            "ln3_b": jnp.zeros((d_model,), jnp.float32),
        })
    norm = (jnp.ones((d_model,), jnp.float32),
            jnp.zeros((d_model,), jnp.float32))
    return {"layers": layers, "norm": norm}


if __name__ == "__main__":
    B, L, S, E, H, F, NL = 2, 8, 8, 32, 4, 64, 2

    key = jax.random.PRNGKey(0)
    k_tgt, k_mem, k_par = jax.random.split(key, 3)
    tgt = jax.random.normal(k_tgt, (B, L, E), jnp.float32)
    memory = jax.random.normal(k_mem, (B, S, E), jnp.float32)
    params = make_params(k_par, NL, E, F)

    tol = dict(atol=1e-2, rtol=1e-2)   # bf16 MXU operands + approx reciprocal

    # 1) no masks (mask DMA / add skipped entirely)
    out = decoder_forward(tgt, memory, params, nhead=H)
    out = jax.block_until_ready(out)
    assert out.shape == (B, L, E)
    assert bool(jnp.all(jnp.isfinite(out)))
    ref = _reference_decoder(tgt, memory, params, None, None, H)
    assert bool(jnp.allclose(out, ref, **tol)), \
        float(jnp.max(jnp.abs(out - ref)))

    # 2) causal tgt mask + (zero) memory mask
    causal = jnp.where(jnp.arange(L)[:, None] >= jnp.arange(L)[None, :],
                       0.0, -1e9).astype(jnp.float32)
    mem_mask = jnp.zeros((L, S), jnp.float32)
    out2 = jax.block_until_ready(
        decoder_forward(tgt, memory, params, tgt_mask=causal,
                        memory_mask=mem_mask, nhead=H))
    ref2 = _reference_decoder(tgt, memory, params, causal, mem_mask, H)
    assert bool(jnp.allclose(out2, ref2, **tol)), \
        float(jnp.max(jnp.abs(out2 - ref2)))

    # 3) chained-layer semantics (guard for a "fixed" upstream Decoder)
    out3 = jax.block_until_ready(
        decoder_forward(tgt, memory, params, tgt_mask=causal, nhead=H,
                        chain_layers=True))
    ref3 = _reference_decoder(tgt, memory, params, causal, None, H,
                              chain_layers=True)
    assert bool(jnp.allclose(out3, ref3, **tol)), \
        float(jnp.max(jnp.abs(out3 - ref3)))

    print("KERNEL_OK")
</pallas_src>

<mosaic_0001>
module attributes {stable_mosaic.version = 11 : i64} {
  func.func @kernel(%arg0: i32, %arg1: memref<16x32xf32, #tpu.memory_space<vmem>>, %arg2: memref<16x32xf32, #tpu.memory_space<vmem>>, %arg3: memref<32x96xbf16, #tpu.memory_space<vmem>>, %arg4: memref<32x32xbf16, #tpu.memory_space<vmem>>, %arg5: memref<32x32xbf16, #tpu.memory_space<vmem>>, %arg6: memref<32x64xbf16, #tpu.memory_space<vmem>>, %arg7: memref<32x32xbf16, #tpu.memory_space<vmem>>, %arg8: memref<32x64xbf16, #tpu.memory_space<vmem>>, %arg9: memref<64x32xbf16, #tpu.memory_space<vmem>>, %arg10: memref<17x32xf32, #tpu.memory_space<vmem>>, %arg11: memref<1x64xf32, #tpu.memory_space<vmem>>, %arg12: memref<16x32xf32, #tpu.memory_space<vmem>>, %arg13: memref<16x32xf32, #tpu.memory_space<vmem>>) attributes {dimension_semantics = [#tpu.dimension_semantics<parallel>], iteration_bounds = array<i64: 1>, scalar_prefetch = 0 : i64, scratch_operands = 1 : i64, tpu.core_type = #tpu.core_type<tc>, window_params = [{transform_indices = @transform_0, window_bounds = array<i64: 16, 32>}, {transform_indices = @transform_1, window_bounds = array<i64: 16, 32>}, {pipeline_mode = #tpu.pipeline_mode<synchronous>, transform_indices = @transform_2, window_bounds = array<i64: 32, 96>}, {pipeline_mode = #tpu.pipeline_mode<synchronous>, transform_indices = @transform_3, window_bounds = array<i64: 32, 32>}, {pipeline_mode = #tpu.pipeline_mode<synchronous>, transform_indices = @transform_4, window_bounds = array<i64: 32, 32>}, {pipeline_mode = #tpu.pipeline_mode<synchronous>, transform_indices = @transform_5, window_bounds = array<i64: 32, 64>}, {pipeline_mode = #tpu.pipeline_mode<synchronous>, transform_indices = @transform_6, window_bounds = array<i64: 32, 32>}, {pipeline_mode = #tpu.pipeline_mode<synchronous>, transform_indices = @transform_7, window_bounds = array<i64: 32, 64>}, {pipeline_mode = #tpu.pipeline_mode<synchronous>, transform_indices = @transform_8, window_bounds = array<i64: 64, 32>}, {pipeline_mode = #tpu.pipeline_mode<synchronous>, transform_indices = @transform_9, window_bounds = array<i64: 17, 32>}, {pipeline_mode = #tpu.pipeline_mode<synchronous>, transform_indices = @transform_10, window_bounds = array<i64: 1, 64>}, {transform_indices = @transform_11, window_bounds = array<i64: 16, 32>}]} {
    %c0 = arith.constant 0 : index
    %c0_0 = arith.constant 0 : index
    %0 = vector.load %arg1[%c0, %c0_0] : memref<16x32xf32, #tpu.memory_space<vmem>>, vector<16x32xf32>
    %c0_1 = arith.constant 0 : index
    %c0_2 = arith.constant 0 : index
    %1 = vector.load %arg2[%c0_1, %c0_2] : memref<16x32xf32, #tpu.memory_space<vmem>>, vector<16x32xf32>
    %c0_3 = arith.constant 0 : index
    %c0_4 = arith.constant 0 : index
    %2 = vector.load %arg10[%c0_3, %c0_4] : memref<17x32xf32, #tpu.memory_space<vmem>>, vector<17x32xf32>
    %3 = arith.truncf %0 : vector<16x32xf32> to vector<16x32xbf16>
    %c0_5 = arith.constant 0 : index
    %c0_6 = arith.constant 0 : index
    %4 = vector.load %arg3[%c0_5, %c0_6] : memref<32x96xbf16, #tpu.memory_space<vmem>>, vector<32x96xbf16>
    %cst = arith.constant dense<0.000000e+00> : vector<16x96xf32>
    %5 = tpu.matmul %3, %4, %cst {dimension_numbers = #tpu.dot_dimension_numbers<[1], [0], [0], [1], [0, 0, 1, 1], [], []>} : vector<16x32xbf16>, vector<32x96xbf16>, vector<16x96xf32> -> vector<16x96xf32>
    %6 = vector.extract_strided_slice %5 {offsets = [0, 0], sizes = [16, 32], strides = [1, 1]} : vector<16x96xf32> to vector<16x32xf32>
    %7 = vector.extract_strided_slice %2 {offsets = [0, 0], sizes = [1, 32], strides = [1, 1]} : vector<17x32xf32> to vector<1x32xf32>
    %8 = vector.broadcast %7 : vector<1x32xf32> to vector<16x32xf32>
    %9 = arith.addf %6, %8 : vector<16x32xf32>
    %10 = vector.extract_strided_slice %5 {offsets = [0, 32], sizes = [16, 32], strides = [1, 1]} : vector<16x96xf32> to vector<16x32xf32>
    %11 = vector.extract_strided_slice %2 {offsets = [1, 0], sizes = [1, 32], strides = [1, 1]} : vector<17x32xf32> to vector<1x32xf32>
    %12 = vector.broadcast %11 : vector<1x32xf32> to vector<16x32xf32>
    %13 = arith.addf %10, %12 : vector<16x32xf32>
    %14 = vector.extract_strided_slice %5 {offsets = [0, 64], sizes = [16, 32], strides = [1, 1]} : vector<16x96xf32> to vector<16x32xf32>
    %15 = vector.extract_strided_slice %2 {offsets = [2, 0], sizes = [1, 32], strides = [1, 1]} : vector<17x32xf32> to vector<1x32xf32>
    %16 = vector.broadcast %15 : vector<1x32xf32> to vector<16x32xf32>
    %17 = arith.addf %14, %16 : vector<16x32xf32>
    %18 = vector.extract_strided_slice %2 {offsets = [3, 0], sizes = [1, 32], strides = [1, 1]} : vector<17x32xf32> to vector<1x32xf32>
    %19 = vector.extract_strided_slice %9 {offsets = [0, 0], sizes = [8, 32], strides = [1, 1]} : vector<16x32xf32> to vector<8x32xf32>
    %20 = vector.extract_strided_slice %13 {offsets = [0, 0], sizes = [8, 32], strides = [1, 1]} : vector<16x32xf32> to vector<8x32xf32>
    %21 = vector.extract_strided_slice %17 {offsets = [0, 0], sizes = [8, 32], strides = [1, 1]} : vector<16x32xf32> to vector<8x32xf32>
    %22 = vector.extract_strided_slice %19 {offsets = [0, 0], sizes = [8, 8], strides = [1, 1]} : vector<8x32xf32> to vector<8x8xf32>
    %23 = arith.truncf %22 : vector<8x8xf32> to vector<8x8xbf16>
    %24 = vector.extract_strided_slice %20 {offsets = [0, 0], sizes = [8, 8], strides = [1, 1]} : vector<8x32xf32> to vector<8x8xf32>
    %25 = arith.truncf %24 : vector<8x8xf32> to vector<8x8xbf16>
    %cst_7 = arith.constant dense<0.000000e+00> : vector<8x8xf32>
    %26 = tpu.matmul %23, %25, %cst_7 {dimension_numbers = #tpu.dot_dimension_numbers<[1], [1], [0], [0], [0, 0, 1, 0], [], []>} : vector<8x8xbf16>, vector<8x8xbf16>, vector<8x8xf32> -> vector<8x8xf32>
    %cst_8 = arith.constant 0.353553385 : f32
    %27 = vector.broadcast %cst_8 : f32 to vector<8x8xf32>
    %28 = arith.mulf %26, %27 : vector<8x8xf32>
    %cst_9 = arith.constant dense<0xFF800000> : vector<8xf32>
    %29 = vector.multi_reduction <maximumf>, %28, %cst_9 [1] : vector<8x8xf32> to vector<8xf32>
    %30 = vector.shape_cast %29 : vector<8xf32> to vector<8x1xf32>
    %31 = vector.broadcast %30 : vector<8x1xf32> to vector<8x8xf32>
    %32 = arith.subf %28, %31 : vector<8x8xf32>
    %33 = math.exp %32 : vector<8x8xf32>
    %cst_10 = arith.constant dense<0.000000e+00> : vector<8xf32>
    %34 = vector.multi_reduction <add>, %33, %cst_10 [1] : vector<8x8xf32> to vector<8xf32>
    %35 = vector.shape_cast %34 : vector<8xf32> to vector<8x1xf32>
    %36 = tpu.reciprocal %35 {approx = true} : vector<8x1xf32> -> vector<8x1xf32>
    %37 = vector.broadcast %36 : vector<8x1xf32> to vector<8x8xf32>
    %38 = arith.mulf %33, %37 : vector<8x8xf32>
    %39 = arith.truncf %38 : vector<8x8xf32> to vector<8x8xbf16>
    %40 = vector.extract_strided_slice %21 {offsets = [0, 0], sizes = [8, 8], strides = [1, 1]} : vector<8x32xf32> to vector<8x8xf32>
    %41 = arith.truncf %40 : vector<8x8xf32> to vector<8x8xbf16>
    %cst_11 = arith.constant dense<0.000000e+00> : vector<8x8xf32>
    %42 = tpu.matmul %39, %41, %cst_11 {dimension_numbers = #tpu.dot_dimension_numbers<[1], [0], [0], [1], [0, 0, 1, 1], [], []>} : vector<8x8xbf16>, vector<8x8xbf16>, vector<8x8xf32> -> vector<8x8xf32>
    %c0_12 = arith.constant 0 : index
    %c0_13 = arith.constant 0 : index
    %43 = vector.load %arg13[%c0_12, %c0_13] : memref<16x32xf32, #tpu.memory_space<vmem>>, vector<8x8xf32>
    tpu.vector_store %arg13[%c0_12, %c0_13], %42 {strides = array<i32>} : memref<16x32xf32, #tpu.memory_space<vmem>>, vector<8x8xf32>,
    %44 = vector.extract_strided_slice %19 {offsets = [0, 8], sizes = [8, 8], strides = [1, 1]} : vector<8x32xf32> to vector<8x8xf32>
    %45 = arith.truncf %44 : vector<8x8xf32> to vector<8x8xbf16>
    %46 = vector.extract_strided_slice %20 {offsets = [0, 8], sizes = [8, 8], strides = [1, 1]} : vector<8x32xf32> to vector<8x8xf32>
    %47 = arith.truncf %46 : vector<8x8xf32> to vector<8x8xbf16>
    %cst_14 = arith.constant dense<0.000000e+00> : vector<8x8xf32>
    %48 = tpu.matmul %45, %47, %cst_14 {dimension_numbers = #tpu.dot_dimension_numbers<[1], [1], [0], [0], [0, 0, 1, 0], [], []>} : vector<8x8xbf16>, vector<8x8xbf16>, vector<8x8xf32> -> vector<8x8xf32>
    %cst_15 = arith.constant 0.353553385 : f32
    %49 = vector.broadcast %cst_15 : f32 to vector<8x8xf32>
    %50 = arith.mulf %48, %49 : vector<8x8xf32>
    %cst_16 = arith.constant dense<0xFF800000> : vector<8xf32>
    %51 = vector.multi_reduction <maximumf>, %50, %cst_16 [1] : vector<8x8xf32> to vector<8xf32>
    %52 = vector.shape_cast %51 : vector<8xf32> to vector<8x1xf32>
    %53 = vector.broadcast %52 : vector<8x1xf32> to vector<8x8xf32>
    %54 = arith.subf %50, %53 : vector<8x8xf32>
    %55 = math.exp %54 : vector<8x8xf32>
    %cst_17 = arith.constant dense<0.000000e+00> : vector<8xf32>
    %56 = vector.multi_reduction <add>, %55, %cst_17 [1] : vector<8x8xf32> to vector<8xf32>
    %57 = vector.shape_cast %56 : vector<8xf32> to vector<8x1xf32>
    %58 = tpu.reciprocal %57 {approx = true} : vector<8x1xf32> -> vector<8x1xf32>
    %59 = vector.broadcast %58 : vector<8x1xf32> to vector<8x8xf32>
    %60 = arith.mulf %55, %59 : vector<8x8xf32>
    %61 = arith.truncf %60 : vector<8x8xf32> to vector<8x8xbf16>
    %62 = vector.extract_strided_slice %21 {offsets = [0, 8], sizes = [8, 8], strides = [1, 1]} : vector<8x32xf32> to vector<8x8xf32>
    %63 = arith.truncf %62 : vector<8x8xf32> to vector<8x8xbf16>
    %cst_18 = arith.constant dense<0.000000e+00> : vector<8x8xf32>
    %64 = tpu.matmul %61, %63, %cst_18 {dimension_numbers = #tpu.dot_dimension_numbers<[1], [0], [0], [1], [0, 0, 1, 1], [], []>} : vector<8x8xbf16>, vector<8x8xbf16>, vector<8x8xf32> -> vector<8x8xf32>
    %c0_19 = arith.constant 0 : index
    %c8 = arith.constant 8 : index
    %65 = vector.load %arg13[%c0_19, %c8] : memref<16x32xf32, #tpu.memory_space<vmem>>, vector<8x8xf32>
    tpu.vector_store %arg13[%c0_19, %c8], %64 {strides = array<i32>} : memref<16x32xf32, #tpu.memory_space<vmem>>, vector<8x8xf32>,
    %66 = vector.extract_strided_slice %19 {offsets = [0, 16], sizes = [8, 8], strides = [1, 1]} : vector<8x32xf32> to vector<8x8xf32>
    %67 = arith.truncf %66 : vector<8x8xf32> to vector<8x8xbf16>
    %68 = vector.extract_strided_slice %20 {offsets = [0, 16], sizes = [8, 8], strides = [1, 1]} : vector<8x32xf32> to vector<8x8xf32>
    %69 = arith.truncf %68 : vector<8x8xf32> to vector<8x8xbf16>
    %cst_20 = arith.constant dense<0.000000e+00> : vector<8x8xf32>
    %70 = tpu.matmul %67, %69, %cst_20 {dimension_numbers = #tpu.dot_dimension_numbers<[1], [1], [0], [0], [0, 0, 1, 0], [], []>} : vector<8x8xbf16>, vector<8x8xbf16>, vector<8x8xf32> -> vector<8x8xf32>
    %cst_21 = arith.constant 0.353553385 : f32
    %71 = vector.broadcast %cst_21 : f32 to vector<8x8xf32>
    %72 = arith.mulf %70, %71 : vector<8x8xf32>
    %cst_22 = arith.constant dense<0xFF800000> : vector<8xf32>
    %73 = vector.multi_reduction <maximumf>, %72, %cst_22 [1] : vector<8x8xf32> to vector<8xf32>
    %74 = vector.shape_cast %73 : vector<8xf32> to vector<8x1xf32>
    %75 = vector.broadcast %74 : vector<8x1xf32> to vector<8x8xf32>
    %76 = arith.subf %72, %75 : vector<8x8xf32>
    %77 = math.exp %76 : vector<8x8xf32>
    %cst_23 = arith.constant dense<0.000000e+00> : vector<8xf32>
    %78 = vector.multi_reduction <add>, %77, %cst_23 [1] : vector<8x8xf32> to vector<8xf32>
    %79 = vector.shape_cast %78 : vector<8xf32> to vector<8x1xf32>
    %80 = tpu.reciprocal %79 {approx = true} : vector<8x1xf32> -> vector<8x1xf32>
    %81 = vector.broadcast %80 : vector<8x1xf32> to vector<8x8xf32>
    %82 = arith.mulf %77, %81 : vector<8x8xf32>
    %83 = arith.truncf %82 : vector<8x8xf32> to vector<8x8xbf16>
    %84 = vector.extract_strided_slice %21 {offsets = [0, 16], sizes = [8, 8], strides = [1, 1]} : vector<8x32xf32> to vector<8x8xf32>
    %85 = arith.truncf %84 : vector<8x8xf32> to vector<8x8xbf16>
    %cst_24 = arith.constant dense<0.000000e+00> : vector<8x8xf32>
    %86 = tpu.matmul %83, %85, %cst_24 {dimension_numbers = #tpu.dot_dimension_numbers<[1], [0], [0], [1], [0, 0, 1, 1], [], []>} : vector<8x8xbf16>, vector<8x8xbf16>, vector<8x8xf32> -> vector<8x8xf32>
    %c0_25 = arith.constant 0 : index
    %c16 = arith.constant 16 : index
    %87 = vector.load %arg13[%c0_25, %c16] : memref<16x32xf32, #tpu.memory_space<vmem>>, vector<8x8xf32>
    tpu.vector_store %arg13[%c0_25, %c16], %86 {strides = array<i32>} : memref<16x32xf32, #tpu.memory_space<vmem>>, vector<8x8xf32>,
    %88 = vector.extract_strided_slice %19 {offsets = [0, 24], sizes = [8, 8], strides = [1, 1]} : vector<8x32xf32> to vector<8x8xf32>
    %89 = arith.truncf %88 : vector<8x8xf32> to vector<8x8xbf16>
    %90 = vector.extract_strided_slice %20 {offsets = [0, 24], sizes = [8, 8], strides = [1, 1]} : vector<8x32xf32> to vector<8x8xf32>
    %91 = arith.truncf %90 : vector<8x8xf32> to vector<8x8xbf16>
    %cst_26 = arith.constant dense<0.000000e+00> : vector<8x8xf32>
    %92 = tpu.matmul %89, %91, %cst_26 {dimension_numbers = #tpu.dot_dimension_numbers<[1], [1], [0], [0], [0, 0, 1, 0], [], []>} : vector<8x8xbf16>, vector<8x8xbf16>, vector<8x8xf32> -> vector<8x8xf32>
    %cst_27 = arith.constant 0.353553385 : f32
    %93 = vector.broadcast %cst_27 : f32 to vector<8x8xf32>
    %94 = arith.mulf %92, %93 : vector<8x8xf32>
    %cst_28 = arith.constant dense<0xFF800000> : vector<8xf32>
    %95 = vector.multi_reduction <maximumf>, %94, %cst_28 [1] : vector<8x8xf32> to vector<8xf32>
    %96 = vector.shape_cast %95 : vector<8xf32> to vector<8x1xf32>
    %97 = vector.broadcast %96 : vector<8x1xf32> to vector<8x8xf32>
    %98 = arith.subf %94, %97 : vector<8x8xf32>
    %99 = math.exp %98 : vector<8x8xf32>
    %cst_29 = arith.constant dense<0.000000e+00> : vector<8xf32>
    %100 = vector.multi_reduction <add>, %99, %cst_29 [1] : vector<8x8xf32> to vector<8xf32>
    %101 = vector.shape_cast %100 : vector<8xf32> to vector<8x1xf32>
    %102 = tpu.reciprocal %101 {approx = true} : vector<8x1xf32> -> vector<8x1xf32>
    %103 = vector.broadcast %102 : vector<8x1xf32> to vector<8x8xf32>
    %104 = arith.mulf %99, %103 : vector<8x8xf32>
    %105 = arith.truncf %104 : vector<8x8xf32> to vector<8x8xbf16>
    %106 = vector.extract_strided_slice %21 {offsets = [0, 24], sizes = [8, 8], strides = [1, 1]} : vector<8x32xf32> to vector<8x8xf32>
    %107 = arith.truncf %106 : vector<8x8xf32> to vector<8x8xbf16>
    %cst_30 = arith.constant dense<0.000000e+00> : vector<8x8xf32>
    %108 = tpu.matmul %105, %107, %cst_30 {dimension_numbers = #tpu.dot_dimension_numbers<[1], [0], [0], [1], [0, 0, 1, 1], [], []>} : vector<8x8xbf16>, vector<8x8xbf16>, vector<8x8xf32> -> vector<8x8xf32>
    %c0_31 = arith.constant 0 : index
    %c24 = arith.constant 24 : index
    %109 = vector.load %arg13[%c0_31, %c24] : memref<16x32xf32, #tpu.memory_space<vmem>>, vector<8x8xf32>
    tpu.vector_store %arg13[%c0_31, %c24], %108 {strides = array<i32>} : memref<16x32xf32, #tpu.memory_space<vmem>>, vector<8x8xf32>,
    %110 = vector.extract_strided_slice %9 {offsets = [8, 0], sizes = [8, 32], strides = [1, 1]} : vector<16x32xf32> to vector<8x32xf32>
    %111 = vector.extract_strided_slice %13 {offsets = [8, 0], sizes = [8, 32], strides = [1, 1]} : vector<16x32xf32> to vector<8x32xf32>
    %112 = vector.extract_strided_slice %17 {offsets = [8, 0], sizes = [8, 32], strides = [1, 1]} : vector<16x32xf32> to vector<8x32xf32>
    %113 = vector.extract_strided_slice %110 {offsets = [0, 0], sizes = [8, 8], strides = [1, 1]} : vector<8x32xf32> to vector<8x8xf32>
    %114 = arith.truncf %113 : vector<8x8xf32> to vector<8x8xbf16>
    %115 = vector.extract_strided_slice %111 {offsets = [0, 0], sizes = [8, 8], strides = [1, 1]} : vector<8x32xf32> to vector<8x8xf32>
    %116 = arith.truncf %115 : vector<8x8xf32> to vector<8x8xbf16>
    %cst_32 = arith.constant dense<0.000000e+00> : vector<8x8xf32>
    %117 = tpu.matmul %114, %116, %cst_32 {dimension_numbers = #tpu.dot_dimension_numbers<[1], [1], [0], [0], [0, 0, 1, 0], [], []>} : vector<8x8xbf16>, vector<8x8xbf16>, vector<8x8xf32> -> vector<8x8xf32>
    %cst_33 = arith.constant 0.353553385 : f32
    %118 = vector.broadcast %cst_33 : f32 to vector<8x8xf32>
    %119 = arith.mulf %117, %118 : vector<8x8xf32>
    %cst_34 = arith.constant dense<0xFF800000> : vector<8xf32>
    %120 = vector.multi_reduction <maximumf>, %119, %cst_34 [1] : vector<8x8xf32> to vector<8xf32>
    %121 = vector.shape_cast %120 : vector<8xf32> to vector<8x1xf32>
    %122 = vector.broadcast %121 : vector<8x1xf32> to vector<8x8xf32>
    %123 = arith.subf %119, %122 : vector<8x8xf32>
    %124 = math.exp %123 : vector<8x8xf32>
    %cst_35 = arith.constant dense<0.000000e+00> : vector<8xf32>
    %125 = vector.multi_reduction <add>, %124, %cst_35 [1] : vector<8x8xf32> to vector<8xf32>
    %126 = vector.shape_cast %125 : vector<8xf32> to vector<8x1xf32>
    %127 = tpu.reciprocal %126 {approx = true} : vector<8x1xf32> -> vector<8x1xf32>
    %128 = vector.broadcast %127 : vector<8x1xf32> to vector<8x8xf32>
    %129 = arith.mulf %124, %128 : vector<8x8xf32>
    %130 = arith.truncf %129 : vector<8x8xf32> to vector<8x8xbf16>
    %131 = vector.extract_strided_slice %112 {offsets = [0, 0], sizes = [8, 8], strides = [1, 1]} : vector<8x32xf32> to vector<8x8xf32>
    %132 = arith.truncf %131 : vector<8x8xf32> to vector<8x8xbf16>
    %cst_36 = arith.constant dense<0.000000e+00> : vector<8x8xf32>
    %133 = tpu.matmul %130, %132, %cst_36 {dimension_numbers = #tpu.dot_dimension_numbers<[1], [0], [0], [1], [0, 0, 1, 1], [], []>} : vector<8x8xbf16>, vector<8x8xbf16>, vector<8x8xf32> -> vector<8x8xf32>
    %c8_37 = arith.constant 8 : index
    %c0_38 = arith.constant 0 : index
    %134 = vector.load %arg13[%c8_37, %c0_38] : memref<16x32xf32, #tpu.memory_space<vmem>>, vector<8x8xf32>
    tpu.vector_store %arg13[%c8_37, %c0_38], %133 {strides = array<i32>} : memref<16x32xf32, #tpu.memory_space<vmem>>, vector<8x8xf32>,
    %135 = vector.extract_strided_slice %110 {offsets = [0, 8], sizes = [8, 8], strides = [1, 1]} : vector<8x32xf32> to vector<8x8xf32>
    %136 = arith.truncf %135 : vector<8x8xf32> to vector<8x8xbf16>
    %137 = vector.extract_strided_slice %111 {offsets = [0, 8], sizes = [8, 8], strides = [1, 1]} : vector<8x32xf32> to vector<8x8xf32>
    %138 = arith.truncf %137 : vector<8x8xf32> to vector<8x8xbf16>
    %cst_39 = arith.constant dense<0.000000e+00> : vector<8x8xf32>
    %139 = tpu.matmul %136, %138, %cst_39 {dimension_numbers = #tpu.dot_dimension_numbers<[1], [1], [0], [0], [0, 0, 1, 0], [], []>} : vector<8x8xbf16>, vector<8x8xbf16>, vector<8x8xf32> -> vector<8x8xf32>
    %cst_40 = arith.constant 0.353553385 : f32
    %140 = vector.broadcast %cst_40 : f32 to vector<8x8xf32>
    %141 = arith.mulf %139, %140 : vector<8x8xf32>
    %cst_41 = arith.constant dense<0xFF800000> : vector<8xf32>
    %142 = vector.multi_reduction <maximumf>, %141, %cst_41 [1] : vector<8x8xf32> to vector<8xf32>
    %143 = vector.shape_cast %142 : vector<8xf32> to vector<8x1xf32>
    %144 = vector.broadcast %143 : vector<8x1xf32> to vector<8x8xf32>
    %145 = arith.subf %141, %144 : vector<8x8xf32>
    %146 = math.exp %145 : vector<8x8xf32>
    %cst_42 = arith.constant dense<0.000000e+00> : vector<8xf32>
    %147 = vector.multi_reduction <add>, %146, %cst_42 [1] : vector<8x8xf32> to vector<8xf32>
    %148 = vector.shape_cast %147 : vector<8xf32> to vector<8x1xf32>
    %149 = tpu.reciprocal %148 {approx = true} : vector<8x1xf32> -> vector<8x1xf32>
    %150 = vector.broadcast %149 : vector<8x1xf32> to vector<8x8xf32>
    %151 = arith.mulf %146, %150 : vector<8x8xf32>
    %152 = arith.truncf %151 : vector<8x8xf32> to vector<8x8xbf16>
    %153 = vector.extract_strided_slice %112 {offsets = [0, 8], sizes = [8, 8], strides = [1, 1]} : vector<8x32xf32> to vector<8x8xf32>
    %154 = arith.truncf %153 : vector<8x8xf32> to vector<8x8xbf16>
    %cst_43 = arith.constant dense<0.000000e+00> : vector<8x8xf32>
    %155 = tpu.matmul %152, %154, %cst_43 {dimension_numbers = #tpu.dot_dimension_numbers<[1], [0], [0], [1], [0, 0, 1, 1], [], []>} : vector<8x8xbf16>, vector<8x8xbf16>, vector<8x8xf32> -> vector<8x8xf32>
    %c8_44 = arith.constant 8 : index
    %c8_45 = arith.constant 8 : index
    %156 = vector.load %arg13[%c8_44, %c8_45] : memref<16x32xf32, #tpu.memory_space<vmem>>, vector<8x8xf32>
    tpu.vector_store %arg13[%c8_44, %c8_45], %155 {strides = array<i32>} : memref<16x32xf32, #tpu.memory_space<vmem>>, vector<8x8xf32>,
    %157 = vector.extract_strided_slice %110 {offsets = [0, 16], sizes = [8, 8], strides = [1, 1]} : vector<8x32xf32> to vector<8x8xf32>
    %158 = arith.truncf %157 : vector<8x8xf32> to vector<8x8xbf16>
    %159 = vector.extract_strided_slice %111 {offsets = [0, 16], sizes = [8, 8], strides = [1, 1]} : vector<8x32xf32> to vector<8x8xf32>
    %160 = arith.truncf %159 : vector<8x8xf32> to vector<8x8xbf16>
    %cst_46 = arith.constant dense<0.000000e+00> : vector<8x8xf32>
    %161 = tpu.matmul %158, %160, %cst_46 {dimension_numbers = #tpu.dot_dimension_numbers<[1], [1], [0], [0], [0, 0, 1, 0], [], []>} : vector<8x8xbf16>, vector<8x8xbf16>, vector<8x8xf32> -> vector<8x8xf32>
    %cst_47 = arith.constant 0.353553385 : f32
    %162 = vector.broadcast %cst_47 : f32 to vector<8x8xf32>
    %163 = arith.mulf %161, %162 : vector<8x8xf32>
    %cst_48 = arith.constant dense<0xFF800000> : vector<8xf32>
    %164 = vector.multi_reduction <maximumf>, %163, %cst_48 [1] : vector<8x8xf32> to vector<8xf32>
    %165 = vector.shape_cast %164 : vector<8xf32> to vector<8x1xf32>
    %166 = vector.broadcast %165 : vector<8x1xf32> to vector<8x8xf32>
    %167 = arith.subf %163, %166 : vector<8x8xf32>
    %168 = math.exp %167 : vector<8x8xf32>
    %cst_49 = arith.constant dense<0.000000e+00> : vector<8xf32>
    %169 = vector.multi_reduction <add>, %168, %cst_49 [1] : vector<8x8xf32> to vector<8xf32>
    %170 = vector.shape_cast %169 : vector<8xf32> to vector<8x1xf32>
    %171 = tpu.reciprocal %170 {approx = true} : vector<8x1xf32> -> vector<8x1xf32>
    %172 = vector.broadcast %171 : vector<8x1xf32> to vector<8x8xf32>
    %173 = arith.mulf %168, %172 : vector<8x8xf32>
    %174 = arith.truncf %173 : vector<8x8xf32> to vector<8x8xbf16>
    %175 = vector.extract_strided_slice %112 {offsets = [0, 16], sizes = [8, 8], strides = [1, 1]} : vector<8x32xf32> to vector<8x8xf32>
    %176 = arith.truncf %175 : vector<8x8xf32> to vector<8x8xbf16>
    %cst_50 = arith.constant dense<0.000000e+00> : vector<8x8xf32>
    %177 = tpu.matmul %174, %176, %cst_50 {dimension_numbers = #tpu.dot_dimension_numbers<[1], [0], [0], [1], [0, 0, 1, 1], [], []>} : vector<8x8xbf16>, vector<8x8xbf16>, vector<8x8xf32> -> vector<8x8xf32>
    %c8_51 = arith.constant 8 : index
    %c16_52 = arith.constant 16 : index
    %178 = vector.load %arg13[%c8_51, %c16_52] : memref<16x32xf32, #tpu.memory_space<vmem>>, vector<8x8xf32>
    tpu.vector_store %arg13[%c8_51, %c16_52], %177 {strides = array<i32>} : memref<16x32xf32, #tpu.memory_space<vmem>>, vector<8x8xf32>,
    %179 = vector.extract_strided_slice %110 {offsets = [0, 24], sizes = [8, 8], strides = [1, 1]} : vector<8x32xf32> to vector<8x8xf32>
    %180 = arith.truncf %179 : vector<8x8xf32> to vector<8x8xbf16>
    %181 = vector.extract_strided_slice %111 {offsets = [0, 24], sizes = [8, 8], strides = [1, 1]} : vector<8x32xf32> to vector<8x8xf32>
    %182 = arith.truncf %181 : vector<8x8xf32> to vector<8x8xbf16>
    %cst_53 = arith.constant dense<0.000000e+00> : vector<8x8xf32>
    %183 = tpu.matmul %180, %182, %cst_53 {dimension_numbers = #tpu.dot_dimension_numbers<[1], [1], [0], [0], [0, 0, 1, 0], [], []>} : vector<8x8xbf16>, vector<8x8xbf16>, vector<8x8xf32> -> vector<8x8xf32>
    %cst_54 = arith.constant 0.353553385 : f32
    %184 = vector.broadcast %cst_54 : f32 to vector<8x8xf32>
    %185 = arith.mulf %183, %184 : vector<8x8xf32>
    %cst_55 = arith.constant dense<0xFF800000> : vector<8xf32>
    %186 = vector.multi_reduction <maximumf>, %185, %cst_55 [1] : vector<8x8xf32> to vector<8xf32>
    %187 = vector.shape_cast %186 : vector<8xf32> to vector<8x1xf32>
    %188 = vector.broadcast %187 : vector<8x1xf32> to vector<8x8xf32>
    %189 = arith.subf %185, %188 : vector<8x8xf32>
    %190 = math.exp %189 : vector<8x8xf32>
    %cst_56 = arith.constant dense<0.000000e+00> : vector<8xf32>
    %191 = vector.multi_reduction <add>, %190, %cst_56 [1] : vector<8x8xf32> to vector<8xf32>
    %192 = vector.shape_cast %191 : vector<8xf32> to vector<8x1xf32>
    %193 = tpu.reciprocal %192 {approx = true} : vector<8x1xf32> -> vector<8x1xf32>
    %194 = vector.broadcast %193 : vector<8x1xf32> to vector<8x8xf32>
    %195 = arith.mulf %190, %194 : vector<8x8xf32>
    %196 = arith.truncf %195 : vector<8x8xf32> to vector<8x8xbf16>
    %197 = vector.extract_strided_slice %112 {offsets = [0, 24], sizes = [8, 8], strides = [1, 1]} : vector<8x32xf32> to vector<8x8xf32>
    %198 = arith.truncf %197 : vector<8x8xf32> to vector<8x8xbf16>
    %cst_57 = arith.constant dense<0.000000e+00> : vector<8x8xf32>
    %199 = tpu.matmul %196, %198, %cst_57 {dimension_numbers = #tpu.dot_dimension_numbers<[1], [0], [0], [1], [0, 0, 1, 1], [], []>} : vector<8x8xbf16>, vector<8x8xbf16>, vector<8x8xf32> -> vector<8x8xf32>
    %c8_58 = arith.constant 8 : index
    %c24_59 = arith.constant 24 : index
    %200 = vector.load %arg13[%c8_58, %c24_59] : memref<16x32xf32, #tpu.memory_space<vmem>>, vector<8x8xf32>
    tpu.vector_store %arg13[%c8_58, %c24_59], %199 {strides = array<i32>} : memref<16x32xf32, #tpu.memory_space<vmem>>, vector<8x8xf32>,
    %c0_60 = arith.constant 0 : index
    %c0_61 = arith.constant 0 : index
    %201 = vector.load %arg13[%c0_60, %c0_61] : memref<16x32xf32, #tpu.memory_space<vmem>>, vector<16x32xf32>
    %202 = arith.truncf %201 : vector<16x32xf32> to vector<16x32xbf16>
    %c0_62 = arith.constant 0 : index
    %c0_63 = arith.constant 0 : index
    %203 = vector.load %arg4[%c0_62, %c0_63] : memref<32x32xbf16, #tpu.memory_space<vmem>>, vector<32x32xbf16>
    %cst_64 = arith.constant dense<0.000000e+00> : vector<16x32xf32>
    %204 = tpu.matmul %202, %203, %cst_64 {dimension_numbers = #tpu.dot_dimension_numbers<[1], [0], [0], [1], [0, 0, 1, 1], [], []>} : vector<16x32xbf16>, vector<32x32xbf16>, vector<16x32xf32> -> vector<16x32xf32>
    %205 = vector.broadcast %18 : vector<1x32xf32> to vector<16x32xf32>
    %206 = arith.addf %204, %205 : vector<16x32xf32>
    %207 = arith.addf %0, %206 : vector<16x32xf32>
    %cst_65 = arith.constant dense<0.000000e+00> : vector<16xf32>
    %208 = vector.multi_reduction <add>, %207, %cst_65 [1] : vector<16x32xf32> to vector<16xf32>
    %209 = vector.shape_cast %208 : vector<16xf32> to vector<16x1xf32>
    %cst_66 = arith.constant 3.200000e+01 : f32
    %210 = vector.broadcast %cst_66 : f32 to vector<16x1xf32>
    %211 = arith.divf %209, %210 : vector<16x1xf32>
    %212 = vector.broadcast %211 : vector<16x1xf32> to vector<16x32xf32>
    %213 = arith.subf %207, %212 : vector<16x32xf32>
    %214 = arith.mulf %213, %213 : vector<16x32xf32>
    %cst_67 = arith.constant dense<0.000000e+00> : vector<16xf32>
    %215 = vector.multi_reduction <add>, %214, %cst_67 [1] : vector<16x32xf32> to vector<16xf32>
    %216 = vector.shape_cast %215 : vector<16xf32> to vector<16x1xf32>
    %cst_68 = arith.constant 3.200000e+01 : f32
    %217 = vector.broadcast %cst_68 : f32 to vector<16x1xf32>
    %218 = arith.divf %216, %217 : vector<16x1xf32>
    %219 = vector.broadcast %211 : vector<16x1xf32> to vector<16x32xf32>
    %220 = arith.subf %207, %219 : vector<16x32xf32>
    %cst_69 = arith.constant 9.99999974E-6 : f32
    %221 = vector.broadcast %cst_69 : f32 to vector<16x1xf32>
    %222 = arith.addf %218, %221 : vector<16x1xf32>
    %223 = math.rsqrt %222 : vector<16x1xf32>
    %224 = vector.broadcast %223 : vector<16x1xf32> to vector<16x32xf32>
    %225 = arith.mulf %220, %224 : vector<16x32xf32>
    %226 = vector.extract_strided_slice %2 {offsets = [4, 0], sizes = [1, 32], strides = [1, 1]} : vector<17x32xf32> to vector<1x32xf32>
    %227 = vector.broadcast %226 : vector<1x32xf32> to vector<16x32xf32>
    %228 = arith.mulf %225, %227 : vector<16x32xf32>
    %229 = vector.extract_strided_slice %2 {offsets = [5, 0], sizes = [1, 32], strides = [1, 1]} : vector<17x32xf32> to vector<1x32xf32>
    %230 = vector.broadcast %229 : vector<1x32xf32> to vector<16x32xf32>
    %231 = arith.addf %228, %230 : vector<16x32xf32>
    %232 = vector.extract_strided_slice %2 {offsets = [6, 0], sizes = [1, 32], strides = [1, 1]} : vector<17x32xf32> to vector<1x32xf32>
    %233 = arith.truncf %231 : vector<16x32xf32> to vector<16x32xbf16>
    %c0_70 = arith.constant 0 : index
    %c0_71 = arith.constant 0 : index
    %234 = vector.load %arg5[%c0_70, %c0_71] : memref<32x32xbf16, #tpu.memory_space<vmem>>, vector<32x32xbf16>
    %cst_72 = arith.constant dense<0.000000e+00> : vector<16x32xf32>
    %235 = tpu.matmul %233, %234, %cst_72 {dimension_numbers = #tpu.dot_dimension_numbers<[1], [0], [0], [1], [0, 0, 1, 1], [], []>} : vector<16x32xbf16>, vector<32x32xbf16>, vector<16x32xf32> -> vector<16x32xf32>
    %236 = vector.broadcast %232 : vector<1x32xf32> to vector<16x32xf32>
    %237 = arith.addf %235, %236 : vector<16x32xf32>
    %238 = arith.truncf %1 : vector<16x32xf32> to vector<16x32xbf16>
    %c0_73 = arith.constant 0 : index
    %c0_74 = arith.constant 0 : index
    %239 = vector.load %arg6[%c0_73, %c0_74] : memref<32x64xbf16, #tpu.memory_space<vmem>>, vector<32x64xbf16>
    %cst_75 = arith.constant dense<0.000000e+00> : vector<16x64xf32>
    %240 = tpu.matmul %238, %239, %cst_75 {dimension_numbers = #tpu.dot_dimension_numbers<[1], [0], [0], [1], [0, 0, 1, 1], [], []>} : vector<16x32xbf16>, vector<32x64xbf16>, vector<16x64xf32> -> vector<16x64xf32>
    %241 = vector.extract_strided_slice %240 {offsets = [0, 0], sizes = [16, 32], strides = [1, 1]} : vector<16x64xf32> to vector<16x32xf32>
    %242 = vector.extract_strided_slice %2 {offsets = [7, 0], sizes = [1, 32], strides = [1, 1]} : vector<17x32xf32> to vector<1x32xf32>
    %243 = vector.broadcast %242 : vector<1x32xf32> to vector<16x32xf32>
    %244 = arith.addf %241, %243 : vector<16x32xf32>
    %245 = vector.extract_strided_slice %240 {offsets = [0, 32], sizes = [16, 32], strides = [1, 1]} : vector<16x64xf32> to vector<16x32xf32>
    %246 = vector.extract_strided_slice %2 {offsets = [8, 0], sizes = [1, 32], strides = [1, 1]} : vector<17x32xf32> to vector<1x32xf32>
    %247 = vector.broadcast %246 : vector<1x32xf32> to vector<16x32xf32>
    %248 = arith.addf %245, %247 : vector<16x32xf32>
    %249 = vector.extract_strided_slice %2 {offsets = [9, 0], sizes = [1, 32], strides = [1, 1]} : vector<17x32xf32> to vector<1x32xf32>
    %250 = vector.extract_strided_slice %237 {offsets = [0, 0], sizes = [8, 32], strides = [1, 1]} : vector<16x32xf32> to vector<8x32xf32>
    %251 = vector.extract_strided_slice %244 {offsets = [0, 0], sizes = [8, 32], strides = [1, 1]} : vector<16x32xf32> to vector<8x32xf32>
    %252 = vector.extract_strided_slice %248 {offsets = [0, 0], sizes = [8, 32], strides = [1, 1]} : vector<16x32xf32> to vector<8x32xf32>
    %253 = vector.extract_strided_slice %250 {offsets = [0, 0], sizes = [8, 8], strides = [1, 1]} : vector<8x32xf32> to vector<8x8xf32>
    %254 = arith.truncf %253 : vector<8x8xf32> to vector<8x8xbf16>
    %255 = vector.extract_strided_slice %251 {offsets = [0, 0], sizes = [8, 8], strides = [1, 1]} : vector<8x32xf32> to vector<8x8xf32>
    %256 = arith.truncf %255 : vector<8x8xf32> to vector<8x8xbf16>
    %cst_76 = arith.constant dense<0.000000e+00> : vector<8x8xf32>
    %257 = tpu.matmul %254, %256, %cst_76 {dimension_numbers = #tpu.dot_dimension_numbers<[1], [1], [0], [0], [0, 0, 1, 0], [], []>} : vector<8x8xbf16>, vector<8x8xbf16>, vector<8x8xf32> -> vector<8x8xf32>
    %cst_77 = arith.constant 0.353553385 : f32
    %258 = vector.broadcast %cst_77 : f32 to vector<8x8xf32>
    %259 = arith.mulf %257, %258 : vector<8x8xf32>
    %cst_78 = arith.constant dense<0xFF800000> : vector<8xf32>
    %260 = vector.multi_reduction <maximumf>, %259, %cst_78 [1] : vector<8x8xf32> to vector<8xf32>
    %261 = vector.shape_cast %260 : vector<8xf32> to vector<8x1xf32>
    %262 = vector.broadcast %261 : vector<8x1xf32> to vector<8x8xf32>
    %263 = arith.subf %259, %262 : vector<8x8xf32>
    %264 = math.exp %263 : vector<8x8xf32>
    %cst_79 = arith.constant dense<0.000000e+00> : vector<8xf32>
    %265 = vector.multi_reduction <add>, %264, %cst_79 [1] : vector<8x8xf32> to vector<8xf32>
    %266 = vector.shape_cast %265 : vector<8xf32> to vector<8x1xf32>
    %267 = tpu.reciprocal %266 {approx = true} : vector<8x1xf32> -> vector<8x1xf32>
    %268 = vector.broadcast %267 : vector<8x1xf32> to vector<8x8xf32>
    %269 = arith.mulf %264, %268 : vector<8x8xf32>
    %270 = arith.truncf %269 : vector<8x8xf32> to vector<8x8xbf16>
    %271 = vector.extract_strided_slice %252 {offsets = [0, 0], sizes = [8, 8], strides = [1, 1]} : vector<8x32xf32> to vector<8x8xf32>
    %272 = arith.truncf %271 : vector<8x8xf32> to vector<8x8xbf16>
    %cst_80 = arith.constant dense<0.000000e+00> : vector<8x8xf32>
    %273 = tpu.matmul %270, %272, %cst_80 {dimension_numbers = #tpu.dot_dimension_numbers<[1], [0], [0], [1], [0, 0, 1, 1], [], []>} : vector<8x8xbf16>, vector<8x8xbf16>, vector<8x8xf32> -> vector<8x8xf32>
    %c0_81 = arith.constant 0 : index
    %c0_82 = arith.constant 0 : index
    %274 = vector.load %arg13[%c0_81, %c0_82] : memref<16x32xf32, #tpu.memory_space<vmem>>, vector<8x8xf32>
    tpu.vector_store %arg13[%c0_81, %c0_82], %273 {strides = array<i32>} : memref<16x32xf32, #tpu.memory_space<vmem>>, vector<8x8xf32>,
    %275 = vector.extract_strided_slice %250 {offsets = [0, 8], sizes = [8, 8], strides = [1, 1]} : vector<8x32xf32> to vector<8x8xf32>
    %276 = arith.truncf %275 : vector<8x8xf32> to vector<8x8xbf16>
    %277 = vector.extract_strided_slice %251 {offsets = [0, 8], sizes = [8, 8], strides = [1, 1]} : vector<8x32xf32> to vector<8x8xf32>
    %278 = arith.truncf %277 : vector<8x8xf32> to vector<8x8xbf16>
    %cst_83 = arith.constant dense<0.000000e+00> : vector<8x8xf32>
    %279 = tpu.matmul %276, %278, %cst_83 {dimension_numbers = #tpu.dot_dimension_numbers<[1], [1], [0], [0], [0, 0, 1, 0], [], []>} : vector<8x8xbf16>, vector<8x8xbf16>, vector<8x8xf32> -> vector<8x8xf32>
    %cst_84 = arith.constant 0.353553385 : f32
    %280 = vector.broadcast %cst_84 : f32 to vector<8x8xf32>
    %281 = arith.mulf %279, %280 : vector<8x8xf32>
    %cst_85 = arith.constant dense<0xFF800000> : vector<8xf32>
    %282 = vector.multi_reduction <maximumf>, %281, %cst_85 [1] : vector<8x8xf32> to vector<8xf32>
    %283 = vector.shape_cast %282 : vector<8xf32> to vector<8x1xf32>
    %284 = vector.broadcast %283 : vector<8x1xf32> to vector<8x8xf32>
    %285 = arith.subf %281, %284 : vector<8x8xf32>
    %286 = math.exp %285 : vector<8x8xf32>
    %cst_86 = arith.constant dense<0.000000e+00> : vector<8xf32>
    %287 = vector.multi_reduction <add>, %286, %cst_86 [1] : vector<8x8xf32> to vector<8xf32>
    %288 = vector.shape_cast %287 : vector<8xf32> to vector<8x1xf32>
    %289 = tpu.reciprocal %288 {approx = true} : vector<8x1xf32> -> vector<8x1xf32>
    %290 = vector.broadcast %289 : vector<8x1xf32> to vector<8x8xf32>
    %291 = arith.mulf %286, %290 : vector<8x8xf32>
    %292 = arith.truncf %291 : vector<8x8xf32> to vector<8x8xbf16>
    %293 = vector.extract_strided_slice %252 {offsets = [0, 8], sizes = [8, 8], strides = [1, 1]} : vector<8x32xf32> to vector<8x8xf32>
    %294 = arith.truncf %293 : vector<8x8xf32> to vector<8x8xbf16>
    %cst_87 = arith.constant dense<0.000000e+00> : vector<8x8xf32>
    %295 = tpu.matmul %292, %294, %cst_87 {dimension_numbers = #tpu.dot_dimension_numbers<[1], [0], [0], [1], [0, 0, 1, 1], [], []>} : vector<8x8xbf16>, vector<8x8xbf16>, vector<8x8xf32> -> vector<8x8xf32>
    %c0_88 = arith.constant 0 : index
    %c8_89 = arith.constant 8 : index
    %296 = vector.load %arg13[%c0_88, %c8_89] : memref<16x32xf32, #tpu.memory_space<vmem>>, vector<8x8xf32>
    tpu.vector_store %arg13[%c0_88, %c8_89], %295 {strides = array<i32>} : memref<16x32xf32, #tpu.memory_space<vmem>>, vector<8x8xf32>,
    %297 = vector.extract_strided_slice %250 {offsets = [0, 16], sizes = [8, 8], strides = [1, 1]} : vector<8x32xf32> to vector<8x8xf32>
    %298 = arith.truncf %297 : vector<8x8xf32> to vector<8x8xbf16>
    %299 = vector.extract_strided_slice %251 {offsets = [0, 16], sizes = [8, 8], strides = [1, 1]} : vector<8x32xf32> to vector<8x8xf32>
    %300 = arith.truncf %299 : vector<8x8xf32> to vector<8x8xbf16>
    %cst_90 = arith.constant dense<0.000000e+00> : vector<8x8xf32>
    %301 = tpu.matmul %298, %300, %cst_90 {dimension_numbers = #tpu.dot_dimension_numbers<[1], [1], [0], [0], [0, 0, 1, 0], [], []>} : vector<8x8xbf16>, vector<8x8xbf16>, vector<8x8xf32> -> vector<8x8xf32>
    %cst_91 = arith.constant 0.353553385 : f32
    %302 = vector.broadcast %cst_91 : f32 to vector<8x8xf32>
    %303 = arith.mulf %301, %302 : vector<8x8xf32>
    %cst_92 = arith.constant dense<0xFF800000> : vector<8xf32>
    %304 = vector.multi_reduction <maximumf>, %303, %cst_92 [1] : vector<8x8xf32> to vector<8xf32>
    %305 = vector.shape_cast %304 : vector<8xf32> to vector<8x1xf32>
    %306 = vector.broadcast %305 : vector<8x1xf32> to vector<8x8xf32>
    %307 = arith.subf %303, %306 : vector<8x8xf32>
    %308 = math.exp %307 : vector<8x8xf32>
    %cst_93 = arith.constant dense<0.000000e+00> : vector<8xf32>
    %309 = vector.multi_reduction <add>, %308, %cst_93 [1] : vector<8x8xf32> to vector<8xf32>
    %310 = vector.shape_cast %309 : vector<8xf32> to vector<8x1xf32>
    %311 = tpu.reciprocal %310 {approx = true} : vector<8x1xf32> -> vector<8x1xf32>
    %312 = vector.broadcast %311 : vector<8x1xf32> to vector<8x8xf32>
    %313 = arith.mulf %308, %312 : vector<8x8xf32>
    %314 = arith.truncf %313 : vector<8x8xf32> to vector<8x8xbf16>
    %315 = vector.extract_strided_slice %252 {offsets = [0, 16], sizes = [8, 8], strides = [1, 1]} : vector<8x32xf32> to vector<8x8xf32>
    %316 = arith.truncf %315 : vector<8x8xf32> to vector<8x8xbf16>
    %cst_94 = arith.constant dense<0.000000e+00> : vector<8x8xf32>
    %317 = tpu.matmul %314, %316, %cst_94 {dimension_numbers = #tpu.dot_dimension_numbers<[1], [0], [0], [1], [0, 0, 1, 1], [], []>} : vector<8x8xbf16>, vector<8x8xbf16>, vector<8x8xf32> -> vector<8x8xf32>
    %c0_95 = arith.constant 0 : index
    %c16_96 = arith.constant 16 : index
    %318 = vector.load %arg13[%c0_95, %c16_96] : memref<16x32xf32, #tpu.memory_space<vmem>>, vector<8x8xf32>
    tpu.vector_store %arg13[%c0_95, %c16_96], %317 {strides = array<i32>} : memref<16x32xf32, #tpu.memory_space<vmem>>, vector<8x8xf32>,
    %319 = vector.extract_strided_slice %250 {offsets = [0, 24], sizes = [8, 8], strides = [1, 1]} : vector<8x32xf32> to vector<8x8xf32>
    %320 = arith.truncf %319 : vector<8x8xf32> to vector<8x8xbf16>
    %321 = vector.extract_strided_slice %251 {offsets = [0, 24], sizes = [8, 8], strides = [1, 1]} : vector<8x32xf32> to vector<8x8xf32>
    %322 = arith.truncf %321 : vector<8x8xf32> to vector<8x8xbf16>
    %cst_97 = arith.constant dense<0.000000e+00> : vector<8x8xf32>
    %323 = tpu.matmul %320, %322, %cst_97 {dimension_numbers = #tpu.dot_dimension_numbers<[1], [1], [0], [0], [0, 0, 1, 0], [], []>} : vector<8x8xbf16>, vector<8x8xbf16>, vector<8x8xf32> -> vector<8x8xf32>
    %cst_98 = arith.constant 0.353553385 : f32
    %324 = vector.broadcast %cst_98 : f32 to vector<8x8xf32>
    %325 = arith.mulf %323, %324 : vector<8x8xf32>
    %cst_99 = arith.constant dense<0xFF800000> : vector<8xf32>
    %326 = vector.multi_reduction <maximumf>, %325, %cst_99 [1] : vector<8x8xf32> to vector<8xf32>
    %327 = vector.shape_cast %326 : vector<8xf32> to vector<8x1xf32>
    %328 = vector.broadcast %327 : vector<8x1xf32> to vector<8x8xf32>
    %329 = arith.subf %325, %328 : vector<8x8xf32>
    %330 = math.exp %329 : vector<8x8xf32>
    %cst_100 = arith.constant dense<0.000000e+00> : vector<8xf32>
    %331 = vector.multi_reduction <add>, %330, %cst_100 [1] : vector<8x8xf32> to vector<8xf32>
    %332 = vector.shape_cast %331 : vector<8xf32> to vector<8x1xf32>
    %333 = tpu.reciprocal %332 {approx = true} : vector<8x1xf32> -> vector<8x1xf32>
    %334 = vector.broadcast %333 : vector<8x1xf32> to vector<8x8xf32>
    %335 = arith.mulf %330, %334 : vector<8x8xf32>
    %336 = arith.truncf %335 : vector<8x8xf32> to vector<8x8xbf16>
    %337 = vector.extract_strided_slice %252 {offsets = [0, 24], sizes = [8, 8], strides = [1, 1]} : vector<8x32xf32> to vector<8x8xf32>
    %338 = arith.truncf %337 : vector<8x8xf32> to vector<8x8xbf16>
    %cst_101 = arith.constant dense<0.000000e+00> : vector<8x8xf32>
    %339 = tpu.matmul %336, %338, %cst_101 {dimension_numbers = #tpu.dot_dimension_numbers<[1], [0], [0], [1], [0, 0, 1, 1], [], []>} : vector<8x8xbf16>, vector<8x8xbf16>, vector<8x8xf32> -> vector<8x8xf32>
    %c0_102 = arith.constant 0 : index
    %c24_103 = arith.constant 24 : index
    %340 = vector.load %arg13[%c0_102, %c24_103] : memref<16x32xf32, #tpu.memory_space<vmem>>, vector<8x8xf32>
    tpu.vector_store %arg13[%c0_102, %c24_103], %339 {strides = array<i32>} : memref<16x32xf32, #tpu.memory_space<vmem>>, vector<8x8xf32>,
    %341 = vector.extract_strided_slice %237 {offsets = [8, 0], sizes = [8, 32], strides = [1, 1]} : vector<16x32xf32> to vector<8x32xf32>
    %342 = vector.extract_strided_slice %244 {offsets = [8, 0], sizes = [8, 32], strides = [1, 1]} : vector<16x32xf32> to vector<8x32xf32>
    %343 = vector.extract_strided_slice %248 {offsets = [8, 0], sizes = [8, 32], strides = [1, 1]} : vector<16x32xf32> to vector<8x32xf32>
    %344 = vector.extract_strided_slice %341 {offsets = [0, 0], sizes = [8, 8], strides = [1, 1]} : vector<8x32xf32> to vector<8x8xf32>
    %345 = arith.truncf %344 : vector<8x8xf32> to vector<8x8xbf16>
    %346 = vector.extract_strided_slice %342 {offsets = [0, 0], sizes = [8, 8], strides = [1, 1]} : vector<8x32xf32> to vector<8x8xf32>
    %347 = arith.truncf %346 : vector<8x8xf32> to vector<8x8xbf16>
    %cst_104 = arith.constant dense<0.000000e+00> : vector<8x8xf32>
    %348 = tpu.matmul %345, %347, %cst_104 {dimension_numbers = #tpu.dot_dimension_numbers<[1], [1], [0], [0], [0, 0, 1, 0], [], []>} : vector<8x8xbf16>, vector<8x8xbf16>, vector<8x8xf32> -> vector<8x8xf32>
    %cst_105 = arith.constant 0.353553385 : f32
    %349 = vector.broadcast %cst_105 : f32 to vector<8x8xf32>
    %350 = arith.mulf %348, %349 : vector<8x8xf32>
    %cst_106 = arith.constant dense<0xFF800000> : vector<8xf32>
    %351 = vector.multi_reduction <maximumf>, %350, %cst_106 [1] : vector<8x8xf32> to vector<8xf32>
    %352 = vector.shape_cast %351 : vector<8xf32> to vector<8x1xf32>
    %353 = vector.broadcast %352 : vector<8x1xf32> to vector<8x8xf32>
    %354 = arith.subf %350, %353 : vector<8x8xf32>
    %355 = math.exp %354 : vector<8x8xf32>
    %cst_107 = arith.constant dense<0.000000e+00> : vector<8xf32>
    %356 = vector.multi_reduction <add>, %355, %cst_107 [1] : vector<8x8xf32> to vector<8xf32>
    %357 = vector.shape_cast %356 : vector<8xf32> to vector<8x1xf32>
    %358 = tpu.reciprocal %357 {approx = true} : vector<8x1xf32> -> vector<8x1xf32>
    %359 = vector.broadcast %358 : vector<8x1xf32> to vector<8x8xf32>
    %360 = arith.mulf %355, %359 : vector<8x8xf32>
    %361 = arith.truncf %360 : vector<8x8xf32> to vector<8x8xbf16>
    %362 = vector.extract_strided_slice %343 {offsets = [0, 0], sizes = [8, 8], strides = [1, 1]} : vector<8x32xf32> to vector<8x8xf32>
    %363 = arith.truncf %362 : vector<8x8xf32> to vector<8x8xbf16>
    %cst_108 = arith.constant dense<0.000000e+00> : vector<8x8xf32>
    %364 = tpu.matmul %361, %363, %cst_108 {dimension_numbers = #tpu.dot_dimension_numbers<[1], [0], [0], [1], [0, 0, 1, 1], [], []>} : vector<8x8xbf16>, vector<8x8xbf16>, vector<8x8xf32> -> vector<8x8xf32>
    %c8_109 = arith.constant 8 : index
    %c0_110 = arith.constant 0 : index
    %365 = vector.load %arg13[%c8_109, %c0_110] : memref<16x32xf32, #tpu.memory_space<vmem>>, vector<8x8xf32>
    tpu.vector_store %arg13[%c8_109, %c0_110], %364 {strides = array<i32>} : memref<16x32xf32, #tpu.memory_space<vmem>>, vector<8x8xf32>,
    %366 = vector.extract_strided_slice %341 {offsets = [0, 8], sizes = [8, 8], strides = [1, 1]} : vector<8x32xf32> to vector<8x8xf32>
    %367 = arith.truncf %366 : vector<8x8xf32> to vector<8x8xbf16>
    %368 = vector.extract_strided_slice %342 {offsets = [0, 8], sizes = [8, 8], strides = [1, 1]} : vector<8x32xf32> to vector<8x8xf32>
    %369 = arith.truncf %368 : vector<8x8xf32> to vector<8x8xbf16>
    %cst_111 = arith.constant dense<0.000000e+00> : vector<8x8xf32>
    %370 = tpu.matmul %367, %369, %cst_111 {dimension_numbers = #tpu.dot_dimension_numbers<[1], [1], [0], [0], [0, 0, 1, 0], [], []>} : vector<8x8xbf16>, vector<8x8xbf16>, vector<8x8xf32> -> vector<8x8xf32>
    %cst_112 = arith.constant 0.353553385 : f32
    %371 = vector.broadcast %cst_112 : f32 to vector<8x8xf32>
    %372 = arith.mulf %370, %371 : vector<8x8xf32>
    %cst_113 = arith.constant dense<0xFF800000> : vector<8xf32>
    %373 = vector.multi_reduction <maximumf>, %372, %cst_113 [1] : vector<8x8xf32> to vector<8xf32>
    %374 = vector.shape_cast %373 : vector<8xf32> to vector<8x1xf32>
    %375 = vector.broadcast %374 : vector<8x1xf32> to vector<8x8xf32>
    %376 = arith.subf %372, %375 : vector<8x8xf32>
    %377 = math.exp %376 : vector<8x8xf32>
    %cst_114 = arith.constant dense<0.000000e+00> : vector<8xf32>
    %378 = vector.multi_reduction <add>, %377, %cst_114 [1] : vector<8x8xf32> to vector<8xf32>
    %379 = vector.shape_cast %378 : vector<8xf32> to vector<8x1xf32>
    %380 = tpu.reciprocal %379 {approx = true} : vector<8x1xf32> -> vector<8x1xf32>
    %381 = vector.broadcast %380 : vector<8x1xf32> to vector<8x8xf32>
    %382 = arith.mulf %377, %381 : vector<8x8xf32>
    %383 = arith.truncf %382 : vector<8x8xf32> to vector<8x8xbf16>
    %384 = vector.extract_strided_slice %343 {offsets = [0, 8], sizes = [8, 8], strides = [1, 1]} : vector<8x32xf32> to vector<8x8xf32>
    %385 = arith.truncf %384 : vector<8x8xf32> to vector<8x8xbf16>
    %cst_115 = arith.constant dense<0.000000e+00> : vector<8x8xf32>
    %386 = tpu.matmul %383, %385, %cst_115 {dimension_numbers = #tpu.dot_dimension_numbers<[1], [0], [0], [1], [0, 0, 1, 1], [], []>} : vector<8x8xbf16>, vector<8x8xbf16>, vector<8x8xf32> -> vector<8x8xf32>
    %c8_116 = arith.constant 8 : index
    %c8_117 = arith.constant 8 : index
    %387 = vector.load %arg13[%c8_116, %c8_117] : memref<16x32xf32, #tpu.memory_space<vmem>>, vector<8x8xf32>
    tpu.vector_store %arg13[%c8_116, %c8_117], %386 {strides = array<i32>} : memref<16x32xf32, #tpu.memory_space<vmem>>, vector<8x8xf32>,
    %388 = vector.extract_strided_slice %341 {offsets = [0, 16], sizes = [8, 8], strides = [1, 1]} : vector<8x32xf32> to vector<8x8xf32>
    %389 = arith.truncf %388 : vector<8x8xf32> to vector<8x8xbf16>
    %390 = vector.extract_strided_slice %342 {offsets = [0, 16], sizes = [8, 8], strides = [1, 1]} : vector<8x32xf32> to vector<8x8xf32>
    %391 = arith.truncf %390 : vector<8x8xf32> to vector<8x8xbf16>
    %cst_118 = arith.constant dense<0.000000e+00> : vector<8x8xf32>
    %392 = tpu.matmul %389, %391, %cst_118 {dimension_numbers = #tpu.dot_dimension_numbers<[1], [1], [0], [0], [0, 0, 1, 0], [], []>} : vector<8x8xbf16>, vector<8x8xbf16>, vector<8x8xf32> -> vector<8x8xf32>
    %cst_119 = arith.constant 0.353553385 : f32
    %393 = vector.broadcast %cst_119 : f32 to vector<8x8xf32>
    %394 = arith.mulf %392, %393 : vector<8x8xf32>
    %cst_120 = arith.constant dense<0xFF800000> : vector<8xf32>
    %395 = vector.multi_reduction <maximumf>, %394, %cst_120 [1] : vector<8x8xf32> to vector<8xf32>
    %396 = vector.shape_cast %395 : vector<8xf32> to vector<8x1xf32>
    %397 = vector.broadcast %396 : vector<8x1xf32> to vector<8x8xf32>
    %398 = arith.subf %394, %397 : vector<8x8xf32>
    %399 = math.exp %398 : vector<8x8xf32>
    %cst_121 = arith.constant dense<0.000000e+00> : vector<8xf32>
    %400 = vector.multi_reduction <add>, %399, %cst_121 [1] : vector<8x8xf32> to vector<8xf32>
    %401 = vector.shape_cast %400 : vector<8xf32> to vector<8x1xf32>
    %402 = tpu.reciprocal %401 {approx = true} : vector<8x1xf32> -> vector<8x1xf32>
    %403 = vector.broadcast %402 : vector<8x1xf32> to vector<8x8xf32>
    %404 = arith.mulf %399, %403 : vector<8x8xf32>
    %405 = arith.truncf %404 : vector<8x8xf32> to vector<8x8xbf16>
    %406 = vector.extract_strided_slice %343 {offsets = [0, 16], sizes = [8, 8], strides = [1, 1]} : vector<8x32xf32> to vector<8x8xf32>
    %407 = arith.truncf %406 : vector<8x8xf32> to vector<8x8xbf16>
    %cst_122 = arith.constant dense<0.000000e+00> : vector<8x8xf32>
    %408 = tpu.matmul %405, %407, %cst_122 {dimension_numbers = #tpu.dot_dimension_numbers<[1], [0], [0], [1], [0, 0, 1, 1], [], []>} : vector<8x8xbf16>, vector<8x8xbf16>, vector<8x8xf32> -> vector<8x8xf32>
    %c8_123 = arith.constant 8 : index
    %c16_124 = arith.constant 16 : index
    %409 = vector.load %arg13[%c8_123, %c16_124] : memref<16x32xf32, #tpu.memory_space<vmem>>, vector<8x8xf32>
    tpu.vector_store %arg13[%c8_123, %c16_124], %408 {strides = array<i32>} : memref<16x32xf32, #tpu.memory_space<vmem>>, vector<8x8xf32>,
    %410 = vector.extract_strided_slice %341 {offsets = [0, 24], sizes = [8, 8], strides = [1, 1]} : vector<8x32xf32> to vector<8x8xf32>
    %411 = arith.truncf %410 : vector<8x8xf32> to vector<8x8xbf16>
    %412 = vector.extract_strided_slice %342 {offsets = [0, 24], sizes = [8, 8], strides = [1, 1]} : vector<8x32xf32> to vector<8x8xf32>
    %413 = arith.truncf %412 : vector<8x8xf32> to vector<8x8xbf16>
    %cst_125 = arith.constant dense<0.000000e+00> : vector<8x8xf32>
    %414 = tpu.matmul %411, %413, %cst_125 {dimension_numbers = #tpu.dot_dimension_numbers<[1], [1], [0], [0], [0, 0, 1, 0], [], []>} : vector<8x8xbf16>, vector<8x8xbf16>, vector<8x8xf32> -> vector<8x8xf32>
    %cst_126 = arith.constant 0.353553385 : f32
    %415 = vector.broadcast %cst_126 : f32 to vector<8x8xf32>
    %416 = arith.mulf %414, %415 : vector<8x8xf32>
    %cst_127 = arith.constant dense<0xFF800000> : vector<8xf32>
    %417 = vector.multi_reduction <maximumf>, %416, %cst_127 [1] : vector<8x8xf32> to vector<8xf32>
    %418 = vector.shape_cast %417 : vector<8xf32> to vector<8x1xf32>
    %419 = vector.broadcast %418 : vector<8x1xf32> to vector<8x8xf32>
    %420 = arith.subf %416, %419 : vector<8x8xf32>
    %421 = math.exp %420 : vector<8x8xf32>
    %cst_128 = arith.constant dense<0.000000e+00> : vector<8xf32>
    %422 = vector.multi_reduction <add>, %421, %cst_128 [1] : vector<8x8xf32> to vector<8xf32>
    %423 = vector.shape_cast %422 : vector<8xf32> to vector<8x1xf32>
    %424 = tpu.reciprocal %423 {approx = true} : vector<8x1xf32> -> vector<8x1xf32>
    %425 = vector.broadcast %424 : vector<8x1xf32> to vector<8x8xf32>
    %426 = arith.mulf %421, %425 : vector<8x8xf32>
    %427 = arith.truncf %426 : vector<8x8xf32> to vector<8x8xbf16>
    %428 = vector.extract_strided_slice %343 {offsets = [0, 24], sizes = [8, 8], strides = [1, 1]} : vector<8x32xf32> to vector<8x8xf32>
    %429 = arith.truncf %428 : vector<8x8xf32> to vector<8x8xbf16>
    %cst_129 = arith.constant dense<0.000000e+00> : vector<8x8xf32>
    %430 = tpu.matmul %427, %429, %cst_129 {dimension_numbers = #tpu.dot_dimension_numbers<[1], [0], [0], [1], [0, 0, 1, 1], [], []>} : vector<8x8xbf16>, vector<8x8xbf16>, vector<8x8xf32> -> vector<8x8xf32>
    %c8_130 = arith.constant 8 : index
    %c24_131 = arith.constant 24 : index
    %431 = vector.load %arg13[%c8_130, %c24_131] : memref<16x32xf32, #tpu.memory_space<vmem>>, vector<8x8xf32>
    tpu.vector_store %arg13[%c8_130, %c24_131], %430 {strides = array<i32>} : memref<16x32xf32, #tpu.memory_space<vmem>>, vector<8x8xf32>,
    %c0_132 = arith.constant 0 : index
    %c0_133 = arith.constant 0 : index
    %432 = vector.load %arg13[%c0_132, %c0_133] : memref<16x32xf32, #tpu.memory_space<vmem>>, vector<16x32xf32>
    %433 = arith.truncf %432 : vector<16x32xf32> to vector<16x32xbf16>
    %c0_134 = arith.constant 0 : index
    %c0_135 = arith.constant 0 : index
    %434 = vector.load %arg7[%c0_134, %c0_135] : memref<32x32xbf16, #tpu.memory_space<vmem>>, vector<32x32xbf16>
    %cst_136 = arith.constant dense<0.000000e+00> : vector<16x32xf32>
    %435 = tpu.matmul %433, %434, %cst_136 {dimension_numbers = #tpu.dot_dimension_numbers<[1], [0], [0], [1], [0, 0, 1, 1], [], []>} : vector<16x32xbf16>, vector<32x32xbf16>, vector<16x32xf32> -> vector<16x32xf32>
    %436 = vector.broadcast %249 : vector<1x32xf32> to vector<16x32xf32>
    %437 = arith.addf %435, %436 : vector<16x32xf32>
    %438 = arith.addf %231, %437 : vector<16x32xf32>
    %cst_137 = arith.constant dense<0.000000e+00> : vector<16xf32>
    %439 = vector.multi_reduction <add>, %438, %cst_137 [1] : vector<16x32xf32> to vector<16xf32>
    %440 = vector.shape_cast %439 : vector<16xf32> to vector<16x1xf32>
    %cst_138 = arith.constant 3.200000e+01 : f32
    %441 = vector.broadcast %cst_138 : f32 to vector<16x1xf32>
    %442 = arith.divf %440, %441 : vector<16x1xf32>
    %443 = vector.broadcast %442 : vector<16x1xf32> to vector<16x32xf32>
    %444 = arith.subf %438, %443 : vector<16x32xf32>
    %445 = arith.mulf %444, %444 : vector<16x32xf32>
    %cst_139 = arith.constant dense<0.000000e+00> : vector<16xf32>
    %446 = vector.multi_reduction <add>, %445, %cst_139 [1] : vector<16x32xf32> to vector<16xf32>
    %447 = vector.shape_cast %446 : vector<16xf32> to vector<16x1xf32>
    %cst_140 = arith.constant 3.200000e+01 : f32
    %448 = vector.broadcast %cst_140 : f32 to vector<16x1xf32>
    %449 = arith.divf %447, %448 : vector<16x1xf32>
    %450 = vector.broadcast %442 : vector<16x1xf32> to vector<16x32xf32>
    %451 = arith.subf %438, %450 : vector<16x32xf32>
    %cst_141 = arith.constant 9.99999974E-6 : f32
    %452 = vector.broadcast %cst_141 : f32 to vector<16x1xf32>
    %453 = arith.addf %449, %452 : vector<16x1xf32>
    %454 = math.rsqrt %453 : vector<16x1xf32>
    %455 = vector.broadcast %454 : vector<16x1xf32> to vector<16x32xf32>
    %456 = arith.mulf %451, %455 : vector<16x32xf32>
    %457 = vector.extract_strided_slice %2 {offsets = [10, 0], sizes = [1, 32], strides = [1, 1]} : vector<17x32xf32> to vector<1x32xf32>
    %458 = vector.broadcast %457 : vector<1x32xf32> to vector<16x32xf32>
    %459 = arith.mulf %456, %458 : vector<16x32xf32>
    %460 = vector.extract_strided_slice %2 {offsets = [11, 0], sizes = [1, 32], strides = [1, 1]} : vector<17x32xf32> to vector<1x32xf32>
    %461 = vector.broadcast %460 : vector<1x32xf32> to vector<16x32xf32>
    %462 = arith.addf %459, %461 : vector<16x32xf32>
    %c0_142 = arith.constant 0 : index
    %c0_143 = arith.constant 0 : index
    %463 = vector.load %arg11[%c0_142, %c0_143] : memref<1x64xf32, #tpu.memory_space<vmem>>, vector<1x64xf32>
    %464 = arith.truncf %462 : vector<16x32xf32> to vector<16x32xbf16>
    %c0_144 = arith.constant 0 : index
    %c0_145 = arith.constant 0 : index
    %465 = vector.load %arg8[%c0_144, %c0_145] : memref<32x64xbf16, #tpu.memory_space<vmem>>, vector<32x64xbf16>
    %cst_146 = arith.constant dense<0.000000e+00> : vector<16x64xf32>
    %466 = tpu.matmul %464, %465, %cst_146 {dimension_numbers = #tpu.dot_dimension_numbers<[1], [0], [0], [1], [0, 0, 1, 1], [], []>} : vector<16x32xbf16>, vector<32x64xbf16>, vector<16x64xf32> -> vector<16x64xf32>
    %467 = vector.broadcast %463 : vector<1x64xf32> to vector<16x64xf32>
    %468 = arith.addf %466, %467 : vector<16x64xf32>
    %cst_147 = arith.constant 0.000000e+00 : f32
    %469 = vector.broadcast %cst_147 : f32 to vector<16x64xf32>
    %470 = arith.maximumf %468, %469 : vector<16x64xf32>
    %471 = vector.extract_strided_slice %2 {offsets = [12, 0], sizes = [1, 32], strides = [1, 1]} : vector<17x32xf32> to vector<1x32xf32>
    %472 = arith.truncf %470 : vector<16x64xf32> to vector<16x64xbf16>
    %c0_148 = arith.constant 0 : index
    %c0_149 = arith.constant 0 : index
    %473 = vector.load %arg9[%c0_148, %c0_149] : memref<64x32xbf16, #tpu.memory_space<vmem>>, vector<64x32xbf16>
    %cst_150 = arith.constant dense<0.000000e+00> : vector<16x32xf32>
    %474 = tpu.matmul %472, %473, %cst_150 {dimension_numbers = #tpu.dot_dimension_numbers<[1], [0], [0], [1], [0, 0, 1, 1], [], []>} : vector<16x64xbf16>, vector<64x32xbf16>, vector<16x32xf32> -> vector<16x32xf32>
    %475 = vector.broadcast %471 : vector<1x32xf32> to vector<16x32xf32>
    %476 = arith.addf %474, %475 : vector<16x32xf32>
    %477 = arith.addf %462, %476 : vector<16x32xf32>
    %cst_151 = arith.constant dense<0.000000e+00> : vector<16xf32>
    %478 = vector.multi_reduction <add>, %477, %cst_151 [1] : vector<16x32xf32> to vector<16xf32>
    %479 = vector.shape_cast %478 : vector<16xf32> to vector<16x1xf32>
    %cst_152 = arith.constant 3.200000e+01 : f32
    %480 = vector.broadcast %cst_152 : f32 to vector<16x1xf32>
    %481 = arith.divf %479, %480 : vector<16x1xf32>
    %482 = vector.broadcast %481 : vector<16x1xf32> to vector<16x32xf32>
    %483 = arith.subf %477, %482 : vector<16x32xf32>
    %484 = arith.mulf %483, %483 : vector<16x32xf32>
    %cst_153 = arith.constant dense<0.000000e+00> : vector<16xf32>
    %485 = vector.multi_reduction <add>, %484, %cst_153 [1] : vector<16x32xf32> to vector<16xf32>
    %486 = vector.shape_cast %485 : vector<16xf32> to vector<16x1xf32>
    %cst_154 = arith.constant 3.200000e+01 : f32
    %487 = vector.broadcast %cst_154 : f32 to vector<16x1xf32>
    %488 = arith.divf %486, %487 : vector<16x1xf32>
    %489 = vector.broadcast %481 : vector<16x1xf32> to vector<16x32xf32>
    %490 = arith.subf %477, %489 : vector<16x32xf32>
    %cst_155 = arith.constant 9.99999974E-6 : f32
    %491 = vector.broadcast %cst_155 : f32 to vector<16x1xf32>
    %492 = arith.addf %488, %491 : vector<16x1xf32>
    %493 = math.rsqrt %492 : vector<16x1xf32>
    %494 = vector.broadcast %493 : vector<16x1xf32> to vector<16x32xf32>
    %495 = arith.mulf %490, %494 : vector<16x32xf32>
    %496 = vector.extract_strided_slice %2 {offsets = [13, 0], sizes = [1, 32], strides = [1, 1]} : vector<17x32xf32> to vector<1x32xf32>
    %497 = vector.broadcast %496 : vector<1x32xf32> to vector<16x32xf32>
    %498 = arith.mulf %495, %497 : vector<16x32xf32>
    %499 = vector.extract_strided_slice %2 {offsets = [14, 0], sizes = [1, 32], strides = [1, 1]} : vector<17x32xf32> to vector<1x32xf32>
    %500 = vector.broadcast %499 : vector<1x32xf32> to vector<16x32xf32>
    %501 = arith.addf %498, %500 : vector<16x32xf32>
    %cst_156 = arith.constant dense<0.000000e+00> : vector<16xf32>
    %502 = vector.multi_reduction <add>, %501, %cst_156 [1] : vector<16x32xf32> to vector<16xf32>
    %503 = vector.shape_cast %502 : vector<16xf32> to vector<16x1xf32>
    %cst_157 = arith.constant 3.200000e+01 : f32
    %504 = vector.broadcast %cst_157 : f32 to vector<16x1xf32>
    %505 = arith.divf %503, %504 : vector<16x1xf32>
    %506 = vector.broadcast %505 : vector<16x1xf32> to vector<16x32xf32>
    %507 = arith.subf %501, %506 : vector<16x32xf32>
    %508 = arith.mulf %507, %507 : vector<16x32xf32>
    %cst_158 = arith.constant dense<0.000000e+00> : vector<16xf32>
    %509 = vector.multi_reduction <add>, %508, %cst_158 [1] : vector<16x32xf32> to vector<16xf32>
    %510 = vector.shape_cast %509 : vector<16xf32> to vector<16x1xf32>
    %cst_159 = arith.constant 3.200000e+01 : f32
    %511 = vector.broadcast %cst_159 : f32 to vector<16x1xf32>
    %512 = arith.divf %510, %511 : vector<16x1xf32>
    %513 = vector.broadcast %505 : vector<16x1xf32> to vector<16x32xf32>
    %514 = arith.subf %501, %513 : vector<16x32xf32>
    %cst_160 = arith.constant 9.99999974E-6 : f32
    %515 = vector.broadcast %cst_160 : f32 to vector<16x1xf32>
    %516 = arith.addf %512, %515 : vector<16x1xf32>
    %517 = math.rsqrt %516 : vector<16x1xf32>
    %518 = vector.broadcast %517 : vector<16x1xf32> to vector<16x32xf32>
    %519 = arith.mulf %514, %518 : vector<16x32xf32>
    %520 = vector.extract_strided_slice %2 {offsets = [15, 0], sizes = [1, 32], strides = [1, 1]} : vector<17x32xf32> to vector<1x32xf32>
    %521 = vector.broadcast %520 : vector<1x32xf32> to vector<16x32xf32>
    %522 = arith.mulf %519, %521 : vector<16x32xf32>
    %523 = vector.extract_strided_slice %2 {offsets = [16, 0], sizes = [1, 32], strides = [1, 1]} : vector<17x32xf32> to vector<1x32xf32>
    %524 = vector.broadcast %523 : vector<1x32xf32> to vector<16x32xf32>
    %525 = arith.addf %522, %524 : vector<16x32xf32>
    %c0_161 = arith.constant 0 : index
    %c0_162 = arith.constant 0 : index
    %526 = vector.load %arg12[%c0_161, %c0_162] : memref<16x32xf32, #tpu.memory_space<vmem>>, vector<16x32xf32>
    tpu.vector_store %arg12[%c0_161, %c0_162], %525 {strides = array<i32>} : memref<16x32xf32, #tpu.memory_space<vmem>>, vector<16x32xf32>,
    return
  }
  func.func @transform_0(%arg0: i32) -> (i32, i32) {
    %c0_i32 = arith.constant 0 : i32
    %c0_i32_0 = arith.constant 0 : i32
    return %arg0, %c0_i32 : i32, i32
  }
  func.func @transform_1(%arg0: i32) -> (i32, i32) {
    %c0_i32 = arith.constant 0 : i32
    %c0_i32_0 = arith.constant 0 : i32
    return %arg0, %c0_i32 : i32, i32
  }
  func.func @transform_2(%arg0: i32) -> (i32, i32) {
    %c0_i32 = arith.constant 0 : i32
    %c0_i32_0 = arith.constant 0 : i32
    %c0_i32_1 = arith.constant 0 : i32
    return %c0_i32, %c0_i32_0 : i32, i32
  }
  func.func @transform_3(%arg0: i32) -> (i32, i32) {
    %c0_i32 = arith.constant 0 : i32
    %c0_i32_0 = arith.constant 0 : i32
    %c0_i32_1 = arith.constant 0 : i32
    return %c0_i32, %c0_i32_0 : i32, i32
  }
  func.func @transform_4(%arg0: i32) -> (i32, i32) {
    %c0_i32 = arith.constant 0 : i32
    %c0_i32_0 = arith.constant 0 : i32
    %c0_i32_1 = arith.constant 0 : i32
    return %c0_i32, %c0_i32_0 : i32, i32
  }
  func.func @transform_5(%arg0: i32) -> (i32, i32) {
    %c0_i32 = arith.constant 0 : i32
    %c0_i32_0 = arith.constant 0 : i32
    %c0_i32_1 = arith.constant 0 : i32
    return %c0_i32, %c0_i32_0 : i32, i32
  }
  func.func @transform_6(%arg0: i32) -> (i32, i32) {
    %c0_i32 = arith.constant 0 : i32
    %c0_i32_0 = arith.constant 0 : i32
    %c0_i32_1 = arith.constant 0 : i32
    return %c0_i32, %c0_i32_0 : i32, i32
  }
  func.func @transform_7(%arg0: i32) -> (i32, i32) {
    %c0_i32 = arith.constant 0 : i32
    %c0_i32_0 = arith.constant 0 : i32
    %c0_i32_1 = arith.constant 0 : i32
    return %c0_i32, %c0_i32_0 : i32, i32
  }
  func.func @transform_8(%arg0: i32) -> (i32, i32) {
    %c0_i32 = arith.constant 0 : i32
    %c0_i32_0 = arith.constant 0 : i32
    %c0_i32_1 = arith.constant 0 : i32
    return %c0_i32, %c0_i32_0 : i32, i32
  }
  func.func @transform_9(%arg0: i32) -> (i32, i32) {
    %c0_i32 = arith.constant 0 : i32
    %c0_i32_0 = arith.constant 0 : i32
    %c0_i32_1 = arith.constant 0 : i32
    return %c0_i32, %c0_i32_0 : i32, i32
  }
  func.func @transform_10(%arg0: i32) -> (i32, i32) {
    %c0_i32 = arith.constant 0 : i32
    %c0_i32_0 = arith.constant 0 : i32
    %c0_i32_1 = arith.constant 0 : i32
    return %c0_i32, %c0_i32_0 : i32, i32
  }
  func.func @transform_11(%arg0: i32) -> (i32, i32) {
    %c0_i32 = arith.constant 0 : i32
    %c0_i32_0 = arith.constant 0 : i32
    return %arg0, %c0_i32 : i32, i32
  }
}

</mosaic_0001>

<bundles_post_ra>
// kernel: tpu_custom_call.1
= control target key start
LH: loop header
LB: loop body
LE: loop exit
PB: predicated region body
PF: predicated region fallthrough
CT: control target
= control target key end

     0   :  { %16 = vsyncpa [#allocation4], 0  ;;  %s4079_s0 = inlined_call_operand.vmem [shape: f32[16,32], index: 0, kind: input, shape index: {}]   ;;  %s4080_s1 = inlined_call_operand.hbm [shape: f32[16,32], index: 1, kind: input, shape index: {}]   ;;  %s4081_s2 = inlined_call_operand.hbm [shape: bf16[32,96], index: 2, kind: input, shape index: {}]   ;;  %s4082_s3 = inlined_call_operand.vmem [shape: bf16[32,32], index: 3, kind: input, shape index: {}]   ;;  %s4083_s4 = inlined_call_operand.hbm [shape: bf16[32,32], index: 4, kind: input, shape index: {}]   ;;  %s4084_s5 = inlined_call_operand.hbm [shape: bf16[32,64], index: 5, kind: input, shape index: {}]   ;;  %s4085_s6 = inlined_call_operand.hbm [shape: bf16[32,32], index: 6, kind: input, shape index: {}]   ;;  %s4086_s7 = inlined_call_operand.hbm [shape: bf16[32,64], index: 7, kind: input, shape index: {}]   ;;  %s4087_s8 = inlined_call_operand.vmem [shape: bf16[64,32], index: 8, kind: input, shape index: {}]   ;;  %s4088_s9 = inlined_call_operand.vmem [shape: f32[17,32], index: 9, kind: input, shape index: {}]   ;;  %s4089_s10 = inlined_call_operand.vmem [shape: f32[1,64], index: 10, kind: input, shape index: {}]   ;;  %s4090_s11 = inlined_call_operand.hbm [shape: f32[16,32], index: 11, kind: output, shape index: {}]  }
   0x1   :  { %17 = vsyncpa [#allocation7], 0 }
   0x2   :  { %18 = vsyncpa [#allocation10], 0 }
   0x3   :  { %19 = vsyncpa [#allocation13], 0 }
   0x4   :  { %20 = vsyncpa [#allocation5], 0  ;;  %s3365_s17 = smov [#allocation6]   ;;  %s3201_s21 = scalar_lea.hbm %s4081_s2, 256 }
   0x5   :  { %s40_s18 = sshll.u32 %s3365_s17, 4  ;;  %p3202_p0 = scmp.ne.s32.totalorder %s4081_s2, %s3201_s21  ;;  %s41_s18 = int_to_ptr.vmem [resolvable:$true] %s40_s18 }
   0x6   :  { %p3205_p1 = scmp.lt.u32.totalorder %s3201_s21, %s4081_s2 }
   0x8   :  { %p3207_p2 = pnand %p3205_p1, %p3202_p0 }
   0xa   :  { %3210 = shalt.err (!%p3207_p2)
}
   0xb   :  { %s3211_s26 = scalar_lea.vmem %s41_s18, 256  ;;  %p3216_p4 = scmp.lt.s32.totalorder %s41_s18, %s41_s18 }
   0xc   :  { %p3212_p3 = scmp.ne.s32.totalorder %s41_s18, %s3211_s26  ;;  %p3217_p5 = scmp.lt.s32.totalorder %s3211_s26, %s3211_s26 }
   0xe   :  { %p3218_p6 = por %p3217_p5, %p3216_p4 }
  0x10   :  { %p3219_p7 = pnand %p3218_p6, %p3212_p3 }
  0x12   :  { %3222 = shalt.err (!%p3219_p7)
}
  0x13   :  { %s3366_s27 = smov 64   ;;  %s3367_s28 = smov 4  }
  0x14   :  { %46 = dma.hbm_to_vmem [thread:$0]  %s4081_s2, 256, %s41_s18, [#allocation7], %s3366_s27, %s3366_s27, %s3367_s28  }
  0x15   :  { %s3368_s12 = smov [#allocation9]   ;;  %s3369_s14 = smov [#allocation3]  }
  0x16   :  { %s66_s13 = sshll.u32 %s3368_s12, 4  ;;  %s28_s15 = sshll.u32 %s3369_s14, 4  ;;  %s67_s13 = int_to_ptr.vmem [resolvable:$true] %s66_s13  ;;  %s29_s15 = int_to_ptr.vmem [resolvable:$true] %s28_s15 }
  0x17   :  { %s3223_s19 = scalar_lea.hbm %s4084_s5, 256 }
  0x18   :  { %p3224_p8 = scmp.ne.s32.totalorder %s4084_s5, %s3223_s19  ;;  %p3227_p9 = scmp.lt.u32.totalorder %s3223_s19, %s4084_s5 }
  0x1a   :  { %p3229_p10 = pnand %p3227_p9, %p3224_p8 }
  0x1c   :  { %3232 = shalt.err (!%p3229_p10)
}
  0x1d   :  { %s3233_s2 = scalar_lea.vmem %s67_s13, 256  ;;  %p3238_p12 = scmp.lt.s32.totalorder %s67_s13, %s67_s13 }
  0x1e   :  { %p3234_p11 = scmp.ne.s32.totalorder %s67_s13, %s3233_s2  ;;  %p3239_p13 = scmp.lt.s32.totalorder %s3233_s2, %s3233_s2 }
  0x20   :  { %p3240_p0 = por %p3239_p13, %p3238_p12 }
  0x22   :  { %p3241_p1 = pnand %p3240_p0, %p3234_p11 }
  0x24   :  { %3244 = shalt.err (!%p3241_p1)
}
  0x25   :  { %72 = dma.hbm_to_vmem [thread:$0]  %s4084_s5, 256, %s67_s13, [#allocation10], %s3366_s27, %s3366_s27, %s3367_s28  }
  0x26   :  { %s3245_s29 = scalar_lea.hbm %s4080_s1, 256 }
  0x27   :  { %p3246_p2 = scmp.ne.s32.totalorder %s4080_s1, %s3245_s29  ;;  %p3249_p3 = scmp.lt.u32.totalorder %s3245_s29, %s4080_s1 }
  0x29   :  { %p3251_p4 = pnand %p3249_p3, %p3246_p2 }
  0x2b   :  { %3254 = shalt.err (!%p3251_p4)
}
  0x2c   :  { %s3255_s17 = scalar_lea.vmem %s29_s15, 256  ;;  %p3260_p6 = scmp.lt.s32.totalorder %s29_s15, %s29_s15 }
  0x2d   :  { %p3256_p5 = scmp.ne.s32.totalorder %s29_s15, %s3255_s17  ;;  %p3261_p7 = scmp.lt.s32.totalorder %s3255_s17, %s3255_s17 }
  0x2f   :  { %p3262_p8 = por %p3261_p7, %p3260_p6 }
  0x31   :  { %p3263_p9 = pnand %p3262_p8, %p3256_p5 }
  0x33   :  { %3266 = shalt.err (!%p3263_p9)
}
  0x34   :  { %s3370_s5 = smov 128   ;;  %s3371_s13 = smov 8  }
  0x35   :  { %34 = dma.hbm_to_vmem [thread:$0]  %s4080_s1, 256, %s29_s15, [#allocation4], %s3370_s5, %s3370_s5, %s3371_s13  }
  0x36   :  { %s3372_s21 = smov [#allocation8]   ;;  %s3373_s23 = smov [#allocation11]  }
  0x37   :  { %s54_s22 = sshll.u32 %s3372_s21, 4  ;;  %s78_s2 = sshll.u32 %s3373_s23, 4  ;;  %s55_s22 = int_to_ptr.vmem [resolvable:$true] %s54_s22  ;;  %s79_s2 = int_to_ptr.vmem [resolvable:$true] %s78_s2 }
  0x38   :  { %s3267_s25 = scalar_lea.hbm %s4083_s4, 256 }
  0x39   :  { %p3268_p10 = scmp.ne.s32.totalorder %s4083_s4, %s3267_s25  ;;  %p3271_p11 = scmp.lt.u32.totalorder %s3267_s25, %s4083_s4 }
  0x3b   :  { %p3273_p12 = pnand %p3271_p11, %p3268_p10 }
  0x3d   :  { %3276 = shalt.err (!%p3273_p12)
}
  0x3e   :  { %s3277_s1 = scalar_lea.vmem %s55_s22, 256  ;;  %p3282_p0 = scmp.lt.s32.totalorder %s55_s22, %s55_s22 }
  0x3f   :  { %p3278_p13 = scmp.ne.s32.totalorder %s55_s22, %s3277_s1  ;;  %p3283_p1 = scmp.lt.s32.totalorder %s3277_s1, %s3277_s1 }
  0x41   :  { %p3284_p2 = por %p3283_p1, %p3282_p0 }
  0x43   :  { %p3285_p3 = pnand %p3284_p2, %p3278_p13 }
  0x45   :  { %3288 = shalt.err (!%p3285_p3)
}
  0x46   :  { %60 = dma.hbm_to_vmem [thread:$0]  %s4083_s4, 256, %s55_s22, [#allocation7], %s3366_s27, %s3366_s27, %s3367_s28  }
  0x47   :  { %s3289_s19 = scalar_lea.hbm %s4085_s6, 256 }
  0x48   :  { %p3290_p4 = scmp.ne.s32.totalorder %s4085_s6, %s3289_s19  ;;  %p3293_p5 = scmp.lt.u32.totalorder %s3289_s19, %s4085_s6 }
  0x4a   :  { %p3295_p6 = pnand %p3293_p5, %p3290_p4 }
  0x4c   :  { %3298 = shalt.err (!%p3295_p6)
}
  0x4d   :  { %s3299_s24 = scalar_lea.vmem %s79_s2, 256  ;;  %p3304_p8 = scmp.lt.s32.totalorder %s79_s2, %s79_s2 }
  0x4e   :  { %p3300_p7 = scmp.ne.s32.totalorder %s79_s2, %s3299_s24  ;;  %p3305_p9 = scmp.lt.s32.totalorder %s3299_s24, %s3299_s24 }
  0x50   :  { %p3306_p10 = por %p3305_p9, %p3304_p8 }
  0x52   :  { %p3307_p11 = pnand %p3306_p10, %p3300_p7 }
  0x54   :  { %3310 = shalt.err (!%p3307_p11)
}
  0x55   :  { %84 = dma.hbm_to_vmem [thread:$0]  %s4085_s6, 256, %s79_s2, [#allocation10], %s3366_s27, %s3366_s27, %s3367_s28  }
  0x56   :  { %s3374_s25 = smov [#allocation12]   ;;  %s3311_s12 = scalar_lea.hbm %s4086_s7, 256 }
  0x57   :  { %s90_s26 = sshll.u32 %s3374_s25, 4  ;;  %p3312_p12 = scmp.ne.s32.totalorder %s4086_s7, %s3311_s12  ;;  %s91_s26 = int_to_ptr.vmem [resolvable:$true] %s90_s26 }
  0x58   :  { %p3315_p13 = scmp.lt.u32.totalorder %s3311_s12, %s4086_s7 }
  0x5a   :  { %p3317_p0 = pnand %p3315_p13, %p3312_p12 }
  0x5c   :  { %3320 = shalt.err (!%p3317_p0)
}
  0x5d   :  { %s3321_s17 = scalar_lea.vmem %s91_s26, 256  ;;  %p3326_p2 = scmp.lt.s32.totalorder %s91_s26, %s91_s26 }
  0x5e   :  { %p3322_p1 = scmp.ne.s32.totalorder %s91_s26, %s3321_s17  ;;  %p3327_p3 = scmp.lt.s32.totalorder %s3321_s17, %s3321_s17 }
  0x60   :  { %p3328_p4 = por %p3327_p3, %p3326_p2 }
  0x62   :  { %p3329_p5 = pnand %p3328_p4, %p3322_p1 }
  0x64   :  { %3332 = shalt.err (!%p3329_p5)
}
  0x65   :  { %96 = dma.hbm_to_vmem [thread:$0]  %s4086_s7, 256, %s91_s26, [#allocation13], %s3366_s27, %s3366_s27, %s3367_s28  }
  0x66   :  { %3355 = dma.done.wait [#allocation4], 256  }
  0x67   :  { %3356 = vsyncadd [#allocation4], 4294967040 }
  0x68   :  { %3357 = dma.done.wait [#allocation7], 512  }
  0x69   :  { %3358 = vsyncadd [#allocation7], 4294966784 }
  0x6a   :  { %3359 = dma.done.wait [#allocation10], 512  }
  0x6b   :  { %3360 = vsyncadd [#allocation10], 4294966784 }
  0x6c   :  { %3361 = dma.done.wait [#allocation13], 256  }
  0x6d   :  { %3362 = vsyncadd [#allocation13], 4294967040  ;;  %v191_v0 = vlaneseq  ;;  %v3375_v1 = vmov 0.0   ;;  %vm3376_vm0 = vmmov 0   ;;  %v3105_v4 = vld [vmem:[#allocation6] sm:$0xff]   ;;  %v3106_v5 = vld [vmem:[#allocation6 + $0x8] sm:$0xff]  }
  0x6e   :  { %2827 = vmatprep.subr.bf16.mxu1 %v3375_v1  ;;  %2831 = vmatprep.mubr.msk.bf16.mxu1 %vm3376_vm0, %v3375_v1  ;;  %v3553_v6 = vld [vmem:[%s4079_s0] sm:$0xff]  ;;  %v3558_v7 = vld [vmem:[%s4079_s0 + $0x8] sm:$0xff]  ;;  %vm146_vm1 = vcmask 261120   ;;  %s3377_s18 = smov 32   ;;  %s3378_s0 = smov 88   ;;  %vm222_vm2 = vcmask 64512  }
  0x6f   :  { %v3544_v2 = vshrl.u32 %v191_v0, 7  ;;  %2841 = vmatprep.subr.bf16.mxu0 %v3375_v1  ;;  %2843 = vmatprep.mubr.msk.bf16.mxu0 %vm3376_vm0, %v3375_v1  ;;  %v3563_v8 = vld [vmem:[%s4088_s9] sm:$0xff]  ;;  %v129_v10 = vpack.c.bf16 %v3558_v7, %v3553_v6  ;;  %s3379_s24 = smov 96   ;;  %s3380_s4 = smov 80   ;;  %vm289_vm3 = vcmask 1043456   ;;  %vm450_vm4 = vcmask 130112  }
  0x70   :  { %2828 = vmatpush3.bf16.msra.mxu1 %v3105_v4  ;;  %s3381_s22 = smov 120   ;;  %s3382_s25 = smov 72   ;;  %vm567_vm5 = vcmask 195712   ;;  %vm684_vm6 = vcmask 261312   ;;  %vm2538_vm7 = vcmask 523264  }
  0x71   :  { %v199_v3 = vsub.s32 1, %v3544_v2  ;;  %2829 = vmatprep.subr.bf16.mxu1 %v3375_v1  ;;  %v193_v11 = vsub.s32 0, %v3544_v2  ;;  %s3383_s26 = smov 112   ;;  %s3384_s29 = smov 104  }
  0x72   :  { %s3385_s30 = smov 56   ;;  %s3386_s12 = smov 48  }
  0x73   :  { %v200_v9 = vrot.slane %v3563_v8, %v199_v3  ;;  %v194_v13 = vrot.slane %v3563_v8, %v193_v11  ;;  %s3387_s1 = smov 40   ;;  %s3389_s15 = smov 24  }
  0x74   :  { %2830 = vmatpush3.bf16.msra.mxu1 %v3106_v5 }
  0x75   :  { %202 = vrot.lane.b32.xlu0 %v200_v9, %s3377_s18  ;;  %2835 = vmatprep.subr.bf16.mxu1 %v3375_v1 }
  0x77   :  { %2832 = vmatmul.mubr.msk.bf16.vlgmr.msra.gmra.mrb[0].mxu1 %vm146_vm1, %v129_v10 }
  0x78   :  { %2837 = vmatprep.mubr.msk.bf16.mxu1 %vm3376_vm0, %v3375_v1 }
  0xe7   :  { %v203_v12 = vpop.permute.xlu0 %202 }
 0x14a   :  { %v3580_v14 = vpop.f32.mrb[0].mxu1 }
 0x14b   :  { %v205_v15 = vadd.f32 %v203_v12, %v3580_v14  ;;  %v2833_v16 = vpop.f32.mrb[1].mxu1  ;;  %v195_v18 = vadd.f32 %v194_v13, %v3580_v14 }
 0x14c   :  { %v3583_v17 = vpop.f32.mrb[2].mxu1 }
 0x14d   :  { %v218_v19 = vpack.c.bf16 %v205_v15, %v205_v15  ;;  %v2834_v20 = vpop.f32.mrb[3].mxu1  ;;  %v217_v21 = vpack.c.bf16 %v195_v18, %v195_v18  ;;  %v206_v22 = vadd.f32 %v203_v12, %v3583_v17  ;;  %v196_v23 = vadd.f32 %v194_v13, %v3583_v17 }
 0x14f   :  { %337 = vrot.lane.b32.xlu1 %v218_v19, %s3378_s0  ;;  %220 = vrot.lane.b32.xlu0 %v218_v19, %s3379_s24  ;;  %v687_v24 = vpack.c.bf16 %v206_v22, %v206_v22  ;;  %v686_v25 = vpack.c.bf16 %v196_v23, %v196_v23  ;;  %v209_v23 = vsub.s32 2, %v3544_v2 }
 0x153   :  { %454 = vrot.lane.b32.xlu0 %v218_v19, %s3380_s4  ;;  %335 = vrot.lane.b32.xlu1 %v217_v21, %s3381_s22 }
 0x157   :  { %571 = vrot.lane.b32.xlu0 %v218_v19, %s3382_s25  ;;  %452 = vrot.lane.b32.xlu1 %v217_v21, %s3383_s26 }
 0x15b   :  { %569 = vrot.lane.b32.xlu1 %v217_v21, %s3384_s29  ;;  %689 = vrot.lane.b32.xlu0 %v687_v24, %s3379_s24 }
 0x15f   :  { %804 = vrot.lane.b32.xlu1 %v687_v24, %s3378_s0  ;;  %802 = vrot.lane.b32.xlu0 %v686_v25, %s3381_s22 }
 0x163   :  { %920 = vrot.lane.b32.xlu1 %v687_v24, %s3380_s4  ;;  %918 = vrot.lane.b32.xlu0 %v686_v25, %s3383_s26 }
 0x167   :  { %1036 = vrot.lane.b32.xlu1 %v687_v24, %s3382_s25  ;;  %1034 = vrot.lane.b32.xlu0 %v686_v25, %s3384_s29 }
 0x1c1   :  { %v221_v26 = vpop.permute.xlu0 %220  ;;  %v338_v28 = vpop.permute.xlu1 %337 }
 0x1c2   :  { %v227_v27 = vsel %vm222_vm2, %v221_v26, 0  ;;  %v343_v29 = vsel %vm222_vm2, %v338_v28, 0  ;;  %v210_v26 = vrot.slane %v3563_v8, %v209_v23 }
 0x1c3   :  { %2836 = vmatpush3.bf16.xpose.msra.mxu1 %v227_v27 }
 0x1c4   :  { %2847 = vmatprep.subr.bf16.mxu1 %v3375_v1 }
 0x1c5   :  { %v455_v30 = vpop.permute.xlu0 %454  ;;  %v336_v31 = vpop.permute.xlu1 %335 }
 0x1c6   :  { %v460_v32 = vsel %vm222_vm2, %v455_v30, 0 }
 0x1c9   :  { %v572_v33 = vpop.permute.xlu0 %571  ;;  %v453_v34 = vpop.permute.xlu1 %452 }
 0x1ca   :  { %2838 = vmatmul.mubr.msk.bf16.vlgmr.msra.gmra.mrb[4].mxu1 %vm222_vm2, %v217_v21  ;;  %v577_v35 = vsel %vm222_vm2, %v572_v33, 0 }
 0x1cb   :  { %2848 = vmatpush3.bf16.xpose.msra.mxu1 %v343_v29  ;;  %2849 = vmatprep.mubr.msk.bf16.mxu1 %vm3376_vm0, %v3375_v1 }
 0x1cc   :  { %2859 = vmatprep.subr.bf16.mxu1 %v3375_v1 }
 0x1cd   :  { %v690_v36 = vpop.permute.xlu0 %689  ;;  %v570_v37 = vpop.permute.xlu1 %569 }
 0x1ce   :  { %v695_v38 = vsel %vm222_vm2, %v690_v36, 0 }
 0x1d1   :  { %v805_v39 = vpop.permute.xlu1 %804  ;;  %v803_v42 = vpop.permute.xlu0 %802 }
 0x1d2   :  { %2850 = vmatmul.mubr.msk.bf16.vlgmr.msra.gmra.mrb[8].mxu1 %vm222_vm2, %v336_v31  ;;  %v810_v40 = vsel %vm222_vm2, %v805_v39, 0 }
 0x1d3   :  { %2860 = vmatpush3.bf16.xpose.msra.mxu1 %v460_v32  ;;  %2861 = vmatprep.mubr.msk.bf16.mxu1 %vm3376_vm0, %v3375_v1 }
 0x1d4   :  { %2871 = vmatprep.subr.bf16.mxu1 %v3375_v1 }
 0x1d5   :  { %v921_v41 = vpop.permute.xlu1 %920  ;;  %v919_v45 = vpop.permute.xlu0 %918 }
 0x1d6   :  { %v926_v43 = vsel %vm222_vm2, %v921_v41, 0 }
 0x1d9   :  { %v1037_v44 = vpop.permute.xlu1 %1036  ;;  %v1035_v47 = vpop.permute.xlu0 %1034 }
 0x1da   :  { %2862 = vmatmul.mubr.msk.bf16.vlgmr.msra.gmra.mrb[12].mxu1 %vm222_vm2, %v453_v34  ;;  %v1042_v46 = vsel %vm222_vm2, %v1037_v44, 0 }
 0x1db   :  { %2872 = vmatpush3.bf16.xpose.msra.mxu1 %v577_v35  ;;  %2873 = vmatprep.mubr.msk.bf16.mxu1 %vm3376_vm0, %v3375_v1 }
 0x1dc   :  { %2883 = vmatprep.subr.bf16.mxu1 %v3375_v1 }
 0x1e2   :  { %2874 = vmatmul.mubr.msk.bf16.vlgmr.msra.gmra.mrb[16].mxu1 %vm222_vm2, %v570_v37 }
 0x1e3   :  { %2884 = vmatpush3.bf16.xpose.msra.mxu1 %v695_v38  ;;  %2885 = vmatprep.mubr.msk.bf16.mxu1 %vm3376_vm0, %v3375_v1 }
 0x1e4   :  { %2895 = vmatprep.subr.bf16.mxu1 %v3375_v1 }
 0x1ea   :  { %2886 = vmatmul.mubr.msk.bf16.vlgmr.msra.gmra.mrb[20].mxu1 %vm222_vm2, %v686_v25 }
 0x1eb   :  { %2896 = vmatpush3.bf16.xpose.msra.mxu1 %v810_v40  ;;  %2897 = vmatprep.mubr.msk.bf16.mxu1 %vm3376_vm0, %v3375_v1 }
 0x1ec   :  { %2907 = vmatprep.subr.bf16.mxu1 %v3375_v1 }
 0x1f2   :  { %2898 = vmatmul.mubr.msk.bf16.vlgmr.msra.gmra.mrb[24].mxu1 %vm222_vm2, %v803_v42 }
 0x1f3   :  { %2908 = vmatpush3.bf16.xpose.msra.mxu1 %v926_v43  ;;  %2909 = vmatprep.mubr.msk.bf16.mxu1 %vm3376_vm0, %v3375_v1 }
 0x1f4   :  { %2919 = vmatprep.subr.bf16.mxu1 %v3375_v1 }
 0x1fa   :  { %2910 = vmatmul.mubr.msk.bf16.vlgmr.msra.gmra.mrb[28].mxu1 %vm222_vm2, %v919_v45 }
 0x1fb   :  { %2920 = vmatpush3.bf16.xpose.msra.mxu1 %v1042_v46  ;;  %2921 = vmatprep.mubr.msk.bf16.mxu1 %vm3376_vm0, %v3375_v1 }
 0x1fc   :  { %2931 = vmatprep.subr.bf16.mxu1 %v3375_v1 }
 0x202   :  { %2922 = vmatmul.mubr.msk.bf16.vlgmr.msra.gmra.mrb[32].mxu1 %vm222_vm2, %v1035_v47 }
 0x203   :  { %2935 = vmatprep.mubr.msk.bf16.mxu1 %vm3376_vm0, %v3375_v1 }
 0x29d   :  { %v263_v48 = vpop.f32.mrb[4].mxu1 }
 0x29e   :  { %v3642_v49 = vmul.f32 0.35355338, %v263_v48  ;;  %v2839_v50 = vpop.f32.mrb[5].mxu1 }
 0x29f   :  { %v266_v51 = vpop.f32.mrb[6].mxu1 }
 0x2a0   :  { %v2840_v52 = vpop.f32.mrb[7].mxu1  ;;  %v270_v53 = vsel %vm222_vm2, %v3642_v49, -inf }
 0x2a1   :  { %271 = vmax.xlane.f32.xlu1 %v270_v53 }
 0x2a5   :  { %v379_v54 = vpop.f32.mrb[8].mxu1 }
 0x2a6   :  { %v3646_v55 = vmul.f32 0.35355338, %v379_v54  ;;  %v2851_v56 = vpop.f32.mrb[9].mxu1 }
 0x2a7   :  { %v382_v57 = vpop.f32.mrb[10].mxu1 }
 0x2a8   :  { %v2852_v58 = vpop.f32.mrb[11].mxu1  ;;  %v386_v59 = vsel %vm222_vm2, %v3646_v55, -inf }
 0x2a9   :  { %387 = vmax.xlane.f32.xlu0 %v386_v59 }
 0x2ad   :  { %v496_v60 = vpop.f32.mrb[12].mxu1 }
 0x2ae   :  { %v502_v61 = vmul.f32 0.35355338, %v496_v60  ;;  %v2863_v62 = vpop.f32.mrb[13].mxu1 }
 0x2af   :  { %v499_v63 = vpop.f32.mrb[14].mxu1 }
 0x2b0   :  { %v2864_v0 = vpop.f32.mrb[15].mxu1  ;;  %v503_v4 = vsel %vm222_vm2, %v502_v61, -inf }
 0x2b1   :  { %504 = vmax.xlane.f32.xlu0 %v503_v4 }
 0x2b5   :  { %v613_v5 = vpop.f32.mrb[16].mxu1 }
 0x2b6   :  { %v619_v9 = vmul.f32 0.35355338, %v613_v5  ;;  %v2875_v10 = vpop.f32.mrb[17].mxu1 }
 0x2b7   :  { %v616_v12 = vpop.f32.mrb[18].mxu1 }
 0x2b8   :  { %v2876_v13 = vpop.f32.mrb[19].mxu1  ;;  %v620_v15 = vsel %vm222_vm2, %v619_v9, -inf }
 0x2b9   :  { %621 = vmax.xlane.f32.xlu1 %v620_v15 }
 0x2bd   :  { %v731_v16 = vpop.f32.mrb[20].mxu1 }
 0x2be   :  { %v3652_v18 = vmul.f32 0.35355338, %v731_v16  ;;  %v2887_v19 = vpop.f32.mrb[21].mxu1 }
 0x2bf   :  { %v734_v20 = vpop.f32.mrb[22].mxu1 }
 0x2c0   :  { %v2888_v21 = vpop.f32.mrb[23].mxu1  ;;  %v738_v22 = vsel %vm222_vm2, %v3652_v18, -inf }
 0x2c1   :  { %739 = vmax.xlane.f32.xlu0 %v738_v22 }
 0x2c5   :  { %v846_v24 = vpop.f32.mrb[24].mxu1 }
 0x2c6   :  { %v2899_v25 = vpop.f32.mrb[25].mxu1  ;;  %v852_v37 = vmul.f32 0.35355338, %v846_v24 }
 0x2c7   :  { %v849_v27 = vpop.f32.mrb[26].mxu1 }
 0x2c8   :  { %v2900_v28 = vpop.f32.mrb[27].mxu1  ;;  %v853_v38 = vsel %vm222_vm2, %v852_v37, -inf }
 0x2ca   :  { %212 = vrot.lane.b32.xlu1 %v210_v26, %s3366_s27 }
 0x2cd   :  { %v962_v29 = vpop.f32.mrb[28].mxu1 }
 0x2ce   :  { %v2911_v30 = vpop.f32.mrb[29].mxu1  ;;  %v968_v53 = vmul.f32 0.35355338, %v962_v29 }
 0x2cf   :  { %v965_v31 = vpop.f32.mrb[30].mxu1 }
 0x2d0   :  { %v2912_v32 = vpop.f32.mrb[31].mxu1  ;;  %v969_v57 = vsel %vm222_vm2, %v968_v53, -inf }
 0x2d5   :  { %v1078_v33 = vpop.f32.mrb[32].mxu1 }
 0x2d6   :  { %v2923_v34 = vpop.f32.mrb[33].mxu1  ;;  %v1084_v56 = vmul.f32 0.35355338, %v1078_v33 }
 0x2d7   :  { %v1081_v35 = vpop.f32.mrb[34].mxu1 }
 0x2d8   :  { %v2924_v36 = vpop.f32.mrb[35].mxu1 }
 0x2ee   :  { %854 = vmax.xlane.f32.xlu1 %v853_v38 }
 0x32e   :  { %v272_v39 = vpop.xlane.xlu1 %271 }
 0x32f   :  { %v273_v46 = vsub.f32 %v3642_v49, %v272_v39  ;;  %v1085_v49 = vsel %vm222_vm2, %v1084_v56, -inf }
 0x331   :  { %v274_v50 = vmul.f32 1.442695, %v273_v46 }
 0x336   :  { %v388_v47 = vpop.xlane.xlu0 %387 }
 0x337   :  { %v389_v51 = vsub.f32 %v3646_v55, %v388_v47 }
 0x33e   :  { %v505_v52 = vpop.xlane.xlu0 %504 }
 0x346   :  { %v622_v40 = vpop.xlane.xlu1 %621 }
 0x347   :  { %v623_v45 = vsub.f32 %v619_v9, %v622_v40 }
 0x349   :  { %v624_v48 = vmul.f32 1.442695, %v623_v45 }
 0x34a   :  { %v213_v41 = vpop.permute.xlu1 %212 }
 0x34b   :  { %v215_v42 = vadd.f32 %v213_v41, %v3580_v14  ;;  %v3664_v43 = vadd.f32 %v213_v41, %v3583_v17  ;;  %3121 = vpow2.f32 %v624_v48  ;;  %v390_v14 = vmul.f32 1.442695, %v389_v51 }
 0x34c   :  { %3123 = vpow2.f32 %v274_v50  ;;  %v506_v17 = vsub.f32 %v502_v61, %v505_v52 }
 0x34d   :  { %v282_v44 = vpack.c.bf16 %v215_v42, %v215_v42  ;;  %3125 = vpow2.f32 %v390_v14  ;;  %v750_v52 = vpack.c.bf16 %v3664_v43, %v3664_v43 }
 0x34e   :  { %v507_v54 = vmul.f32 1.442695, %v506_v17  ;;  %v740_v13 = vpop.xlane.xlu0 %739 }
 0x34f   :  { %284 = vrot.lane.b32.xlu0 %v282_v44, %s3366_s27  ;;  %398 = vrot.lane.b32.xlu1 %v282_v44, %s3385_s30  ;;  %v741_v15 = vsub.f32 %v3652_v18, %v740_v13 }
 0x350   :  { %3127 = vpow2.f32 %v507_v54 }
 0x351   :  { %v742_v16 = vmul.f32 1.442695, %v741_v15 }
 0x355   :  { %v3671_v58 = vpop.eup %3121 }
 0x356   :  { %v3124_v59 = vpop.eup %3123  ;;  %v626_v55 = vsel %vm222_vm2, %v3671_v58, 0.0 }
 0x357   :  { %v276_v60 = vsel %vm222_vm2, %v3124_v59, 0.0  ;;  %v3126_v61 = vpop.eup %3125 }
 0x358   :  { %v392_v62 = vsel %vm222_vm2, %v3126_v61, 0.0 }
 0x35a   :  { %v3678_v63 = vpop.eup %3127 }
 0x35b   :  { %v509_v5 = vsel %vm222_vm2, %v3678_v63, 0.0 }
 0x36e   :  { %970 = vmax.xlane.f32.xlu0 %v969_v57 }
 0x372   :  { %1086 = vmax.xlane.f32.xlu0 %v1085_v49 }
 0x373   :  { %627 = vadd.xlane.f32.xlu1 %v626_v55 }
 0x376   :  { %277 = vadd.xlane.f32.xlu0 %v276_v60 }
 0x37a   :  { %393 = vadd.xlane.f32.xlu0 %v392_v62 }
 0x37b   :  { %v855_v0 = vpop.xlane.xlu1 %854 }
 0x37c   :  { %v856_v4 = vsub.f32 %v852_v37, %v855_v0 }
 0x37e   :  { %v857_v9 = vmul.f32 1.442695, %v856_v4  ;;  %510 = vadd.xlane.f32.xlu0 %v509_v5 }
 0x380   :  { %3129 = vpow2.f32 %v857_v9 }
 0x381   :  { %3131 = vpow2.f32 %v742_v16 }
 0x38a   :  { %v3682_v10 = vpop.eup %3129 }
 0x38b   :  { %v859_v12 = vsel %vm222_vm2, %v3682_v10, 0.0  ;;  %v3689_v19 = vpop.eup %3131 }
 0x38c   :  { %860 = vadd.xlane.f32.xlu1 %v859_v12  ;;  %v744_v20 = vsel %vm222_vm2, %v3689_v19, 0.0 }
 0x394   :  { %515 = vrot.lane.b32.xlu0 %v282_v44, %s3386_s12 }
 0x39d   :  { %632 = vrot.lane.b32.xlu1 %v282_v44, %s3387_s1 }
 0x3b3   :  { %745 = vadd.xlane.f32.xlu0 %v744_v20 }
 0x3c1   :  { %v285_v21 = vpop.permute.xlu0 %284  ;;  %v399_v38 = vpop.permute.xlu1 %398 }
 0x3c2   :  { %v291_v22 = vsel %vm289_vm3, %v285_v21, 0  ;;  %v404_v41 = vsel %vm289_vm3, %v399_v38, 0 }
 0x3c3   :  { %2842 = vmatpush3.bf16.msra.mxu0 %v291_v22 }
 0x3c4   :  { %2853 = vmatprep.subr.bf16.mxu0 %v3375_v1 }
 0x3fb   :  { %v971_v24 = vpop.xlane.xlu0 %970 }
 0x3fc   :  { %v972_v18 = vsub.f32 %v968_v53, %v971_v24 }
 0x3fe   :  { %v973_v25 = vmul.f32 1.442695, %v972_v18 }
 0x3ff   :  { %v1087_v26 = vpop.xlane.xlu0 %1086 }
 0x400   :  { %3133 = vpow2.f32 %v973_v25  ;;  %v1088_v27 = vsub.f32 %v1084_v56, %v1087_v26  ;;  %v628_v42 = vpop.xlane.xlu1 %627 }
 0x402   :  { %v1089_v28 = vmul.f32 1.442695, %v1088_v27 }
 0x403   :  { %v278_v29 = vpop.xlane.xlu0 %277 }
 0x404   :  { %3135 = vpow2.f32 %v1089_v28 }
 0x405   :  { %3137 = vrcp.f32 %v278_v29 }
 0x407   :  { %v394_v30 = vpop.xlane.xlu0 %393 }
 0x408   :  { %3139 = vrcp.f32 %v394_v30 }
 0x40a   :  { %v3695_v31 = vpop.eup %3133 }
 0x40b   :  { %v975_v32 = vsel %vm222_vm2, %v3695_v31, 0.0  ;;  %v511_v34 = vpop.xlane.xlu0 %510 }
 0x40c   :  { %976 = vadd.xlane.f32.xlu0 %v975_v32  ;;  %3141 = vrcp.f32 %v511_v34 }
 0x40d   :  { %3143 = vrcp.f32 %v628_v42 }
 0x40e   :  { %v3699_v33 = vpop.eup %3135 }
 0x40f   :  { %v3138_v35 = vpop.eup %3137  ;;  %v1091_v36 = vsel %vm222_vm2, %v3699_v33, 0.0  ;;  %v516_v45 = vpop.permute.xlu0 %515 }
 0x410   :  { %1092 = vadd.xlane.f32.xlu1 %v1091_v36  ;;  %v280_v37 = vmul.f32 %v3138_v35, %v3124_v59  ;;  %v521_v50 = vsel %vm289_vm3, %v516_v45, 0 }
 0x412   :  { %v281_v39 = vpack.c.bf16 %v280_v37, %v280_v37  ;;  %v3140_v40 = vpop.eup %3139 }
 0x413   :  { %v396_v44 = vmul.f32 %v3140_v40, %v3126_v61 }
 0x414   :  { %2844 = vmatmul.mubr.msk.bf16.vlgmr.msra.gmra.mrb[0].mxu0 %vm222_vm2, %v281_v39 }
 0x415   :  { %2854 = vmatpush3.bf16.msra.mxu0 %v404_v41  ;;  %2855 = vmatprep.mubr.msk.bf16.mxu0 %vm3376_vm0, %v3375_v1  ;;  %v397_v46 = vpack.c.bf16 %v396_v44, %v396_v44 }
 0x416   :  { %2865 = vmatprep.subr.bf16.mxu0 %v3375_v1  ;;  %v3142_v47 = vpop.eup %3141 }
 0x417   :  { %v513_v51 = vmul.f32 %v3142_v47, %v3678_v63  ;;  %v3144_v53 = vpop.eup %3143 }
 0x418   :  { %v630_v56 = vmul.f32 %v3144_v53, %v3671_v58 }
 0x419   :  { %v861_v48 = vpop.xlane.xlu1 %860  ;;  %v514_v17 = vpack.c.bf16 %v513_v51, %v513_v51 }
 0x41a   :  { %v631_v43 = vpack.c.bf16 %v630_v56, %v630_v56 }
 0x41c   :  { %2856 = vmatmul.mubr.msk.bf16.vlgmr.msra.gmra.mrb[4].mxu0 %vm222_vm2, %v397_v46 }
 0x41d   :  { %2866 = vmatpush3.bf16.msra.mxu0 %v521_v50  ;;  %2867 = vmatprep.mubr.msk.bf16.mxu0 %vm3376_vm0, %v3375_v1  ;;  %v633_v14 = vpop.permute.xlu1 %632 }
 0x41e   :  { %2877 = vmatprep.subr.bf16.mxu0 %v3375_v1  ;;  %v638_v54 = vsel %vm289_vm3, %v633_v14, 0  ;;  %v3107_v14 = vld [vmem:[%s4082_s3] sm:$0xff]  }
 0x41f   :  { %2932 = vmatpush3.bf16.msra.mxu1 %v3107_v14 }
 0x420   :  { %2933 = vmatprep.subr.bf16.mxu1 %v3375_v1 }
 0x422   :  { %752 = vrot.lane.b32.xlu0 %v750_v52, %s3366_s27  ;;  %s3388_s27 = smov 16  }
 0x424   :  { %2868 = vmatmul.mubr.msk.bf16.vlgmr.msra.gmra.mrb[8].mxu0 %vm222_vm2, %v514_v17  ;;  %v3108_v17 = vld [vmem:[%s4082_s3 + $0x8] sm:$0xff]  }
 0x425   :  { %2878 = vmatpush3.bf16.msra.mxu0 %v638_v54  ;;  %2879 = vmatprep.mubr.msk.bf16.mxu0 %vm3376_vm0, %v3375_v1 }
 0x426   :  { %865 = vrot.lane.b32.xlu0 %v750_v52, %s3385_s30  ;;  %2889 = vmatprep.subr.bf16.mxu0 %v3375_v1 }
 0x427   :  { %2934 = vmatpush3.bf16.msra.mxu1 %v3108_v17 }
 0x428   :  { %2947 = vmatprep.subr.bf16.mxu1 %v3375_v1 }
 0x42a   :  { %981 = vrot.lane.b32.xlu0 %v750_v52, %s3386_s12 }
 0x42c   :  { %2880 = vmatmul.mubr.msk.bf16.vlgmr.msra.gmra.mrb[12].mxu0 %vm222_vm2, %v631_v43 }
 0x42d   :  { %2891 = vmatprep.mubr.msk.bf16.mxu0 %vm3376_vm0, %v3375_v1 }
 0x42e   :  { %1097 = vrot.lane.b32.xlu0 %v750_v52, %s3387_s1 }
 0x440   :  { %v746_v57 = vpop.xlane.xlu0 %745 }
 0x441   :  { %3145 = vrcp.f32 %v746_v57 }
 0x442   :  { %3147 = vrcp.f32 %v861_v48 }
 0x44b   :  { %v3146_v49 = vpop.eup %3145 }
 0x44c   :  { %v748_v58 = vmul.f32 %v3146_v49, %v3689_v19  ;;  %v3148_v62 = vpop.eup %3147 }
 0x44d   :  { %v863_v4 = vmul.f32 %v3148_v62, %v3682_v10 }
 0x44e   :  { %v749_v61 = vpack.c.bf16 %v748_v58, %v748_v58 }
 0x44f   :  { %v864_v12 = vpack.c.bf16 %v863_v4, %v863_v4  ;;  %v1159_v4 = vsub.s32 3, %v3544_v2 }
 0x499   :  { %v977_v59 = vpop.xlane.xlu0 %976 }
 0x49a   :  { %3149 = vrcp.f32 %v977_v59 }
 0x49d   :  { %v753_v55 = vpop.permute.xlu0 %752  ;;  %v1093_v5 = vpop.xlane.xlu1 %1092 }
 0x49e   :  { %v758_v60 = vsel %vm289_vm3, %v753_v55, 0  ;;  %3151 = vrcp.f32 %v1093_v5  ;;  %v1160_v5 = vrot.slane %v3563_v8, %v1159_v4 }
 0x49f   :  { %2890 = vmatpush3.bf16.msra.mxu0 %v758_v60 }
 0x4a0   :  { %2901 = vmatprep.subr.bf16.mxu0 %v3375_v1 }
 0x4a1   :  { %v866_v63 = vpop.permute.xlu0 %865 }
 0x4a2   :  { %v871_v0 = vsel %vm289_vm3, %v866_v63, 0  ;;  %2892 = vmatmul.mubr.msk.bf16.vlgmr.msra.gmra.mrb[16].mxu0 %vm222_vm2, %v749_v61 }
 0x4a3   :  { %2902 = vmatpush3.bf16.msra.mxu0 %v871_v0  ;;  %2903 = vmatprep.mubr.msk.bf16.mxu0 %vm3376_vm0, %v3375_v1 }
 0x4a4   :  { %2913 = vmatprep.subr.bf16.mxu0 %v3375_v1  ;;  %v3150_v13 = vpop.eup %3149 }
 0x4a5   :  { %v982_v9 = vpop.permute.xlu0 %981  ;;  %v979_v16 = vmul.f32 %v3150_v13, %v3695_v31 }
 0x4a6   :  { %v987_v15 = vsel %vm289_vm3, %v982_v9, 0 }
 0x4a7   :  { %v980_v19 = vpack.c.bf16 %v979_v16, %v979_v16 }
 0x4a8   :  { %v3152_v20 = vpop.eup %3151 }
 0x4a9   :  { %v1098_v10 = vpop.permute.xlu0 %1097  ;;  %v1095_v22 = vmul.f32 %v3152_v20, %v3699_v33 }
 0x4aa   :  { %2904 = vmatmul.mubr.msk.bf16.vlgmr.msra.gmra.mrb[20].mxu0 %vm222_vm2, %v864_v12  ;;  %v1103_v21 = vsel %vm289_vm3, %v1098_v10, 0 }
 0x4ab   :  { %2914 = vmatpush3.bf16.msra.mxu0 %v987_v15  ;;  %2915 = vmatprep.mubr.msk.bf16.mxu0 %vm3376_vm0, %v3375_v1  ;;  %v1096_v24 = vpack.c.bf16 %v1095_v22, %v1095_v22 }
 0x4ac   :  { %2925 = vmatprep.subr.bf16.mxu0 %v3375_v1 }
 0x4b2   :  { %2916 = vmatmul.mubr.msk.bf16.vlgmr.msra.gmra.mrb[24].mxu0 %vm222_vm2, %v980_v19 }
 0x4b3   :  { %2926 = vmatpush3.bf16.msra.mxu0 %v1103_v21  ;;  %2927 = vmatprep.mubr.msk.bf16.mxu0 %vm3376_vm0, %v3375_v1 }
 0x4b4   :  { %2939 = vmatprep.subr.bf16.mxu0 %v3375_v1 }
 0x4ba   :  { %2928 = vmatmul.mubr.msk.bf16.vlgmr.msra.gmra.mrb[28].mxu0 %vm222_vm2, %v1096_v24 }
 0x4bb   :  { %2943 = vmatprep.mubr.msk.bf16.mxu0 %vm3376_vm0, %v3375_v1 }
 0x4e7   :  { %v327_v18 = vpop.f32.mrb[0].mxu0 }
 0x4e8   :  { %333 = vst.msk [vmem:[#allocation2] sm:$0xff] %vm222_vm2, %v327_v18  ;;  %v2845_v25 = vpop.f32.mrb[1].mxu0 }
 0x4e9   :  { %v330_v26 = vpop.f32.mrb[2].mxu0 }
 0x4ea   :  { %v2846_v27 = vpop.f32.mrb[3].mxu0 }
 0x4ef   :  { %v440_v28 = vpop.f32.mrb[4].mxu0 }
 0x4f0   :  { %447 = vrot.lane.b32.xlu0 %v440_v28, %s3371_s13  ;;  %v2857_v29 = vpop.f32.mrb[5].mxu0 }
 0x4f1   :  { %v443_v30 = vpop.f32.mrb[6].mxu0 }
 0x4f2   :  { %v2858_v31 = vpop.f32.mrb[7].mxu0 }
 0x4f7   :  { %v557_v32 = vpop.f32.mrb[8].mxu0 }
 0x4f8   :  { %564 = vrot.lane.b32.xlu0 %v557_v32, %s3388_s27  ;;  %v2869_v33 = vpop.f32.mrb[9].mxu0  ;;  %v3109_v32 = vld [vmem:[#allocation9] sm:$0xff]  }
 0x4f9   :  { %v560_v34 = vpop.f32.mrb[10].mxu0  ;;  %v124_v33 = vld [vmem:[#allocation3] sm:$0xff] }
 0x4fa   :  { %v2870_v35 = vpop.f32.mrb[11].mxu0  ;;  %v125_v34 = vld [vmem:[#allocation3 + $0x8] sm:$0xff] }
 0x4fb   :  { %v1323_v35 = vpack.c.bf16 %v125_v34, %v124_v33 }
 0x4ff   :  { %v674_v36 = vpop.f32.mrb[12].mxu0 }
 0x500   :  { %681 = vrot.lane.b32.xlu0 %v674_v36, %s3389_s15  ;;  %v2881_v37 = vpop.f32.mrb[13].mxu0  ;;  %v3111_v36 = vld [vmem:[#allocation8] sm:$0xff]  }
 0x501   :  { %v677_v38 = vpop.f32.mrb[14].mxu0  ;;  %2940 = vmatpush3.bf16.msra.mxu0 %v3111_v36  ;;  %v3112_v37 = vld [vmem:[#allocation8 + $0x8] sm:$0xff]  }
 0x502   :  { %v2882_v39 = vpop.f32.mrb[15].mxu0  ;;  %2941 = vmatprep.subr.bf16.mxu0 %v3375_v1 }
 0x505   :  { %2942 = vmatpush3.bf16.msra.mxu0 %v3112_v37 }
 0x506   :  { %2955 = vmatprep.subr.bf16.mxu0 %v3375_v1 }
 0x562   :  { %v448_v40 = vpop.permute.xlu0 %447 }
 0x563   :  { %451 = vst.msk [vmem:[#allocation2] sm:$0xff] %vm450_vm4, %v448_v40 }
 0x56a   :  { %v565_v41 = vpop.permute.xlu0 %564 }
 0x56b   :  { %568 = vst.msk [vmem:[#allocation2] sm:$0xff] %vm567_vm5, %v565_v41 }
 0x572   :  { %v682_v42 = vpop.permute.xlu0 %681 }
 0x573   :  { %685 = vst.msk [vmem:[#allocation2] sm:$0xff] %vm684_vm6, %v682_v42 }
 0x575   :  { %v794_v44 = vpop.f32.mrb[16].mxu0 }
 0x576   :  { %800 = vst.msk [vmem:[#allocation2 + $0x8] sm:$0xff] %vm222_vm2, %v794_v44  ;;  %v2893_v45 = vpop.f32.mrb[17].mxu0 }
 0x577   :  { %v797_v46 = vpop.f32.mrb[18].mxu0  ;;  %v1248_v45 = vsub.s32 4, %v3544_v2 }
 0x578   :  { %v2894_v47 = vpop.f32.mrb[19].mxu0 }
 0x579   :  { %v1249_v46 = vrot.slane %v3563_v8, %v1248_v45  ;;  %v1254_v47 = vsub.s32 5, %v3544_v2 }
 0x57a   :  { %v1150_v62 = vld [vmem:[#allocation2] sm:$0xff] }
 0x57b   :  { %v1255_v17 = vrot.slane %v3563_v8, %v1254_v47 }
 0x57d   :  { %v907_v48 = vpop.f32.mrb[20].mxu0 }
 0x57e   :  { %914 = vrot.lane.b32.xlu1 %v907_v48, %s3371_s13  ;;  %v2905_v50 = vpop.f32.mrb[21].mxu0 }
 0x57f   :  { %v910_v51 = vpop.f32.mrb[22].mxu0 }
 0x580   :  { %v2906_v52 = vpop.f32.mrb[23].mxu0 }
 0x585   :  { %v1023_v53 = vpop.f32.mrb[24].mxu0 }
 0x586   :  { %1030 = vrot.lane.b32.xlu0 %v1023_v53, %s3388_s27  ;;  %v2917_v54 = vpop.f32.mrb[25].mxu0 }
 0x587   :  { %v1026_v56 = vpop.f32.mrb[26].mxu0 }
 0x588   :  { %v2918_v43 = vpop.f32.mrb[27].mxu0 }
 0x58d   :  { %v1139_v57 = vpop.f32.mrb[28].mxu0 }
 0x58e   :  { %1146 = vrot.lane.b32.xlu0 %v1139_v57, %s3389_s15  ;;  %v2929_v49 = vpop.f32.mrb[29].mxu0  ;;  %v1386_v57 = vsub.s32 7, %v3544_v2 }
 0x58f   :  { %v1142_v59 = vpop.f32.mrb[30].mxu0 }
 0x590   :  { %v2930_v58 = vpop.f32.mrb[31].mxu0  ;;  %v1387_v49 = vrot.slane %v3563_v8, %v1386_v57 }
 0x5f0   :  { %v915_v55 = vpop.permute.xlu1 %914 }
 0x5f1   :  { %917 = vst.msk [vmem:[#allocation2 + $0x8] sm:$0xff] %vm450_vm4, %v915_v55 }
 0x5f8   :  { %v1031_v60 = vpop.permute.xlu0 %1030 }
 0x5f9   :  { %1033 = vst.msk [vmem:[#allocation2 + $0x8] sm:$0xff] %vm567_vm5, %v1031_v60 }
 0x600   :  { %v1147_v61 = vpop.permute.xlu0 %1146 }
 0x601   :  { %1149 = vst.msk [vmem:[#allocation2 + $0x8] sm:$0xff] %vm684_vm6, %v1147_v61 }
 0x608   :  { %v1151_v63 = vld [vmem:[#allocation2 + $0x8] sm:$0xff] }
 0x609   :  { %v1152_v0 = vpack.c.bf16 %v1151_v63, %v1150_v62 }
 0x60b   :  { %2936 = vmatmul.mubr.msk.bf16.vlgmr.msra.gmra.mrb[36].mxu1 %vm146_vm1, %v1152_v0 }
 0x60c   :  { %2951 = vmatprep.mubr.msk.bf16.mxu1 %vm3376_vm0, %v3375_v1  ;;  %2948 = vmatpush3.bf16.msra.mxu1 %v3109_v32 }
 0x60d   :  { %2949 = vmatprep.subr.bf16.mxu1 %v3375_v1 }
 0x6de   :  { %v1210_v9 = vpop.f32.mrb[36].mxu1 }
 0x6df   :  { %v1211_v12 = vadd.f32 %v1210_v9, %v1160_v5  ;;  %v2937_v13 = vpop.f32.mrb[37].mxu1 }
 0x6e0   :  { %v1213_v15 = vpop.f32.mrb[38].mxu1 }
 0x6e1   :  { %v1214_v16 = vadd.f32 %v1213_v15, %v1160_v5  ;;  %v2938_v10 = vpop.f32.mrb[39].mxu1  ;;  %v1217_v19 = vadd.f32 %v1211_v12, %v3553_v6  ;;  %v1265_v5 = vsub.s32 6, %v3544_v2 }
 0x6e3   :  { %v1219_v20 = vsel %vm146_vm1, %v1217_v19, 0.0  ;;  %v1218_v21 = vadd.f32 %v1214_v16, %v3558_v7  ;;  %v3110_v7 = vld [vmem:[#allocation9 + $0x8] sm:$0xff]   ;;  %v1266_v9 = vrot.slane %v3563_v8, %v1265_v5 }
 0x6e4   :  { %1220 = vadd.xlane.f32.xlu1 %v1219_v20  ;;  %2950 = vmatpush3.bf16.msra.mxu1 %v3110_v7 }
 0x6e5   :  { %v1222_v22 = vsel %vm146_vm1, %v1218_v21, 0.0  ;;  %2961 = vmatprep.subr.bf16.mxu1 %v3375_v1 }
 0x6e6   :  { %1223 = vadd.xlane.f32.xlu0 %v1222_v22 }
 0x6e7   :  { %2952 = vmatmul.mubr.msk.bf16.vlgmr.msra.gmra.mrb[40].mxu1 %vm146_vm1, %v1323_v35 }
 0x6e8   :  { %2963 = vmatprep.mubr.msk.bf16.mxu1 %vm3376_vm0, %v3375_v1 }
 0x771   :  { %v1221_v24 = vpop.xlane.xlu1 %1220 }
 0x772   :  { %v1226_v18 = vmul.f32 0.03125, %v1221_v24 }
 0x773   :  { %v1224_v25 = vpop.xlane.xlu0 %1223 }
 0x774   :  { %v1228_v26 = vsub.f32 %v1217_v19, %v1226_v18  ;;  %v1227_v27 = vmul.f32 0.03125, %v1224_v25 }
 0x776   :  { %v1229_v28 = vsub.f32 %v1218_v21, %v1227_v27  ;;  %v1230_v29 = vmul.f32 %v1228_v26, %v1228_v26 }
 0x778   :  { %v1232_v30 = vsel %vm146_vm1, %v1230_v29, 0.0  ;;  %v1231_v31 = vmul.f32 %v1229_v28, %v1229_v28 }
 0x779   :  { %1233 = vadd.xlane.f32.xlu0 %v1232_v30 }
 0x77a   :  { %v1235_v6 = vsel %vm146_vm1, %v1231_v31, 0.0 }
 0x77b   :  { %1236 = vadd.xlane.f32.xlu1 %v1235_v6 }
 0x7ba   :  { %v3816_v59 = vpop.f32.mrb[40].mxu1 }
 0x7bb   :  { %v1388_v58 = vadd.f32 %v1387_v49, %v3816_v59  ;;  %v2953_v55 = vpop.f32.mrb[41].mxu1 }
 0x7bc   :  { %v3819_v60 = vpop.f32.mrb[42].mxu1 }
 0x7bd   :  { %v1401_v61 = vpack.c.bf16 %v1388_v58, %v1388_v58  ;;  %v1389_v62 = vadd.f32 %v1387_v49, %v3819_v60  ;;  %v2954_v63 = vpop.f32.mrb[43].mxu1 }
 0x7bf   :  { %1516 = vrot.lane.b32.xlu0 %v1401_v61, %s3381_s22  ;;  %v1406_v0 = vsel %vm222_vm2, %v1401_v61, 0  ;;  %v1863_v24 = vpack.c.bf16 %v1389_v62, %v1389_v62 }
 0x7c1   :  { %v1868_v31 = vsel %vm222_vm2, %v1863_v24, 0 }
 0x806   :  { %v1234_v38 = vpop.xlane.xlu0 %1233 }
 0x807   :  { %v1238_v39 = vmul.f32 0.03125, %v1234_v38 }
 0x808   :  { %v1237_v40 = vpop.xlane.xlu1 %1236 }
 0x809   :  { %v1240_v41 = vadd.f32 1e-05, %v1238_v39  ;;  %v1239_v42 = vmul.f32 0.03125, %v1237_v40 }
 0x80b   :  { %3153 = vrsqrt.f32 %v1240_v41  ;;  %v1241_v44 = vadd.f32 1e-05, %v1239_v42 }
 0x80d   :  { %3155 = vrsqrt.f32 %v1241_v44 }
 0x815   :  { %v3154_v48 = vpop.eup %3153 }
 0x816   :  { %v1244_v50 = vmul.f32 %v3154_v48, %v1228_v26 }
 0x817   :  { %v3156_v51 = vpop.eup %3155 }
 0x818   :  { %v1250_v52 = vmul.f32 %v1249_v46, %v1244_v50  ;;  %v1245_v14 = vmul.f32 %v3156_v51, %v1229_v28 }
 0x81a   :  { %v1251_v53 = vmul.f32 %v1249_v46, %v1245_v14  ;;  %v3803_v54 = vadd.f32 %v1255_v17, %v1250_v52 }
 0x81c   :  { %v3805_v56 = vadd.f32 %v1255_v17, %v1251_v53 }
 0x81e   :  { %v1258_v43 = vpack.c.bf16 %v3805_v56, %v3803_v54 }
 0x820   :  { %2944 = vmatmul.mubr.msk.bf16.vlgmr.msra.gmra.mrb[32].mxu0 %vm146_vm1, %v1258_v43 }
 0x821   :  { %2957 = vmatprep.mubr.msk.bf16.mxu0 %vm3376_vm0, %v3375_v1  ;;  %2956 = vmatpush3.bf16.xpose.msra.mxu0 %v1406_v0 }
 0x822   :  { %2967 = vmatprep.subr.bf16.mxu0 %v3375_v1 }
 0x831   :  { %v1517_v16 = vpop.permute.xlu0 %1516 }
 0x832   :  { %v1522_v21 = vsel %vm222_vm2, %v1517_v16, 0 }
 0x8f3   :  { %v1316_v12 = vpop.f32.mrb[32].mxu0 }
 0x8f4   :  { %v1317_v13 = vadd.f32 %v1316_v12, %v1266_v9  ;;  %v2945_v15 = vpop.f32.mrb[33].mxu0 }
 0x8f5   :  { %v1319_v10 = vpop.f32.mrb[34].mxu0 }
 0x8f6   :  { %v1400_v19 = vpack.c.bf16 %v1317_v13, %v1317_v13  ;;  %v2946_v20 = vpop.f32.mrb[35].mxu0  ;;  %v1320_v22 = vadd.f32 %v1319_v10, %v1266_v9 }
 0x8f8   :  { %1513 = vrot.lane.b32.xlu1 %v1400_v19, %s3381_s22  ;;  %1630 = vrot.lane.b32.xlu0 %v1400_v19, %s3383_s26  ;;  %v1862_v8 = vpack.c.bf16 %v1320_v22, %v1320_v22  ;;  %v3889_v22 = vld [vmem:[%s4088_s9 + $0x8] sm:$0xff] }
 0x8f9   :  { %2958 = vmatmul.mubr.msk.bf16.vlgmr.msra.gmra.mrb[36].mxu0 %vm222_vm2, %v1400_v19 }
 0x8fa   :  { %2968 = vmatpush3.bf16.xpose.msra.mxu0 %v1522_v21  ;;  %2969 = vmatprep.mubr.msk.bf16.mxu0 %vm3376_vm0, %v3375_v1 }
 0x8fb   :  { %2979 = vmatprep.subr.bf16.mxu0 %v3375_v1 }
 0x8fc   :  { %1632 = vrot.lane.b32.xlu1 %v1401_v61, %s3383_s26  ;;  %1746 = vrot.lane.b32.xlu0 %v1400_v19, %s3384_s29 }
 0x900   :  { %1748 = vrot.lane.b32.xlu1 %v1401_v61, %s3384_s29  ;;  %1975 = vrot.lane.b32.xlu0 %v1862_v8, %s3381_s22 }
 0x904   :  { %2092 = vrot.lane.b32.xlu0 %v1862_v8, %s3383_s26  ;;  %1978 = vrot.lane.b32.xlu1 %v1863_v24, %s3381_s22  ;;  %s3390_s22 = smov [#allocation14]  }
 0x908   :  { %2208 = vrot.lane.b32.xlu0 %v1862_v8, %s3384_s29  ;;  %2094 = vrot.lane.b32.xlu1 %v1863_v24, %s3383_s26 }
 0x90c   :  { %2210 = vrot.lane.b32.xlu1 %v1863_v24, %s3384_s29 }
 0x96a   :  { %v1514_v18 = vpop.permute.xlu1 %1513  ;;  %v1631_v28 = vpop.permute.xlu0 %1630 }
 0x96b   :  { %2970 = vmatmul.mubr.msk.bf16.vlgmr.msra.gmra.mrb[40].mxu0 %vm222_vm2, %v1514_v18  ;;  %v1393_v18 = vrot.slane %v3889_v22, %v193_v11 }
 0x96c   :  { %2981 = vmatprep.mubr.msk.bf16.mxu0 %vm3376_vm0, %v3375_v1 }
 0x96e   :  { %v1633_v25 = vpop.permute.xlu1 %1632  ;;  %v1747_v30 = vpop.permute.xlu0 %1746 }
 0x96f   :  { %v1638_v26 = vsel %vm222_vm2, %v1633_v25, 0 }
 0x970   :  { %2980 = vmatpush3.bf16.xpose.msra.mxu0 %v1638_v26 }
 0x971   :  { %2991 = vmatprep.subr.bf16.mxu0 %v3375_v1 }
 0x972   :  { %v1749_v27 = vpop.permute.xlu1 %1748  ;;  %v1976_v33 = vpop.permute.xlu0 %1975 }
 0x973   :  { %v1754_v29 = vsel %vm222_vm2, %v1749_v27, 0 }
 0x976   :  { %v1979_v6 = vpop.permute.xlu1 %1978  ;;  %v2093_v36 = vpop.permute.xlu0 %2092 }
 0x977   :  { %2982 = vmatmul.mubr.msk.bf16.vlgmr.msra.gmra.mrb[44].mxu0 %vm222_vm2, %v1631_v28  ;;  %v1984_v32 = vsel %vm222_vm2, %v1979_v6, 0 }
 0x978   :  { %2992 = vmatpush3.bf16.xpose.msra.mxu0 %v1754_v29  ;;  %2993 = vmatprep.mubr.msk.bf16.mxu0 %vm3376_vm0, %v3375_v1 }
 0x979   :  { %3003 = vmatprep.subr.bf16.mxu0 %v3375_v1 }
 0x97a   :  { %v2095_v7 = vpop.permute.xlu1 %2094  ;;  %v2209_v38 = vpop.permute.xlu0 %2208 }
 0x97b   :  { %v2100_v34 = vsel %vm222_vm2, %v2095_v7, 0 }
 0x97e   :  { %v2211_v35 = vpop.permute.xlu1 %2210 }
 0x97f   :  { %2994 = vmatmul.mubr.msk.bf16.vlgmr.msra.gmra.mrb[48].mxu0 %vm222_vm2, %v1747_v30  ;;  %v2216_v37 = vsel %vm222_vm2, %v2211_v35, 0 }
 0x980   :  { %3004 = vmatpush3.bf16.xpose.msra.mxu0 %v1868_v31  ;;  %3005 = vmatprep.mubr.msk.bf16.mxu0 %vm3376_vm0, %v3375_v1 }
 0x981   :  { %3015 = vmatprep.subr.bf16.mxu0 %v3375_v1 }
 0x987   :  { %3006 = vmatmul.mubr.msk.bf16.vlgmr.msra.gmra.mrb[52].mxu0 %vm222_vm2, %v1862_v8 }
 0x988   :  { %3016 = vmatpush3.bf16.xpose.msra.mxu0 %v1984_v32  ;;  %3017 = vmatprep.mubr.msk.bf16.mxu0 %vm3376_vm0, %v3375_v1 }
 0x989   :  { %3027 = vmatprep.subr.bf16.mxu0 %v3375_v1 }
 0x98f   :  { %3018 = vmatmul.mubr.msk.bf16.vlgmr.msra.gmra.mrb[56].mxu0 %vm222_vm2, %v1976_v33 }
 0x990   :  { %3028 = vmatpush3.bf16.xpose.msra.mxu0 %v2100_v34  ;;  %3029 = vmatprep.mubr.msk.bf16.mxu0 %vm3376_vm0, %v3375_v1 }
 0x991   :  { %3039 = vmatprep.subr.bf16.mxu0 %v3375_v1 }
 0x997   :  { %3030 = vmatmul.mubr.msk.bf16.vlgmr.msra.gmra.mrb[60].mxu0 %vm222_vm2, %v2093_v36 }
 0x998   :  { %3040 = vmatpush3.bf16.xpose.msra.mxu0 %v2216_v37  ;;  %3041 = vmatprep.mubr.msk.bf16.mxu0 %vm3376_vm0, %v3375_v1 }
 0x999   :  { %3051 = vmatprep.subr.bf16.mxu0 %v3375_v1 }
 0x99f   :  { %3042 = vmatmul.mubr.msk.bf16.vlgmr.msra.gmra.mrb[64].mxu0 %vm222_vm2, %v2209_v38 }
 0x9a0   :  { %3055 = vmatprep.mubr.msk.bf16.mxu0 %vm3376_vm0, %v3375_v1 }
 0x9cc   :  { %v1442_v39 = vpop.f32.mrb[36].mxu0 }
 0x9cd   :  { %v1448_v40 = vmul.f32 0.35355338, %v1442_v39  ;;  %v2959_v41 = vpop.f32.mrb[37].mxu0 }
 0x9ce   :  { %v1445_v42 = vpop.f32.mrb[38].mxu0 }
 0x9cf   :  { %v2960_v44 = vpop.f32.mrb[39].mxu0  ;;  %v1449_v46 = vsel %vm222_vm2, %v1448_v40, -inf }
 0x9d0   :  { %1450 = vmax.xlane.f32.xlu1 %v1449_v46 }
 0xa3e   :  { %v1558_v48 = vpop.f32.mrb[40].mxu0 }
 0xa3f   :  { %v1564_v50 = vmul.f32 0.35355338, %v1558_v48  ;;  %v2971_v51 = vpop.f32.mrb[41].mxu0 }
 0xa40   :  { %v1561_v52 = vpop.f32.mrb[42].mxu0 }
 0xa41   :  { %v2972_v14 = vpop.f32.mrb[43].mxu0  ;;  %v1565_v17 = vsel %vm222_vm2, %v1564_v50, -inf }
 0xa42   :  { %1566 = vmax.xlane.f32.xlu0 %v1565_v17 }
 0xa4a   :  { %v1674_v53 = vpop.f32.mrb[44].mxu0 }
 0xa4b   :  { %v1680_v43 = vmul.f32 0.35355338, %v1674_v53  ;;  %v2983_v49 = vpop.f32.mrb[45].mxu0 }
 0xa4c   :  { %v1677_v58 = vpop.f32.mrb[46].mxu0 }
 0xa4d   :  { %v2984_v55 = vpop.f32.mrb[47].mxu0  ;;  %v1681_v61 = vsel %vm222_vm2, %v1680_v43, -inf }
 0xa4e   :  { %1682 = vmax.xlane.f32.xlu0 %v1681_v61 }
 0xa52   :  { %v1790_v62 = vpop.f32.mrb[48].mxu0 }
 0xa53   :  { %v1796_v63 = vmul.f32 0.35355338, %v1790_v62  ;;  %v2995_v0 = vpop.f32.mrb[49].mxu0 }
 0xa54   :  { %v1793_v9 = vpop.f32.mrb[50].mxu0 }
 0xa55   :  { %v2996_v12 = vpop.f32.mrb[51].mxu0  ;;  %v1797_v13 = vsel %vm222_vm2, %v1796_v63, -inf }
 0xa56   :  { %1798 = vmax.xlane.f32.xlu1 %v1797_v13 }
 0xa5a   :  { %v1904_v15 = vpop.f32.mrb[52].mxu0 }
 0xa5b   :  { %v3882_v16 = vmul.f32 0.35355338, %v1904_v15  ;;  %v3007_v10 = vpop.f32.mrb[53].mxu0 }
 0xa5c   :  { %v1907_v19 = vpop.f32.mrb[54].mxu0 }
 0xa5d   :  { %v3008_v20 = vpop.f32.mrb[55].mxu0  ;;  %v1911_v21 = vsel %vm222_vm2, %v3882_v16, -inf  ;;  %v1451_v35 = vpop.xlane.xlu1 %1450 }
 0xa5e   :  { %1912 = vmax.xlane.f32.xlu0 %v1911_v21  ;;  %v1452_v41 = vsub.f32 %v1448_v40, %v1451_v35 }
 0xa60   :  { %v1453_v44 = vmul.f32 1.442695, %v1452_v41 }
 0xa62   :  { %v2020_v8 = vpop.f32.mrb[56].mxu0  ;;  %3157 = vpow2.f32 %v1453_v44 }
 0xa63   :  { %v3019_v24 = vpop.f32.mrb[57].mxu0  ;;  %v2026_v33 = vmul.f32 0.35355338, %v2020_v8 }
 0xa64   :  { %v2023_v25 = vpop.f32.mrb[58].mxu0 }
 0xa65   :  { %v3020_v26 = vpop.f32.mrb[59].mxu0  ;;  %v2027_v34 = vsel %vm222_vm2, %v2026_v33, -inf }
 0xa67   :  { %1395 = vrot.lane.b32.xlu1 %v1393_v18, %s3377_s18 }
 0xa6a   :  { %v2136_v27 = vpop.f32.mrb[60].mxu0 }
 0xa6b   :  { %v3031_v28 = vpop.f32.mrb[61].mxu0 }
 0xa6c   :  { %v2139_v29 = vpop.f32.mrb[62].mxu0  ;;  %v3158_v49 = vpop.eup %3157 }
 0xa6d   :  { %v3032_v30 = vpop.f32.mrb[63].mxu0  ;;  %v1455_v55 = vsel %vm222_vm2, %v3158_v49, 0.0 }
 0xa72   :  { %v2252_v31 = vpop.f32.mrb[64].mxu0 }
 0xa73   :  { %v3043_v6 = vpop.f32.mrb[65].mxu0  ;;  %v2258_v40 = vmul.f32 0.35355338, %v2252_v31 }
 0xa74   :  { %v2255_v32 = vpop.f32.mrb[66].mxu0 }
 0xa75   :  { %v3044_v7 = vpop.f32.mrb[67].mxu0 }
 0xa8b   :  { %2028 = vmax.xlane.f32.xlu1 %v2027_v34 }
 0xacf   :  { %v1567_v46 = vpop.xlane.xlu0 %1566 }
 0xad0   :  { %v1568_v51 = vsub.f32 %v1564_v50, %v1567_v46 }
 0xad2   :  { %v1569_v14 = vmul.f32 1.442695, %v1568_v51 }
 0xadb   :  { %v1683_v52 = vpop.xlane.xlu0 %1682 }
 0xadc   :  { %v1684_v17 = vsub.f32 %v1680_v43, %v1683_v52  ;;  %v2259_v43 = vsel %vm222_vm2, %v2258_v40, -inf }
 0xae3   :  { %v1799_v36 = vpop.xlane.xlu1 %1798 }
 0xae4   :  { %v1800_v42 = vsub.f32 %v1796_v63, %v1799_v36 }
 0xae6   :  { %v1801_v48 = vmul.f32 1.442695, %v1800_v42 }
 0xae7   :  { %v1396_v37 = vpop.permute.xlu1 %1395 }
 0xae8   :  { %v1398_v11 = vadd.f32 %v1396_v37, %v3816_v59  ;;  %v3898_v38 = vadd.f32 %v1396_v37, %v3819_v60  ;;  %3159 = vpow2.f32 %v1801_v48  ;;  %v2142_v59 = vmul.f32 0.35355338, %v2136_v27 }
 0xae9   :  { %3161 = vpow2.f32 %v1569_v14  ;;  %v1685_v60 = vmul.f32 1.442695, %v1684_v17 }
 0xaea   :  { %v1461_v39 = vpack.c.bf16 %v1398_v11, %v1398_v11  ;;  %v2143_v53 = vsel %vm222_vm2, %v2142_v59, -inf }
 0xaeb   :  { %3163 = vpow2.f32 %v1685_v60  ;;  %v1913_v19 = vpop.xlane.xlu0 %1912 }
 0xaec   :  { %1463 = vrot.lane.b32.xlu0 %v1461_v39, %s3379_s24  ;;  %1577 = vrot.lane.b32.xlu1 %v1461_v39, %s3378_s0  ;;  %v1914_v20 = vsub.f32 %v3882_v16, %v1913_v19 }
 0xaee   :  { %v1915_v21 = vmul.f32 1.442695, %v1914_v20 }
 0xaf2   :  { %v3903_v58 = vpop.eup %3159 }
 0xaf3   :  { %v1803_v50 = vsel %vm222_vm2, %v3903_v58, 0.0  ;;  %v3162_v61 = vpop.eup %3161 }
 0xaf4   :  { %v1571_v62 = vsel %vm222_vm2, %v3162_v61, 0.0 }
 0xaf5   :  { %v3910_v63 = vpop.eup %3163 }
 0xaf6   :  { %v1687_v12 = vsel %vm222_vm2, %v3910_v63, 0.0 }
 0xb0b   :  { %2144 = vmax.xlane.f32.xlu0 %v2143_v53 }
 0xb0f   :  { %1456 = vadd.xlane.f32.xlu0 %v1455_v55  ;;  %v1923_v55 = vpack.c.bf16 %v3898_v38, %v3898_v38 }
 0xb10   :  { %1804 = vadd.xlane.f32.xlu1 %v1803_v50 }
 0xb13   :  { %2260 = vmax.xlane.f32.xlu0 %v2259_v43 }
 0xb17   :  { %1572 = vadd.xlane.f32.xlu0 %v1571_v62 }
 0xb18   :  { %v2029_v0 = vpop.xlane.xlu1 %2028 }
 0xb19   :  { %v2030_v9 = vsub.f32 %v2026_v33, %v2029_v0 }
 0xb1b   :  { %v2031_v13 = vmul.f32 1.442695, %v2030_v9  ;;  %1688 = vadd.xlane.f32.xlu0 %v1687_v12 }
 0xb1d   :  { %3165 = vpow2.f32 %v2031_v13 }
 0xb1e   :  { %3167 = vpow2.f32 %v1915_v21 }
 0xb27   :  { %v3914_v15 = vpop.eup %3165 }
 0xb28   :  { %v2033_v10 = vsel %vm222_vm2, %v3914_v15, 0.0  ;;  %v3921_v8 = vpop.eup %3167 }
 0xb29   :  { %2034 = vadd.xlane.f32.xlu1 %v2033_v10  ;;  %v1917_v24 = vsel %vm222_vm2, %v3921_v8, 0.0 }
 0xb31   :  { %1693 = vrot.lane.b32.xlu0 %v1461_v39, %s3380_s4 }
 0xb3a   :  { %1809 = vrot.lane.b32.xlu1 %v1461_v39, %s3382_s25 }
 0xb50   :  { %1918 = vadd.xlane.f32.xlu0 %v1917_v24 }
 0xb5e   :  { %v1464_v18 = vpop.permute.xlu0 %1463  ;;  %v1578_v36 = vpop.permute.xlu1 %1577 }
 0xb5f   :  { %v1469_v25 = vsel %vm289_vm3, %v1464_v18, 0  ;;  %v1583_v11 = vsel %vm289_vm3, %v1578_v36, 0 }
 0xb60   :  { %2962 = vmatpush3.bf16.msra.mxu1 %v1469_v25 }
 0xb61   :  { %2973 = vmatprep.subr.bf16.mxu1 %v3375_v1 }
 0xb98   :  { %v2145_v26 = vpop.xlane.xlu0 %2144 }
 0xb99   :  { %v2146_v27 = vsub.f32 %v2142_v59, %v2145_v26 }
 0xb9b   :  { %v2147_v28 = vmul.f32 1.442695, %v2146_v27 }
 0xb9c   :  { %v1457_v16 = vpop.xlane.xlu0 %1456 }
 0xb9d   :  { %3169 = vpow2.f32 %v2147_v28  ;;  %v1805_v41 = vpop.xlane.xlu1 %1804 }
 0xb9e   :  { %3171 = vrcp.f32 %v1457_v16 }
 0xba0   :  { %v2261_v29 = vpop.xlane.xlu0 %2260 }
 0xba1   :  { %v2262_v30 = vsub.f32 %v2258_v40, %v2261_v29 }
 0xba3   :  { %v2263_v31 = vmul.f32 1.442695, %v2262_v30 }
 0xba4   :  { %v1573_v6 = vpop.xlane.xlu0 %1572 }
 0xba5   :  { %3173 = vpow2.f32 %v2263_v31 }
 0xba6   :  { %3175 = vrcp.f32 %v1573_v6 }
 0xba7   :  { %v3927_v32 = vpop.eup %3169 }
 0xba8   :  { %v3172_v7 = vpop.eup %3171  ;;  %v1689_v33 = vpop.xlane.xlu0 %1688  ;;  %v2149_v34 = vsel %vm222_vm2, %v3927_v32, 0.0 }
 0xba9   :  { %v1459_v35 = vmul.f32 %v3172_v7, %v3158_v49  ;;  %2150 = vadd.xlane.f32.xlu0 %v2149_v34  ;;  %3177 = vrcp.f32 %v1689_v33 }
 0xbaa   :  { %3179 = vrcp.f32 %v1805_v41 }
 0xbab   :  { %v1460_v37 = vpack.c.bf16 %v1459_v35, %v1459_v35 }
 0xbac   :  { %v1694_v48 = vpop.permute.xlu0 %1693 }
 0xbad   :  { %2964 = vmatmul.mubr.msk.bf16.vlgmr.msra.gmra.mrb[44].mxu1 %vm222_vm2, %v1460_v37  ;;  %v1699_v14 = vsel %vm289_vm3, %v1694_v48, 0 }
 0xbae   :  { %2974 = vmatpush3.bf16.msra.mxu1 %v1583_v11  ;;  %2975 = vmatprep.mubr.msk.bf16.mxu1 %vm3376_vm0, %v3375_v1 }
 0xbaf   :  { %v3935_v39 = vpop.eup %3173  ;;  %2985 = vmatprep.subr.bf16.mxu1 %v3375_v1 }
 0xbb0   :  { %v3176_v42 = vpop.eup %3175  ;;  %v2265_v44 = vsel %vm222_vm2, %v3935_v39, 0.0 }
 0xbb1   :  { %v1575_v46 = vmul.f32 %v3176_v42, %v3162_v61  ;;  %2266 = vadd.xlane.f32.xlu1 %v2265_v44 }
 0xbb3   :  { %v1576_v51 = vpack.c.bf16 %v1575_v46, %v1575_v46  ;;  %v3178_v52 = vpop.eup %3177 }
 0xbb4   :  { %v1691_v59 = vmul.f32 %v3178_v52, %v3910_v63  ;;  %v3180_v40 = vpop.eup %3179 }
 0xbb5   :  { %2976 = vmatmul.mubr.msk.bf16.vlgmr.msra.gmra.mrb[48].mxu1 %vm222_vm2, %v1576_v51  ;;  %v1807_v50 = vmul.f32 %v3180_v40, %v3903_v58 }
 0xbb6   :  { %2986 = vmatpush3.bf16.msra.mxu1 %v1699_v14  ;;  %v2035_v17 = vpop.xlane.xlu1 %2034  ;;  %2987 = vmatprep.mubr.msk.bf16.mxu1 %vm3376_vm0, %v3375_v1  ;;  %v1692_v49 = vpack.c.bf16 %v1691_v59, %v1691_v59 }
 0xbb7   :  { %2997 = vmatprep.subr.bf16.mxu1 %v3375_v1  ;;  %v1808_v43 = vpack.c.bf16 %v1807_v50, %v1807_v50  ;;  %v3113_v50 = vld [vmem:[#allocation11] sm:$0xff]  }
 0xbb8   :  { %3052 = vmatpush3.bf16.msra.mxu0 %v3113_v50 }
 0xbb9   :  { %3053 = vmatprep.subr.bf16.mxu0 %v3375_v1 }
 0xbba   :  { %v1810_v60 = vpop.permute.xlu1 %1809 }
 0xbbb   :  { %v1815_v53 = vsel %vm289_vm3, %v1810_v60, 0 }
 0xbbd   :  { %2988 = vmatmul.mubr.msk.bf16.vlgmr.msra.gmra.mrb[52].mxu1 %vm222_vm2, %v1692_v49 }
 0xbbe   :  { %2998 = vmatpush3.bf16.msra.mxu1 %v1815_v53  ;;  %2999 = vmatprep.mubr.msk.bf16.mxu1 %vm3376_vm0, %v3375_v1 }
 0xbbf   :  { %1925 = vrot.lane.b32.xlu0 %v1923_v55, %s3379_s24  ;;  %3009 = vmatprep.subr.bf16.mxu1 %v3375_v1 }
 0xbc3   :  { %2039 = vrot.lane.b32.xlu0 %v1923_v55, %s3378_s0 }
 0xbc5   :  { %3000 = vmatmul.mubr.msk.bf16.vlgmr.msra.gmra.mrb[56].mxu1 %vm222_vm2, %v1808_v43  ;;  %v3114_v43 = vld [vmem:[#allocation11 + $0x8] sm:$0xff]  }
 0xbc6   :  { %3011 = vmatprep.mubr.msk.bf16.mxu1 %vm3376_vm0, %v3375_v1  ;;  %3054 = vmatpush3.bf16.msra.mxu0 %v3114_v43 }
 0xbc7   :  { %2155 = vrot.lane.b32.xlu0 %v1923_v55, %s3380_s4  ;;  %3067 = vmatprep.subr.bf16.mxu0 %v3375_v1 }
 0xbcb   :  { %2271 = vrot.lane.b32.xlu0 %v1923_v55, %s3382_s25  ;;  %s2668_s25 = sshll.u32 %s3390_s22, 4  ;;  %s2669_s25 = int_to_ptr.vmem [resolvable:$true] %s2668_s25 }
 0xbcc   :  { %s3333_s26 = scalar_lea.vmem %s2669_s25, 256  ;;  %p3338_p7 = scmp.lt.s32.totalorder %s2669_s25, %s2669_s25 }
 0xbcd   :  { %p3334_p6 = scmp.ne.s32.totalorder %s2669_s25, %s3333_s26  ;;  %p3339_p8 = scmp.lt.s32.totalorder %s3333_s26, %s3333_s26 }
 0xbcf   :  { %p3340_p9 = por %p3339_p8, %p3338_p7 }
 0xbd1   :  { %p3341_p10 = pnand %p3340_p9, %p3334_p6 }
 0xbdd   :  { %v1919_v38 = vpop.xlane.xlu0 %1918 }
 0xbde   :  { %3181 = vrcp.f32 %v1919_v38 }
 0xbdf   :  { %3183 = vrcp.f32 %v2035_v17 }
 0xbe8   :  { %v3182_v58 = vpop.eup %3181 }
 0xbe9   :  { %v1921_v62 = vmul.f32 %v3182_v58, %v3921_v8  ;;  %v3184_v12 = vpop.eup %3183 }
 0xbea   :  { %v2037_v19 = vmul.f32 %v3184_v12, %v3914_v15 }
 0xbeb   :  { %v1922_v9 = vpack.c.bf16 %v1921_v62, %v1921_v62 }
 0xbec   :  { %v2038_v8 = vpack.c.bf16 %v2037_v19, %v2037_v19 }
 0xc36   :  { %v2151_v61 = vpop.xlane.xlu0 %2150 }
 0xc37   :  { %3185 = vrcp.f32 %v2151_v61 }
 0xc3a   :  { %v1926_v63 = vpop.permute.xlu0 %1925 }
 0xc3b   :  { %v1931_v0 = vsel %vm289_vm3, %v1926_v63, 0 }
 0xc3c   :  { %3010 = vmatpush3.bf16.msra.mxu1 %v1931_v0 }
 0xc3d   :  { %3021 = vmatprep.subr.bf16.mxu1 %v3375_v1 }
 0xc3e   :  { %v2040_v13 = vpop.permute.xlu0 %2039  ;;  %v2267_v20 = vpop.xlane.xlu1 %2266 }
 0xc3f   :  { %v2045_v10 = vsel %vm289_vm3, %v2040_v13, 0  ;;  %3012 = vmatmul.mubr.msk.bf16.vlgmr.msra.gmra.mrb[60].mxu1 %vm222_vm2, %v1922_v9  ;;  %3187 = vrcp.f32 %v2267_v20 }
 0xc40   :  { %3022 = vmatpush3.bf16.msra.mxu1 %v2045_v10  ;;  %3023 = vmatprep.mubr.msk.bf16.mxu1 %vm3376_vm0, %v3375_v1 }
 0xc41   :  { %3033 = vmatprep.subr.bf16.mxu1 %v3375_v1  ;;  %v3186_v24 = vpop.eup %3185 }
 0xc42   :  { %v2156_v21 = vpop.permute.xlu0 %2155  ;;  %v2153_v25 = vmul.f32 %v3186_v24, %v3927_v32  ;;  %v2334_v24 = vrot.slane %v3889_v22, %v199_v3 }
 0xc43   :  { %v2161_v18 = vsel %vm289_vm3, %v2156_v21, 0 }
 0xc44   :  { %v2154_v26 = vpack.c.bf16 %v2153_v25, %v2153_v25 }
 0xc46   :  { %v2272_v15 = vpop.permute.xlu0 %2271 }
 0xc47   :  { %3024 = vmatmul.mubr.msk.bf16.vlgmr.msra.gmra.mrb[64].mxu1 %vm222_vm2, %v2038_v8  ;;  %v2277_v28 = vsel %vm289_vm3, %v2272_v15, 0 }
 0xc48   :  { %3034 = vmatpush3.bf16.msra.mxu1 %v2161_v18  ;;  %3035 = vmatprep.mubr.msk.bf16.mxu1 %vm3376_vm0, %v3375_v1 }
 0xc49   :  { %3045 = vmatprep.subr.bf16.mxu1 %v3375_v1  ;;  %v3188_v27 = vpop.eup %3187 }
 0xc4a   :  { %v2269_v16 = vmul.f32 %v3188_v27, %v3935_v39 }
 0xc4c   :  { %v2270_v29 = vpack.c.bf16 %v2269_v16, %v2269_v16 }
 0xc4f   :  { %3036 = vmatmul.mubr.msk.bf16.vlgmr.msra.gmra.mrb[68].mxu1 %vm222_vm2, %v2154_v26 }
 0xc50   :  { %3046 = vmatpush3.bf16.msra.mxu1 %v2277_v28  ;;  %3047 = vmatprep.mubr.msk.bf16.mxu1 %vm3376_vm0, %v3375_v1 }
 0xc51   :  { %3059 = vmatprep.subr.bf16.mxu1 %v3375_v1 }
 0xc57   :  { %3048 = vmatmul.mubr.msk.bf16.vlgmr.msra.gmra.mrb[72].mxu1 %vm222_vm2, %v2270_v29 }
 0xc58   :  { %3063 = vmatprep.mubr.msk.bf16.mxu1 %vm3376_vm0, %v3375_v1 }
 0xc80   :  { %v1505_v30 = vpop.f32.mrb[44].mxu1 }
 0xc81   :  { %1511 = vst.msk [vmem:[#allocation2] sm:$0xff] %vm222_vm2, %v1505_v30  ;;  %v2965_v31 = vpop.f32.mrb[45].mxu1 }
 0xc82   :  { %v1508_v6 = vpop.f32.mrb[46].mxu1 }
 0xc83   :  { %v2966_v32 = vpop.f32.mrb[47].mxu1 }
 0xc88   :  { %v1619_v7 = vpop.f32.mrb[48].mxu1 }
 0xc89   :  { %1626 = vrot.lane.b32.xlu0 %v1619_v7, %s3371_s13  ;;  %v2977_v33 = vpop.f32.mrb[49].mxu1 }
 0xc8a   :  { %v1622_v34 = vpop.f32.mrb[50].mxu1 }
 0xc8b   :  { %v2978_v35 = vpop.f32.mrb[51].mxu1 }
 0xc90   :  { %v1735_v36 = vpop.f32.mrb[52].mxu1 }
 0xc91   :  { %1742 = vrot.lane.b32.xlu0 %v1735_v36, %s3388_s27  ;;  %v2989_v37 = vpop.f32.mrb[53].mxu1 }
 0xc92   :  { %v1738_v11 = vpop.f32.mrb[54].mxu1 }
 0xc93   :  { %v2990_v39 = vpop.f32.mrb[55].mxu1  ;;  %v3116_v11 = vld [vmem:[#allocation12 + $0x8] sm:$0xff]  }
 0xc94   :  { %v3117_v39 = vld [vmem:[%s4087_s8] sm:$0xff]  }
 0xc98   :  { %v1851_v41 = vpop.f32.mrb[56].mxu1 }
 0xc99   :  { %1858 = vrot.lane.b32.xlu0 %v1851_v41, %s3389_s15  ;;  %v3001_v42 = vpop.f32.mrb[57].mxu1  ;;  %v3118_v41 = vld [vmem:[%s4087_s8 + $0x8] sm:$0xff]  }
 0xc9a   :  { %v1854_v44 = vpop.f32.mrb[58].mxu1 }
 0xc9b   :  { %v3002_v46 = vpop.f32.mrb[59].mxu1 }
 0xcfb   :  { %v1627_v48 = vpop.permute.xlu0 %1626 }
 0xcfc   :  { %1629 = vst.msk [vmem:[#allocation2] sm:$0xff] %vm450_vm4, %v1627_v48 }
 0xd03   :  { %v1743_v51 = vpop.permute.xlu0 %1742 }
 0xd04   :  { %1745 = vst.msk [vmem:[#allocation2] sm:$0xff] %vm567_vm5, %v1743_v51 }
 0xd0b   :  { %v1859_v52 = vpop.permute.xlu0 %1858 }
 0xd0c   :  { %1861 = vst.msk [vmem:[#allocation2] sm:$0xff] %vm684_vm6, %v1859_v52 }
 0xd12   :  { %v1967_v14 = vpop.f32.mrb[60].mxu1 }
 0xd13   :  { %1973 = vst.msk [vmem:[#allocation2 + $0x8] sm:$0xff] %vm222_vm2, %v1967_v14  ;;  %v3013_v17 = vpop.f32.mrb[61].mxu1  ;;  %v2324_v20 = vld [vmem:[#allocation2] sm:$0xff]  ;;  %v2422_v14 = vrot.slane %v3889_v22, %v209_v23  ;;  %v3120_v23 = vld [vmem:[%s4087_s8 + $0x18] sm:$0xff]  }
 0xd14   :  { %v1970_v59 = vpop.f32.mrb[62].mxu1 }
 0xd15   :  { %v3014_v60 = vpop.f32.mrb[63].mxu1 }
 0xd1a   :  { %v2081_v53 = vpop.f32.mrb[64].mxu1 }
 0xd1b   :  { %2088 = vrot.lane.b32.xlu1 %v2081_v53, %s3371_s13  ;;  %v3025_v49 = vpop.f32.mrb[65].mxu1  ;;  %v2428_v53 = vrot.slane %v3889_v22, %v1159_v4  ;;  %v2730_v4 = vld [vmem:[%s4089_s10] ss:$0 sm:$0xff] }
 0xd1c   :  { %v2084_v40 = vpop.f32.mrb[66].mxu1 }
 0xd1d   :  { %v3026_v55 = vpop.f32.mrb[67].mxu1 }
 0xd22   :  { %v2197_v38 = vpop.f32.mrb[68].mxu1 }
 0xd23   :  { %2204 = vrot.lane.b32.xlu0 %v2197_v38, %s3388_s27  ;;  %v3037_v58 = vpop.f32.mrb[69].mxu1 }
 0xd24   :  { %v2200_v61 = vpop.f32.mrb[70].mxu1  ;;  %v3119_v58 = vld [vmem:[%s4087_s8 + $0x10] sm:$0xff]  }
 0xd25   :  { %v3038_v62 = vpop.f32.mrb[71].mxu1 }
 0xd2a   :  { %v2313_v63 = vpop.f32.mrb[72].mxu1 }
 0xd2b   :  { %2320 = vrot.lane.b32.xlu0 %v2313_v63, %s3389_s15  ;;  %v3049_v0 = vpop.f32.mrb[73].mxu1 }
 0xd2c   :  { %v2316_v9 = vpop.f32.mrb[74].mxu1 }
 0xd2d   :  { %v3050_v12 = vpop.f32.mrb[75].mxu1 }
 0xd8d   :  { %v2089_v13 = vpop.permute.xlu1 %2088 }
 0xd8e   :  { %2091 = vst.msk [vmem:[#allocation2 + $0x8] sm:$0xff] %vm450_vm4, %v2089_v13 }
 0xd95   :  { %v2205_v10 = vpop.permute.xlu0 %2204 }
 0xd96   :  { %2207 = vst.msk [vmem:[#allocation2 + $0x8] sm:$0xff] %vm567_vm5, %v2205_v10 }
 0xd9d   :  { %v2321_v19 = vpop.permute.xlu0 %2320 }
 0xd9e   :  { %2323 = vst.msk [vmem:[#allocation2 + $0x8] sm:$0xff] %vm684_vm6, %v2321_v19 }
 0xda5   :  { %v2325_v21 = vld [vmem:[#allocation2 + $0x8] sm:$0xff] }
 0xda6   :  { %v2326_v8 = vpack.c.bf16 %v2325_v21, %v2324_v20 }
 0xda8   :  { %3056 = vmatmul.mubr.msk.bf16.vlgmr.msra.gmra.mrb[68].mxu0 %vm146_vm1, %v2326_v8 }
 0xda9   :  { %3075 = vmatprep.mubr.msk.bf16.mxu0 %vm3376_vm0, %v3375_v1  ;;  %3068 = vmatpush3.bf16.msra.mxu0 %v3117_v39 }
 0xdaa   :  { %3069 = vmatprep.subr.bf16.mxu0 %v3375_v1 }
 0xdad   :  { %3070 = vmatpush3.bf16.msra.mxu0 %v3118_v41 }
 0xdae   :  { %3071 = vmatprep.subr.bf16.mxu0 %v3375_v1 }
 0xdb1   :  { %3072 = vmatpush3.bf16.msra.mxu0 %v3119_v58 }
 0xdb2   :  { %3073 = vmatprep.subr.bf16.mxu0 %v3375_v1 }
 0xdb5   :  { %3074 = vmatpush3.bf16.msra.mxu0 %v3120_v23 }
 0xe7b   :  { %v2384_v18 = vpop.f32.mrb[68].mxu0 }
 0xe7c   :  { %v2385_v25 = vadd.f32 %v2384_v18, %v2334_v24  ;;  %v3057_v15 = vpop.f32.mrb[69].mxu0 }
 0xe7d   :  { %v2387_v26 = vpop.f32.mrb[70].mxu0 }
 0xe7e   :  { %v2388_v27 = vadd.f32 %v2387_v26, %v2334_v24  ;;  %v3058_v28 = vpop.f32.mrb[71].mxu0  ;;  %v2391_v16 = vadd.f32 %v2385_v25, %v3803_v54 }
 0xe80   :  { %v2392_v29 = vadd.f32 %v2388_v27, %v3805_v56  ;;  %v2393_v30 = vsel %vm146_vm1, %v2391_v16, 0.0  ;;  %v3115_v56 = vld [vmem:[#allocation12] sm:$0xff]  }
 0xe81   :  { %2394 = vadd.xlane.f32.xlu1 %v2393_v30  ;;  %3060 = vmatpush3.bf16.msra.mxu1 %v3115_v56 }
 0xe82   :  { %v2396_v31 = vsel %vm146_vm1, %v2392_v29, 0.0  ;;  %3061 = vmatprep.subr.bf16.mxu1 %v3375_v1  ;;  %v2513_v1 = vrot.slane %v3889_v22, %v1248_v45 }
 0xe83   :  { %2397 = vadd.xlane.f32.xlu0 %v2396_v31 }
 0xe85   :  { %3062 = vmatpush3.bf16.msra.mxu1 %v3116_v11  ;;  %v2614_v11 = vrot.slane %v3889_v22, %v1254_v47 }
 0xf0e   :  { %v2395_v6 = vpop.xlane.xlu1 %2394 }
 0xf0f   :  { %v2399_v32 = vmul.f32 0.03125, %v2395_v6 }
 0xf10   :  { %v2398_v7 = vpop.xlane.xlu0 %2397 }
 0xf11   :  { %v2401_v3 = vsub.f32 %v2391_v16, %v2399_v32  ;;  %v2400_v33 = vmul.f32 0.03125, %v2398_v7 }
 0xf13   :  { %v2402_v34 = vsub.f32 %v2392_v29, %v2400_v33  ;;  %v2403_v35 = vmul.f32 %v2401_v3, %v2401_v3 }
 0xf15   :  { %v2405_v36 = vsel %vm146_vm1, %v2403_v35, 0.0  ;;  %v2404_v37 = vmul.f32 %v2402_v34, %v2402_v34 }
 0xf16   :  { %2406 = vadd.xlane.f32.xlu0 %v2405_v36 }
 0xf17   :  { %v2408_v54 = vsel %vm146_vm1, %v2404_v37, 0.0 }
 0xf18   :  { %2409 = vadd.xlane.f32.xlu1 %v2408_v54 }
 0xfa3   :  { %v2407_v42 = vpop.xlane.xlu0 %2406 }
 0xfa4   :  { %v2411_v44 = vmul.f32 0.03125, %v2407_v42  ;;  %v2620_v42 = vrot.slane %v3889_v22, %v1265_v5 }
 0xfa5   :  { %v2410_v46 = vpop.xlane.xlu1 %2409 }
 0xfa6   :  { %v2413_v48 = vadd.f32 1e-05, %v2411_v44  ;;  %v2412_v51 = vmul.f32 0.03125, %v2410_v46 }
 0xfa8   :  { %3189 = vrsqrt.f32 %v2413_v48  ;;  %v2414_v52 = vadd.f32 1e-05, %v2412_v51 }
 0xfaa   :  { %3191 = vrsqrt.f32 %v2414_v52 }
 0xfb2   :  { %v3190_v17 = vpop.eup %3189 }
 0xfb3   :  { %v2417_v59 = vmul.f32 %v3190_v17, %v2401_v3 }
 0xfb4   :  { %v3192_v60 = vpop.eup %3191 }
 0xfb5   :  { %v2423_v49 = vmul.f32 %v2422_v14, %v2417_v59  ;;  %v2418_v40 = vmul.f32 %v3192_v60, %v2402_v34 }
 0xfb7   :  { %v2424_v55 = vmul.f32 %v2422_v14, %v2418_v40  ;;  %v2429_v50 = vadd.f32 %v2428_v53, %v2423_v49 }
 0xfb9   :  { %v2430_v43 = vadd.f32 %v2428_v53, %v2424_v55 }
 0xfbb   :  { %v2432_v38 = vpack.c.bf16 %v2430_v43, %v2429_v50 }
 0xfbd   :  { %3064 = vmatmul.mubr.msk.bf16.vlgmr.msra.gmra.mrb[76].mxu1 %vm146_vm1, %v2432_v38 }
0x1090   :  { %v2492_v61 = vpop.f32.mrb[76].mxu1 }
0x1091   :  { %v2493_v62 = vadd.f32 %v2730_v4, %v2492_v61  ;;  %v3065_v63 = vpop.f32.mrb[77].mxu1 }
0x1092   :  { %v2495_v0 = vpop.f32.mrb[78].mxu1 }
0x1093   :  { %v2496_v9 = vadd.f32 %v2730_v4, %v2495_v0  ;;  %v3066_v12 = vpop.f32.mrb[79].mxu1  ;;  %v2499_v13 = vmax.f32 %v2493_v62, 0.0  ;;  %v2652_v0 = vrot.slane %v3889_v22, %v1386_v57 }
0x1095   :  { %v2500_v10 = vmax.f32 %v2496_v9, 0.0 }
0x1097   :  { %v2501_v19 = vpack.c.bf16 %v2500_v10, %v2499_v13  ;;  %v2739_v10 = vld [vmem:[%s4088_s9 + $0x10] ss:$0 sm:$0xff] }
0x1099   :  { %3076 = vmatmul.mubr.msk.bf16.vlgmr.msra.gmra.mrb[72].mxu0 %vm2538_vm7, %v2501_v19 }
0x116c   :  { %v2576_v20 = vpop.f32.mrb[72].mxu0 }
0x116d   :  { %v2577_v21 = vadd.f32 %v2576_v20, %v2513_v1  ;;  %v3077_v8 = vpop.f32.mrb[73].mxu0 }
0x116e   :  { %v2579_v24 = vpop.f32.mrb[74].mxu0 }
0x116f   :  { %v2583_v18 = vadd.f32 %v2577_v21, %v2429_v50  ;;  %v2580_v25 = vadd.f32 %v2579_v24, %v2513_v1  ;;  %v3078_v15 = vpop.f32.mrb[75].mxu0 }
0x1171   :  { %v2585_v26 = vsel %vm146_vm1, %v2583_v18, 0.0  ;;  %v2584_v27 = vadd.f32 %v2580_v25, %v2430_v43 }
0x1172   :  { %2586 = vadd.xlane.f32.xlu0 %v2585_v26 }
0x1173   :  { %v2588_v28 = vsel %vm146_vm1, %v2584_v27, 0.0 }
0x1174   :  { %2589 = vadd.xlane.f32.xlu1 %v2588_v28 }
0x11ff   :  { %v2587_v16 = vpop.xlane.xlu0 %2586 }
0x1200   :  { %v2591_v29 = vmul.f32 0.03125, %v2587_v16 }
0x1201   :  { %v2590_v30 = vpop.xlane.xlu1 %2589 }
0x1202   :  { %v2593_v31 = vsub.f32 %v2583_v18, %v2591_v29  ;;  %v2592_v6 = vmul.f32 0.03125, %v2590_v30 }
0x1204   :  { %v2594_v45 = vsub.f32 %v2584_v27, %v2592_v6  ;;  %v2595_v32 = vmul.f32 %v2593_v31, %v2593_v31 }
0x1206   :  { %v2597_v7 = vsel %vm146_vm1, %v2595_v32, 0.0  ;;  %v2596_v3 = vmul.f32 %v2594_v45, %v2594_v45 }
0x1207   :  { %2598 = vadd.xlane.f32.xlu0 %v2597_v7 }
0x1208   :  { %v2600_v33 = vsel %vm146_vm1, %v2596_v3, 0.0 }
0x1209   :  { %2601 = vadd.xlane.f32.xlu1 %v2600_v33 }
0x1294   :  { %v2599_v34 = vpop.xlane.xlu0 %2598 }
0x1295   :  { %v2603_v35 = vmul.f32 0.03125, %v2599_v34 }
0x1296   :  { %v2602_v36 = vpop.xlane.xlu1 %2601 }
0x1297   :  { %v2605_v37 = vadd.f32 1e-05, %v2603_v35  ;;  %v2604_v54 = vmul.f32 0.03125, %v2602_v36 }
0x1299   :  { %3193 = vrsqrt.f32 %v2605_v37  ;;  %v2606_v56 = vadd.f32 1e-05, %v2604_v54 }
0x129b   :  { %3195 = vrsqrt.f32 %v2606_v56 }
0x12a3   :  { %v3194_v39 = vpop.eup %3193 }
0x12a4   :  { %v2609_v41 = vmul.f32 %v3194_v39, %v2593_v31 }
0x12a5   :  { %v3196_v44 = vpop.eup %3195 }
0x12a6   :  { %v2615_v46 = vmul.f32 %v2614_v11, %v2609_v41  ;;  %v2610_v48 = vmul.f32 %v3196_v44, %v2594_v45 }
0x12a8   :  { %v2621_v51 = vadd.f32 %v2620_v42, %v2615_v46  ;;  %v2616_v52 = vmul.f32 %v2614_v11, %v2610_v48 }
0x12aa   :  { %v2623_v14 = vsel %vm146_vm1, %v2621_v51, 0.0  ;;  %v2622_v17 = vadd.f32 %v2620_v42, %v2616_v52 }
0x12ab   :  { %2624 = vadd.xlane.f32.xlu0 %v2623_v14 }
0x12ac   :  { %v2626_v59 = vsel %vm146_vm1, %v2622_v17, 0.0 }
0x12ad   :  { %2627 = vadd.xlane.f32.xlu1 %v2626_v59 }
0x1338   :  { %v2625_v60 = vpop.xlane.xlu0 %2624 }
0x1339   :  { %v2629_v47 = vmul.f32 0.03125, %v2625_v60 }
0x133a   :  { %v2628_v53 = vpop.xlane.xlu1 %2627 }
0x133b   :  { %v2631_v49 = vsub.f32 %v2621_v51, %v2629_v47  ;;  %v2630_v40 = vmul.f32 0.03125, %v2628_v53 }
0x133d   :  { %v2632_v55 = vsub.f32 %v2622_v17, %v2630_v40  ;;  %v2633_v50 = vmul.f32 %v2631_v49, %v2631_v49 }
0x133f   :  { %v2635_v5 = vsel %vm146_vm1, %v2633_v50, 0.0  ;;  %v2634_v43 = vmul.f32 %v2632_v55, %v2632_v55 }
0x1340   :  { %2636 = vadd.xlane.f32.xlu0 %v2635_v5 }
0x1341   :  { %v2638_v38 = vsel %vm146_vm1, %v2634_v43, 0.0 }
0x1342   :  { %2639 = vadd.xlane.f32.xlu1 %v2638_v38 }
0x13cd   :  { %v2637_v58 = vpop.xlane.xlu0 %2636 }
0x13ce   :  { %v2641_v23 = vmul.f32 0.03125, %v2637_v58 }
0x13cf   :  { %v2640_v4 = vpop.xlane.xlu1 %2639 }
0x13d0   :  { %v2643_v61 = vadd.f32 1e-05, %v2641_v23  ;;  %v2642_v62 = vmul.f32 0.03125, %v2640_v4 }
0x13d2   :  { %3197 = vrsqrt.f32 %v2643_v61  ;;  %v2644_v63 = vadd.f32 1e-05, %v2642_v62 }
0x13d4   :  { %3199 = vrsqrt.f32 %v2644_v63 }
0x13dc   :  { %v3198_v9 = vpop.eup %3197 }
0x13dd   :  { %v2647_v12 = vmul.f32 %v3198_v9, %v2631_v49 }
0x13de   :  { %v3200_v13 = vpop.eup %3199 }
0x13df   :  { %v2648_v19 = vmul.f32 %v3200_v13, %v2632_v55  ;;  %v2653_v1 = vmul.f32 %v2652_v0, %v2647_v12 }
0x13e1   :  { %v2654_v20 = vmul.f32 %v2652_v0, %v2648_v19  ;;  %v2659_v21 = vadd.f32 %v2739_v10, %v2653_v1 }
0x13e3   :  { %v2660_v8 = vadd.f32 %v2739_v10, %v2654_v20  ;;  %2661 = vst.msk [vmem:[#allocation14] sm:$0xff] %vm146_vm1, %v2659_v21 }
0x13e5   :  { %2662 = vst.msk [vmem:[#allocation14 + $0x8] sm:$0xff] %vm146_vm1, %v2660_v8 }
0x13e6   :  { %3344 = shalt.err (!%p3341_p10)
}
0x13e7   :  { %s3345_s30 = scalar_lea.hbm %s4090_s11, 256 }
0x13e8   :  { %p3346_p11 = scmp.ne.s32.totalorder %s4090_s11, %s3345_s30  ;;  %p3349_p12 = scmp.lt.u32.totalorder %s3345_s30, %s4090_s11 }
0x13ea   :  { %p3351_p13 = pnand %p3349_p12, %p3346_p11 }
0x13ec   :  { %3354 = shalt.err (!%p3351_p13)
}
0x13ed   :  { %2674 = dma.vmem_to_hbm [thread:$0]  %s2669_s25, 256, %s4090_s11, [#allocation5], %s3370_s5, %s3370_s5, %s3371_s13  }
0x13ee   :  { %3363 = dma.done.wait [#allocation5], 256  }
0x13ef   :  { %3364 = vsyncadd [#allocation5], 4294967040 }
0x13f0   :  { %2678 = vsyncpa [#allocation4], 1 }
0x13f1   :  { %2679 = vsyncpa [#allocation7], 1 }
0x13f2   :  { %2680 = vsyncpa [#allocation10], 1 }
0x13f3   :  { %2681 = vsyncpa [#allocation13], 1 }
0x13f4   :  { %2682 = vsyncpa [#allocation5], 1 }

</bundles_post_ra>
